<compile_context>
chip_gen: v7x
topology: tpu7x:2x2x1
jax: 0.10.0
libtpu: 0.0.40
codegen_flags: <defaults>
</compile_context>

<pallas_src>
import jax
import jax.numpy as jnp
from jax import lax
from jax.experimental import pallas as pl
from jax.experimental.pallas import tpu as pltpu

LN_EPS = 1e-5
_SQRT_HALF = 0.7071067811865476


# ------------------------------------------------------------ chip awareness
def _device_kind():
    try:
        return jax.devices()[0].device_kind.lower()
    except Exception:
        return ""


_KIND = _device_kind()
_IS_V7 = "v7" in _KIND


def _vmem_limit_bytes():
    try:
        cap = int(pltpu.get_tpu_info().vmem_capacity_bytes)
    except Exception:
        cap = (64 if _IS_V7 else 128) * 1024 * 1024
    # ~70% of physical VMEM, clamped to a range Mosaic always accepts.
    return max(32 << 20, min(int(cap * 0.7), 100 << 20))


_VMEM_LIMIT = _vmem_limit_bytes()

# bf16 softmax exp only where the EUP has bf16 (v6e / v7x); f32 elsewhere.
_SOFTMAX_EXP_DTYPE = (jnp.bfloat16 if ("v6" in _KIND or "v7" in _KIND)
                      else jnp.float32)


def _cparams(sem):
    return pltpu.CompilerParams(dimension_semantics=sem,
                                vmem_limit_bytes=_VMEM_LIMIT)


def _row_tiles(m):
    # bigger row tiles on the 128 MiB-VMEM chips, smaller on v7x (64 MiB).
    tmax = 256 if _IS_V7 else 512
    tm = m if m <= tmax else tmax
    return tm, pl.cdiv(m, tm)


# ----------------------------- single-buffering probe for constant weights --
def _probe_single_buffer_mode():
    """Grid-constant weight blocks don't need double buffering; feature-probe
    BlockSpec(pipeline_mode=pl.Buffered(1)) once, fall back silently."""
    if not hasattr(pl, "Buffered"):
        return None

    def _k(x_ref, o_ref):
        o_ref[...] = x_ref[...] + 1.0

    try:
        mode = pl.Buffered(buffer_count=1)
        out = pl.pallas_call(
            _k,
            out_shape=jax.ShapeDtypeStruct((16, 128), jnp.float32),
            grid=(2,),
            in_specs=[pl.BlockSpec((8, 128), lambda i: (0, 0),
                                   pipeline_mode=mode)],
            out_specs=pl.BlockSpec((8, 128), lambda i: (i, 0)),
        )(jnp.zeros((16, 128), jnp.float32))
        jax.block_until_ready(out)
        return mode
    except Exception:
        return None


_WEIGHT_PIPELINE_MODE = _probe_single_buffer_mode()


def _spec(shape, index_map, constant=False):
    if constant and _WEIGHT_PIPELINE_MODE is not None:
        return pl.BlockSpec(shape, index_map,
                            pipeline_mode=_WEIGHT_PIPELINE_MODE)
    return pl.BlockSpec(shape, index_map)


# ------------------------------------------------------------ in-kernel math
def _layernorm(x, gamma_row, beta_row):
    mu = jnp.mean(x, axis=-1, keepdims=True)
    xc = x - mu
    var = jnp.mean(xc * xc, axis=-1, keepdims=True)
    return xc * lax.rsqrt(var + LN_EPS) * gamma_row + beta_row


def _erf(z):
    # Abramowitz & Stegun 7.1.26 (|err| <= 1.5e-7) — exact-erf GELU without
    # relying on an erf primitive inside Mosaic.
    a1, a2, a3, a4, a5 = (0.254829592, -0.284496736, 1.421413741,
                          -1.453152027, 1.061405429)
    p = 0.3275911
    s = jnp.where(z >= 0.0, 1.0, -1.0)
    az = jnp.abs(z)
    t = 1.0 / (1.0 + p * az)
    poly = ((((a5 * t + a4) * t + a3) * t + a2) * t + a1) * t
    return s * (1.0 - poly * jnp.exp(-az * az))


def _gelu(x):
    return 0.5 * x * (1.0 + _erf(x * _SQRT_HALF))


# ----------------------- fused attention sublayer kernel --------------------
def _make_attention_kernel(T, D, H, hd, Pp):
    inv_hd = 1.0 / float(hd)
    bf16 = jnp.bfloat16

    def kernel(x_ref, g1_ref, b1_ref, qkvw_ref, qkvb_ref, qkg_ref, qkb_ref,
               indh_ref, indhp_ref, pmat_ref, coef_ref, outw_ref, outb_ref,
               o_ref):
        x = x_ref[...]                                          # [T, D] f32

        # --- norm1 + fused QKV projection (bf16 MXU operands, f32 accum) ---
        xn = _layernorm(x, g1_ref[...], b1_ref[...])
        qkv = jnp.dot(xn.astype(bf16), qkvw_ref[...],
                      preferred_element_type=jnp.float32) + qkvb_ref[...]
        q = qkv[:, :D]
        k = qkv[:, D:2 * D]
        v_bf = qkv[:, 2 * D:].astype(bf16)

        # --- per-head LayerNorm over head_dim for q and k, with q/k and
        #     x/x^2 stacked along rows so each indicator matmul runs once ---
        indh = indh_ref[...]                                    # [D, H]
        qk = jnp.concatenate([q, k], axis=0)                    # [2T, D]
        stacked = jnp.concatenate([qk, qk * qk], axis=0)        # [4T, D]
        moments = jnp.dot(stacked, indh,
                          preferred_element_type=jnp.float32) * inv_hd
        mom_full = lax.dot_general(moments, indh, (((1,), (1,)), ((), ())),
                                   preferred_element_type=jnp.float32)
        m_full = mom_full[:2 * T]
        e2_full = mom_full[2 * T:]
        var = jnp.maximum(e2_full - m_full * m_full, 0.0)       # no NaN
        qkn = ((qk - m_full) * lax.rsqrt(var + LN_EPS) * qkg_ref[...]
               + qkb_ref[...])                                  # [2T, D]

        # --- splat factors for every (head, splat, point) column at once:
        #     ||x-p||^2 = ||x||^2 - 2 x.p + ||p||^2 on the MXU ---
        pmat = pmat_ref[...]                                    # [D, H*Pp]
        indhp = indhp_ref[...]                                  # [D, H*Pp]
        pn2 = coef_ref[0:1, :]
        outer_c = coef_ref[1:2, :]
        hole_c = coef_ref[2:3, :]
        flag_c = coef_ref[3:4, :]
        iscen_c = coef_ref[4:5, :]
        wq_c = coef_ref[5:6, :]

        cross = jnp.dot(qkn, pmat, preferred_element_type=jnp.float32)
        n2 = jnp.dot(qkn * qkn, indhp, preferred_element_type=jnp.float32)
        d2 = jnp.maximum(n2 - 2.0 * cross + pn2, 0.0)
        d = jnp.sqrt(d2)
        simple = jnp.abs(d - outer_c)
        torus = jnp.sqrt(simple * simple + hole_c * hole_c)
        cmplx = jnp.abs(torus - hole_c)
        sdist = flag_c * simple + (1.0 - flag_c) * cmplx
        # each column is either a torus-surface (center) or an entry-point
        # column, never both: select the exponent, ONE exp total.
        arg = iscen_c * (sdist * sdist) + (1.0 - iscen_c) * d2
        fac = jnp.exp(-0.5 * arg)                               # [2T, H*Pp]

        qf = fac[:T] * wq_c                                     # [T, H*Pp]
        kf = fac[T:]                                            # [T, H*Pp]

        # --- per head: rank-Pp logits -> softmax -> attn @ V (normalize
        #     after the V matmul, exact divide) ---
        heads = []
        for h in range(H):                                      # static unroll
            qfh = qf[:, h * Pp:(h + 1) * Pp]
            kfh = kf[:, h * Pp:(h + 1) * Pp]
            logits = lax.dot_general(qfh, kfh, (((1,), (1,)), ((), ())),
                                     preferred_element_type=jnp.float32)
            mrow = jnp.max(logits, axis=-1, keepdims=True)
            p = jnp.exp((logits - mrow).astype(_SOFTMAX_EXP_DTYPE))
            denom = jnp.sum(p.astype(jnp.float32), axis=-1, keepdims=True)
            vh = v_bf[:, h * hd:(h + 1) * hd]
            oh = jnp.dot(p.astype(bf16), vh,
                         preferred_element_type=jnp.float32)    # [T, hd]
            heads.append(oh * (1.0 / denom))
        o_concat = jnp.concatenate(heads, axis=-1)              # [T, D]

        # --- single [T,D] x [D,D] out-projection + residual ---
        y = x + outb_ref[...] + jnp.dot(o_concat.astype(bf16), outw_ref[...],
                                        preferred_element_type=jnp.float32)
        o_ref[...] = y

    return kernel


def attention_sublayer(x2d, ops, B, T, H, hd):
    # TODO(synk): for long T add a query-tile grid axis + online softmax
    # (flash-style) instead of the per-head full [T,T] logits.
    D = H * hd
    HPp = ops["pmat"].shape[1]
    Pp = HPp // H
    kernel = _make_attention_kernel(T, D, H, hd, Pp)

    def const(shape):
        return _spec(shape, lambda b: (0, 0), constant=True)

    return pl.pallas_call(
        kernel,
        out_shape=jax.ShapeDtypeStruct((B * T, D), jnp.float32),
        grid=(B,),
        in_specs=[
            pl.BlockSpec((T, D), lambda b: (b, 0)),   # this batch's rows
            const((1, D)), const((1, D)),             # norm1 gamma / beta
            const((D, 3 * D)), const((1, 3 * D)),     # qkv weight(bf16)/bias
            const((1, D)), const((1, D)),             # qk-norm gamma / beta
            const((D, H)),                            # per-head indicator
            const((D, HPp)),                          # per-point indicator
            const((D, HPp)),                          # block-diag point matrix
            const((6, HPp)),                          # packed per-column scalars
            const((D, D)), const((1, D)),             # out-proj weight(bf16)/bias
        ],
        out_specs=pl.BlockSpec((T, D), lambda b: (b, 0)),
        compiler_params=_cparams(("parallel",)),
    )(x2d, ops["g1"], ops["b1"], ops["qkv_w"], ops["qkv_b"], ops["qk_g"],
      ops["qk_b"], ops["indh"], ops["indhp"], ops["pmat"], ops["coefs"],
      ops["out_w"], ops["out_b"])


def build_attention_operands(blk):
    """Geometry matrices / packed scalar table (computed ONCE per layer)."""
    H, S, hd = blk["centers"].shape
    NE = blk["entry_points"].shape[2]
    D = H * hd
    P = S * (1 + NE)
    Pp = ((P + 7) // 8) * 8            # pad splat columns to a multiple of 8
    f32 = jnp.float32

    centers = blk["centers"].astype(f32)                       # [H, S, hd]
    entries = blk["entry_points"].astype(f32)                  # [H, S, NE, hd]
    pts = jnp.concatenate([centers[:, :, None, :], entries], axis=2)
    pts = pts.reshape(H, P, hd)
    pts_p = jnp.pad(pts, ((0, 0), (0, Pp - P), (0, 0)))        # [H, Pp, hd]

    eye_h = jnp.eye(H, dtype=f32)
    pmat = (eye_h[:, None, :, None] *
            jnp.swapaxes(pts_p, 1, 2)[:, :, None, :]).reshape(D, H * Pp)
    indhp = jnp.kron(eye_h, jnp.ones((hd, Pp), f32))           # [D, H*Pp]
    indh = jnp.kron(eye_h, jnp.ones((hd, 1), f32))             # [D, H]
    pn2_pp = jnp.sum(pts_p * pts_p, axis=-1)                   # [H, Pp]

    outer = jnp.abs(blk["outer_radius"]).astype(f32) + 1e-8    # [H, S]
    hole = jnp.abs(blk["hole_radius"]).astype(f32)
    flag = (hole / outer < 0.1).astype(f32)
    amp_s = blk["amplitude"].astype(f32) / float(S)
    sig = jax.nn.sigmoid(blk["entry_strengths"].astype(f32))   # [H, S, NE]
    strength = jnp.where(sig > 0.1, sig, 0.0)

    def splat_bcast(a):                 # [H,S] -> [H,P] (center + entries)
        return jnp.broadcast_to(a[:, :, None], (H, S, 1 + NE)).reshape(H, P)

    iscen = jnp.concatenate([jnp.ones((H, S, 1), f32),
                             jnp.zeros((H, S, NE), f32)], axis=2).reshape(H, P)
    wq = (amp_s[:, :, None] *
          jnp.concatenate([jnp.ones((H, S, 1), f32), strength],
                          axis=2)).reshape(H, P)

    def padc(a, val):                   # pad splat columns with benign values
        return jnp.pad(a, ((0, 0), (0, Pp - P)), constant_values=val)

    coefs = jnp.stack([
        pn2_pp,
        padc(splat_bcast(outer), 1.0),
        padc(splat_bcast(hole), 0.0),
        padc(splat_bcast(flag), 1.0),
        padc(iscen, 1.0),
        padc(wq, 0.0),                  # zero weight => padded cols contribute 0
    ], axis=0).reshape(6, H * Pp)

    f32r = lambda a, n: a.reshape(1, n).astype(f32)
    return dict(
        g1=f32r(blk["norm1_g"], D), b1=f32r(blk["norm1_b"], D),
        qkv_w=blk["qkv_w"].astype(jnp.bfloat16),
        qkv_b=f32r(blk["qkv_b"], 3 * D),
        qk_g=jnp.tile(blk["qk_norm_g"].astype(f32), H).reshape(1, D),
        qk_b=jnp.tile(blk["qk_norm_b"].astype(f32), H).reshape(1, D),
        indh=indh, indhp=indhp, pmat=pmat, coefs=coefs,
        out_w=blk["out_w"].astype(jnp.bfloat16),
        out_b=f32r(blk["out_b"], D),
    )


# --------------------------- fused MLP / logits kernels ---------------------
def _mlp_kernel(x_ref, ng_ref, nb_ref, w1_ref, b1_ref, w2_ref, b2_ref, o_ref):
    x = x_ref[...]
    xn = _layernorm(x, ng_ref[...], nb_ref[...])
    h = jnp.dot(xn.astype(jnp.bfloat16), w1_ref[...],
                preferred_element_type=jnp.float32) + b1_ref[...]
    h = _gelu(h)                                   # hidden never leaves VMEM
    y = jnp.dot(h.astype(jnp.bfloat16), w2_ref[...],
                preferred_element_type=jnp.float32) + b2_ref[...]
    o_ref[...] = x + y                             # fused residual


def _logits_kernel(x_ref, g_ref, b_ref, embt_ref, o_ref):
    xn = _layernorm(x_ref[...], g_ref[...], b_ref[...])
    o_ref[...] = jnp.dot(xn.astype(jnp.bfloat16), embt_ref[...],
                         preferred_element_type=jnp.float32)


def mlp_sublayer(x2d, ops):
    m, d = x2d.shape
    dff = ops["w1"].shape[1]
    tm, gm = _row_tiles(m)
    return pl.pallas_call(
        _mlp_kernel,
        out_shape=jax.ShapeDtypeStruct((m, d), jnp.float32),
        grid=(gm,),
        in_specs=[
            pl.BlockSpec((tm, d), lambda i: (i, 0)),
            _spec((1, d), lambda i: (0, 0), constant=True),
            _spec((1, d), lambda i: (0, 0), constant=True),
            _spec((d, dff), lambda i: (0, 0), constant=True),
            _spec((1, dff), lambda i: (0, 0), constant=True),
            _spec((dff, d), lambda i: (0, 0), constant=True),
            _spec((1, d), lambda i: (0, 0), constant=True),
        ],
        out_specs=pl.BlockSpec((tm, d), lambda i: (i, 0)),
        compiler_params=_cparams(("parallel",)),
    )(x2d, ops["ng"], ops["nb"], ops["w1"], ops["b1"], ops["w2"], ops["b2"])


def tied_logits(x2d, g, b, emb_t):
    m, d = x2d.shape
    v = emb_t.shape[1]
    tm, gm = _row_tiles(m)
    tv = v if v <= 2048 else 2048
    gv = pl.cdiv(v, tv)
    return pl.pallas_call(
        _logits_kernel,
        out_shape=jax.ShapeDtypeStruct((m, v), jnp.float32),
        grid=(gm, gv),
        in_specs=[
            pl.BlockSpec((tm, d), lambda i, j: (i, 0)),
            _spec((1, d), lambda i, j: (0, 0), constant=True),
            _spec((1, d), lambda i, j: (0, 0), constant=True),
            pl.BlockSpec((d, tv), lambda i, j: (0, j)),   # vocab-tiled, [D,V]
        ],
        out_specs=pl.BlockSpec((tm, tv), lambda i, j: (i, j)),
        compiler_params=_cparams(("parallel", "parallel")),
    )(x2d, g, b, emb_t)


# --------------------------- parameters & forward ---------------------------
def init_params(key, cfg):
    D = cfg["dim"]; H = cfg["n_heads"]; S = cfg["n_splats_per_head"]
    hd = D // H; V = cfg["vocab_size"]; L = cfg["n_layers"]
    keys = jax.random.split(key, 2 + L)
    p = {
        "token_emb": 0.02 * jax.random.normal(keys[0], (V, D), jnp.float32),
        "pos_emb": jnp.zeros((1, cfg["max_seq_len"], D), jnp.float32),
        "final_norm_g": jnp.ones((D,), jnp.float32),
        "final_norm_b": jnp.zeros((D,), jnp.float32),
        "blocks": [],
    }
    for l in range(L):
        k0, k1, k2, k3, k4, k5 = jax.random.split(keys[2 + l], 6)
        blk = {
            "qkv_w": 0.02 * jax.random.normal(k0, (D, 3 * D), jnp.float32),
            "qkv_b": jnp.zeros((3 * D,), jnp.float32),
            "out_w": 0.02 * jax.random.normal(k1, (D, D), jnp.float32),
            "out_b": jnp.zeros((D,), jnp.float32),
            "mlp_w1": 0.02 * jax.random.normal(k2, (D, 4 * D), jnp.float32),
            "mlp_b1": jnp.zeros((4 * D,), jnp.float32),
            "mlp_w2": 0.02 * jax.random.normal(k3, (4 * D, D), jnp.float32),
            "mlp_b2": jnp.zeros((D,), jnp.float32),
            "norm1_g": jnp.ones((D,), jnp.float32),
            "norm1_b": jnp.zeros((D,), jnp.float32),
            "norm2_g": jnp.ones((D,), jnp.float32),
            "norm2_b": jnp.zeros((D,), jnp.float32),
            "qk_norm_g": jnp.ones((hd,), jnp.float32),
            "qk_norm_b": jnp.zeros((hd,), jnp.float32),
            # splat geometry parameters (matching the __init__ distributions)
            "centers": 0.1 * jax.random.normal(k4, (H, S, hd), jnp.float32),
            "entry_points": 0.2 * jax.random.normal(k5, (H, S, 4, hd), jnp.float32),
            "entry_strengths": jnp.zeros((H, S, 4), jnp.float32),
            "outer_radius": jnp.ones((H, S), jnp.float32),
            "hole_radius": jnp.full((H, S), 0.01, jnp.float32),
            "amplitude": jnp.ones((H, S), jnp.float32),
        }
        p["blocks"].append(blk)
    return p


def prepare_params(params):
    """One-time prep (hoisted out of the per-step graph): geometry / coef
    tables, bf16 weight casts, pre-transposed tied embedding."""
    f32 = jnp.float32
    D = params["token_emb"].shape[1]
    prepared = {
        "token_emb": params["token_emb"].astype(f32),
        "emb_t": params["token_emb"].T.astype(jnp.bfloat16),   # [D, V] bf16
        "pos_emb": params["pos_emb"].astype(f32),
        "final_g": params["final_norm_g"].reshape(1, D).astype(f32),
        "final_b": params["final_norm_b"].reshape(1, D).astype(f32),
        "blocks": [],
    }
    for blk in params["blocks"]:
        dff = blk["mlp_w1"].shape[1]
        mlp = dict(
            ng=blk["norm2_g"].reshape(1, D).astype(f32),
            nb=blk["norm2_b"].reshape(1, D).astype(f32),
            w1=blk["mlp_w1"].astype(jnp.bfloat16),
            b1=blk["mlp_b1"].reshape(1, dff).astype(f32),
            w2=blk["mlp_w2"].astype(jnp.bfloat16),
            b2=blk["mlp_b2"].reshape(1, D).astype(f32),
        )
        prepared["blocks"].append({"attn": build_attention_operands(blk),
                                   "mlp": mlp})
    return prepared


def forward(prepared, tokens, cfg):
    D = cfg["dim"]; H = cfg["n_heads"]; hd = D // H
    B, T = tokens.shape
    # embedding gather + learned positions (plain-JAX glue); dropout = identity
    x = prepared["token_emb"][tokens] + prepared["pos_emb"][:, :T, :]
    x2d = x.reshape(B * T, D).astype(jnp.float32)
    for layer in prepared["blocks"]:
        x2d = attention_sublayer(x2d, layer["attn"], B, T, H, hd)
        x2d = mlp_sublayer(x2d, layer["mlp"])
    logits2d = tied_logits(x2d, prepared["final_g"], prepared["final_b"],
                           prepared["emb_t"])
    V = prepared["emb_t"].shape[1]
    return logits2d.reshape(B, T, V)


if __name__ == "__main__":
    cfg = dict(vocab_size=64, dim=32, n_layers=2, n_heads=4,
               n_splats_per_head=2, max_seq_len=16, dropout=0.1)
    key = jax.random.PRNGKey(0)
    pkey, tkey = jax.random.split(key)
    params = init_params(pkey, cfg)
    prepared = prepare_params(params)   # constant per set of weights

    B, T = 2, 8
    tokens = jax.random.randint(tkey, (B, T), 0, cfg["vocab_size"],
                                dtype=jnp.int32)

    fwd = jax.jit(lambda pp, t: forward(pp, t, cfg))
    logits = fwd(prepared, tokens)
    jax.block_until_ready(logits)
    assert logits.shape == (B, T, cfg["vocab_size"])
    assert bool(jnp.all(jnp.isfinite(logits)))
    print("KERNEL_OK")
</pallas_src>

<mosaic_0001>
module attributes {stable_mosaic.version = 11 : i64} {
  func.func @_k(%arg0: i32, %arg1: memref<8x128xf32, #tpu.memory_space<vmem>>, %arg2: memref<8x128xf32, #tpu.memory_space<vmem>>) attributes {dimension_semantics = [#tpu.dimension_semantics<arbitrary>], iteration_bounds = array<i64: 2>, scalar_prefetch = 0 : i64, scratch_operands = 0 : i64, tpu.core_type = #tpu.core_type<tc>, window_params = [{pipeline_mode = #tpu.pipeline_mode<synchronous>, transform_indices = @transform_0, window_bounds = array<i64: 8, 128>}, {transform_indices = @transform_1, window_bounds = array<i64: 8, 128>}]} {
    %c0 = arith.constant 0 : index
    %c0_0 = arith.constant 0 : index
    %0 = vector.load %arg1[%c0, %c0_0] : memref<8x128xf32, #tpu.memory_space<vmem>>, vector<8x128xf32>
    %cst = arith.constant 1.000000e+00 : f32
    %1 = vector.broadcast %cst : f32 to vector<8x128xf32>
    %2 = arith.addf %0, %1 : vector<8x128xf32>
    %c0_1 = arith.constant 0 : index
    %c0_2 = arith.constant 0 : index
    %3 = vector.load %arg2[%c0_1, %c0_2] : memref<8x128xf32, #tpu.memory_space<vmem>>, vector<8x128xf32>
    tpu.vector_store %arg2[%c0_1, %c0_2], %2 {strides = array<i32>} : memref<8x128xf32, #tpu.memory_space<vmem>>, vector<8x128xf32>,
    return
  }
  func.func @transform_0(%arg0: i32) -> (i32, i32) {
    %c0_i32 = arith.constant 0 : i32
    %c0_i32_0 = arith.constant 0 : i32
    %c0_i32_1 = arith.constant 0 : i32
    return %c0_i32, %c0_i32_0 : i32, i32
  }
  func.func @transform_1(%arg0: i32) -> (i32, i32) {
    %c0_i32 = arith.constant 0 : i32
    %c0_i32_0 = arith.constant 0 : i32
    return %arg0, %c0_i32 : i32, i32
  }
}

module attributes {stable_mosaic.version = 11 : i64} {
  func.func @_logits_kernel(%arg0: i32, %arg1: i32, %arg2: memref<16x32xf32, #tpu.memory_space<vmem>>, %arg3: memref<1x32xf32, #tpu.memory_space<vmem>>, %arg4: memref<1x32xf32, #tpu.memory_space<vmem>>, %arg5: memref<32x64xbf16, #tpu.memory_space<vmem>>, %arg6: memref<16x64xf32, #tpu.memory_space<vmem>>) attributes {dimension_semantics = [#tpu.dimension_semantics<parallel>, #tpu.dimension_semantics<parallel>], iteration_bounds = array<i64: 1, 1>, scalar_prefetch = 0 : i64, scratch_operands = 0 : i64, tpu.core_type = #tpu.core_type<tc>, window_params = [{transform_indices = @transform_0, window_bounds = array<i64: 16, 32>}, {pipeline_mode = #tpu.pipeline_mode<synchronous>, transform_indices = @transform_1, window_bounds = array<i64: 1, 32>}, {pipeline_mode = #tpu.pipeline_mode<synchronous>, transform_indices = @transform_2, window_bounds = array<i64: 1, 32>}, {transform_indices = @transform_3, window_bounds = array<i64: 32, 64>}, {transform_indices = @transform_4, window_bounds = array<i64: 16, 64>}]} {
    %c0 = arith.constant 0 : index
    %c0_0 = arith.constant 0 : index
    %0 = vector.load %arg2[%c0, %c0_0] : memref<16x32xf32, #tpu.memory_space<vmem>>, vector<16x32xf32>
    %c0_1 = arith.constant 0 : index
    %c0_2 = arith.constant 0 : index
    %1 = vector.load %arg3[%c0_1, %c0_2] : memref<1x32xf32, #tpu.memory_space<vmem>>, vector<1x32xf32>
    %c0_3 = arith.constant 0 : index
    %c0_4 = arith.constant 0 : index
    %2 = vector.load %arg4[%c0_3, %c0_4] : memref<1x32xf32, #tpu.memory_space<vmem>>, vector<1x32xf32>
    %cst = arith.constant dense<0.000000e+00> : vector<16xf32>
    %3 = vector.multi_reduction <add>, %0, %cst [1] : vector<16x32xf32> to vector<16xf32>
    %4 = vector.shape_cast %3 : vector<16xf32> to vector<16x1xf32>
    %cst_5 = arith.constant 3.200000e+01 : f32
    %5 = vector.broadcast %cst_5 : f32 to vector<16x1xf32>
    %6 = arith.divf %4, %5 : vector<16x1xf32>
    %7 = vector.broadcast %6 : vector<16x1xf32> to vector<16x32xf32>
    %8 = arith.subf %0, %7 : vector<16x32xf32>
    %9 = arith.mulf %8, %8 : vector<16x32xf32>
    %cst_6 = arith.constant dense<0.000000e+00> : vector<16xf32>
    %10 = vector.multi_reduction <add>, %9, %cst_6 [1] : vector<16x32xf32> to vector<16xf32>
    %11 = vector.shape_cast %10 : vector<16xf32> to vector<16x1xf32>
    %cst_7 = arith.constant 3.200000e+01 : f32
    %12 = vector.broadcast %cst_7 : f32 to vector<16x1xf32>
    %13 = arith.divf %11, %12 : vector<16x1xf32>
    %cst_8 = arith.constant 9.99999974E-6 : f32
    %14 = vector.broadcast %cst_8 : f32 to vector<16x1xf32>
    %15 = arith.addf %13, %14 : vector<16x1xf32>
    %16 = math.rsqrt %15 : vector<16x1xf32>
    %17 = vector.broadcast %16 : vector<16x1xf32> to vector<16x32xf32>
    %18 = arith.mulf %8, %17 : vector<16x32xf32>
    %19 = vector.broadcast %1 : vector<1x32xf32> to vector<16x32xf32>
    %20 = arith.mulf %18, %19 : vector<16x32xf32>
    %21 = vector.broadcast %2 : vector<1x32xf32> to vector<16x32xf32>
    %22 = arith.addf %20, %21 : vector<16x32xf32>
    %23 = arith.truncf %22 : vector<16x32xf32> to vector<16x32xbf16>
    %c0_9 = arith.constant 0 : index
    %c0_10 = arith.constant 0 : index
    %24 = vector.load %arg5[%c0_9, %c0_10] : memref<32x64xbf16, #tpu.memory_space<vmem>>, vector<32x64xbf16>
    %cst_11 = arith.constant dense<0.000000e+00> : vector<16x64xf32>
    %25 = tpu.matmul %23, %24, %cst_11 {dimension_numbers = #tpu.dot_dimension_numbers<[1], [0], [0], [1], [0, 0, 1, 1], [], []>} : vector<16x32xbf16>, vector<32x64xbf16>, vector<16x64xf32> -> vector<16x64xf32>
    %c0_12 = arith.constant 0 : index
    %c0_13 = arith.constant 0 : index
    %26 = vector.load %arg6[%c0_12, %c0_13] : memref<16x64xf32, #tpu.memory_space<vmem>>, vector<16x64xf32>
    tpu.vector_store %arg6[%c0_12, %c0_13], %25 {strides = array<i32>} : memref<16x64xf32, #tpu.memory_space<vmem>>, vector<16x64xf32>,
    return
  }
  func.func @transform_0(%arg0: i32, %arg1: i32) -> (i32, i32) {
    %c0_i32 = arith.constant 0 : i32
    %c0_i32_0 = arith.constant 0 : i32
    return %arg0, %c0_i32 : i32, i32
  }
  func.func @transform_1(%arg0: i32, %arg1: i32) -> (i32, i32) {
    %c0_i32 = arith.constant 0 : i32
    %c0_i32_0 = arith.constant 0 : i32
    %c0_i32_1 = arith.constant 0 : i32
    return %c0_i32, %c0_i32_0 : i32, i32
  }
  func.func @transform_2(%arg0: i32, %arg1: i32) -> (i32, i32) {
    %c0_i32 = arith.constant 0 : i32
    %c0_i32_0 = arith.constant 0 : i32
    %c0_i32_1 = arith.constant 0 : i32
    return %c0_i32, %c0_i32_0 : i32, i32
  }
  func.func @transform_3(%arg0: i32, %arg1: i32) -> (i32, i32) {
    %c0_i32 = arith.constant 0 : i32
    %c0_i32_0 = arith.constant 0 : i32
    return %c0_i32, %arg1 : i32, i32
  }
  func.func @transform_4(%arg0: i32, %arg1: i32) -> (i32, i32) {
    %c0_i32 = arith.constant 0 : i32
    return %arg0, %arg1 : i32, i32
  }
}

module attributes {stable_mosaic.version = 11 : i64} {
  func.func @_mlp_kernel(%arg0: i32, %arg1: memref<16x32xf32, #tpu.memory_space<vmem>>, %arg2: memref<1x32xf32, #tpu.memory_space<vmem>>, %arg3: memref<1x32xf32, #tpu.memory_space<vmem>>, %arg4: memref<32x128xbf16, #tpu.memory_space<vmem>>, %arg5: memref<1x128xf32, #tpu.memory_space<vmem>>, %arg6: memref<128x32xbf16, #tpu.memory_space<vmem>>, %arg7: memref<1x32xf32, #tpu.memory_space<vmem>>, %arg8: memref<16x32xf32, #tpu.memory_space<vmem>>) attributes {dimension_semantics = [#tpu.dimension_semantics<parallel>], iteration_bounds = array<i64: 1>, scalar_prefetch = 0 : i64, scratch_operands = 0 : i64, tpu.core_type = #tpu.core_type<tc>, window_params = [{transform_indices = @transform_0, window_bounds = array<i64: 16, 32>}, {pipeline_mode = #tpu.pipeline_mode<synchronous>, transform_indices = @transform_1, window_bounds = array<i64: 1, 32>}, {pipeline_mode = #tpu.pipeline_mode<synchronous>, transform_indices = @transform_2, window_bounds = array<i64: 1, 32>}, {pipeline_mode = #tpu.pipeline_mode<synchronous>, transform_indices = @transform_3, window_bounds = array<i64: 32, 128>}, {pipeline_mode = #tpu.pipeline_mode<synchronous>, transform_indices = @transform_4, window_bounds = array<i64: 1, 128>}, {pipeline_mode = #tpu.pipeline_mode<synchronous>, transform_indices = @transform_5, window_bounds = array<i64: 128, 32>}, {pipeline_mode = #tpu.pipeline_mode<synchronous>, transform_indices = @transform_6, window_bounds = array<i64: 1, 32>}, {transform_indices = @transform_7, window_bounds = array<i64: 16, 32>}]} {
    %c0 = arith.constant 0 : index
    %c0_0 = arith.constant 0 : index
    %0 = vector.load %arg1[%c0, %c0_0] : memref<16x32xf32, #tpu.memory_space<vmem>>, vector<16x32xf32>
    %c0_1 = arith.constant 0 : index
    %c0_2 = arith.constant 0 : index
    %1 = vector.load %arg2[%c0_1, %c0_2] : memref<1x32xf32, #tpu.memory_space<vmem>>, vector<1x32xf32>
    %c0_3 = arith.constant 0 : index
    %c0_4 = arith.constant 0 : index
    %2 = vector.load %arg3[%c0_3, %c0_4] : memref<1x32xf32, #tpu.memory_space<vmem>>, vector<1x32xf32>
    %cst = arith.constant dense<0.000000e+00> : vector<16xf32>
    %3 = vector.multi_reduction <add>, %0, %cst [1] : vector<16x32xf32> to vector<16xf32>
    %4 = vector.shape_cast %3 : vector<16xf32> to vector<16x1xf32>
    %cst_5 = arith.constant 3.200000e+01 : f32
    %5 = vector.broadcast %cst_5 : f32 to vector<16x1xf32>
    %6 = arith.divf %4, %5 : vector<16x1xf32>
    %7 = vector.broadcast %6 : vector<16x1xf32> to vector<16x32xf32>
    %8 = arith.subf %0, %7 : vector<16x32xf32>
    %9 = arith.mulf %8, %8 : vector<16x32xf32>
    %cst_6 = arith.constant dense<0.000000e+00> : vector<16xf32>
    %10 = vector.multi_reduction <add>, %9, %cst_6 [1] : vector<16x32xf32> to vector<16xf32>
    %11 = vector.shape_cast %10 : vector<16xf32> to vector<16x1xf32>
    %cst_7 = arith.constant 3.200000e+01 : f32
    %12 = vector.broadcast %cst_7 : f32 to vector<16x1xf32>
    %13 = arith.divf %11, %12 : vector<16x1xf32>
    %cst_8 = arith.constant 9.99999974E-6 : f32
    %14 = vector.broadcast %cst_8 : f32 to vector<16x1xf32>
    %15 = arith.addf %13, %14 : vector<16x1xf32>
    %16 = math.rsqrt %15 : vector<16x1xf32>
    %17 = vector.broadcast %16 : vector<16x1xf32> to vector<16x32xf32>
    %18 = arith.mulf %8, %17 : vector<16x32xf32>
    %19 = vector.broadcast %1 : vector<1x32xf32> to vector<16x32xf32>
    %20 = arith.mulf %18, %19 : vector<16x32xf32>
    %21 = vector.broadcast %2 : vector<1x32xf32> to vector<16x32xf32>
    %22 = arith.addf %20, %21 : vector<16x32xf32>
    %23 = arith.truncf %22 : vector<16x32xf32> to vector<16x32xbf16>
    %c0_9 = arith.constant 0 : index
    %c0_10 = arith.constant 0 : index
    %24 = vector.load %arg4[%c0_9, %c0_10] : memref<32x128xbf16, #tpu.memory_space<vmem>>, vector<32x128xbf16>
    %cst_11 = arith.constant dense<0.000000e+00> : vector<16x128xf32>
    %25 = tpu.matmul %23, %24, %cst_11 {dimension_numbers = #tpu.dot_dimension_numbers<[1], [0], [0], [1], [0, 0, 1, 1], [], []>} : vector<16x32xbf16>, vector<32x128xbf16>, vector<16x128xf32> -> vector<16x128xf32>
    %c0_12 = arith.constant 0 : index
    %c0_13 = arith.constant 0 : index
    %26 = vector.load %arg5[%c0_12, %c0_13] : memref<1x128xf32, #tpu.memory_space<vmem>>, vector<1x128xf32>
    %27 = vector.broadcast %26 : vector<1x128xf32> to vector<16x128xf32>
    %28 = arith.addf %25, %27 : vector<16x128xf32>
    %cst_14 = arith.constant 5.000000e-01 : f32
    %29 = vector.broadcast %cst_14 : f32 to vector<16x128xf32>
    %30 = arith.mulf %29, %28 : vector<16x128xf32>
    %cst_15 = arith.constant 0.707106769 : f32
    %31 = vector.broadcast %cst_15 : f32 to vector<16x128xf32>
    %32 = arith.mulf %28, %31 : vector<16x128xf32>
    %cst_16 = arith.constant 0.000000e+00 : f32
    %33 = vector.broadcast %cst_16 : f32 to vector<16x128xf32>
    %34 = arith.cmpf oge, %32, %33 : vector<16x128xf32>
    %cst_17 = arith.constant 1.000000e+00 : f32
    %cst_18 = arith.constant -1.000000e+00 : f32
    %35 = vector.broadcast %cst_17 : f32 to vector<16x128xf32>
    %36 = vector.broadcast %cst_18 : f32 to vector<16x128xf32>
    %37 = arith.select %34, %35, %36 : vector<16x128xi1>, vector<16x128xf32>
    %38 = math.absf %32 : vector<16x128xf32>
    %cst_19 = arith.constant 0.327591091 : f32
    %39 = vector.broadcast %cst_19 : f32 to vector<16x128xf32>
    %40 = arith.mulf %39, %38 : vector<16x128xf32>
    %cst_20 = arith.constant 1.000000e+00 : f32
    %41 = vector.broadcast %cst_20 : f32 to vector<16x128xf32>
    %42 = arith.addf %41, %40 : vector<16x128xf32>
    %cst_21 = arith.constant 1.000000e+00 : f32
    %43 = vector.broadcast %cst_21 : f32 to vector<16x128xf32>
    %44 = arith.divf %43, %42 : vector<16x128xf32>
    %cst_22 = arith.constant 1.06140542 : f32
    %45 = vector.broadcast %cst_22 : f32 to vector<16x128xf32>
    %46 = arith.mulf %45, %44 : vector<16x128xf32>
    %cst_23 = arith.constant -1.45315206 : f32
    %47 = vector.broadcast %cst_23 : f32 to vector<16x128xf32>
    %48 = arith.addf %46, %47 : vector<16x128xf32>
    %49 = arith.mulf %48, %44 : vector<16x128xf32>
    %cst_24 = arith.constant 1.42141378 : f32
    %50 = vector.broadcast %cst_24 : f32 to vector<16x128xf32>
    %51 = arith.addf %49, %50 : vector<16x128xf32>
    %52 = arith.mulf %51, %44 : vector<16x128xf32>
    %cst_25 = arith.constant -0.284496725 : f32
    %53 = vector.broadcast %cst_25 : f32 to vector<16x128xf32>
    %54 = arith.addf %52, %53 : vector<16x128xf32>
    %55 = arith.mulf %54, %44 : vector<16x128xf32>
    %cst_26 = arith.constant 0.254829586 : f32
    %56 = vector.broadcast %cst_26 : f32 to vector<16x128xf32>
    %57 = arith.addf %55, %56 : vector<16x128xf32>
    %58 = arith.mulf %57, %44 : vector<16x128xf32>
    %cst_27 = arith.constant 0.000000e+00 : f32
    %59 = vector.broadcast %cst_27 : f32 to vector<16x128xf32>
    %60 = arith.subf %59, %38 : vector<16x128xf32>
    %61 = arith.mulf %60, %38 : vector<16x128xf32>
    %62 = math.exp %61 : vector<16x128xf32>
    %63 = arith.mulf %58, %62 : vector<16x128xf32>
    %cst_28 = arith.constant 1.000000e+00 : f32
    %64 = vector.broadcast %cst_28 : f32 to vector<16x128xf32>
    %65 = arith.subf %64, %63 : vector<16x128xf32>
    %66 = arith.mulf %37, %65 : vector<16x128xf32>
    %cst_29 = arith.constant 1.000000e+00 : f32
    %67 = vector.broadcast %cst_29 : f32 to vector<16x128xf32>
    %68 = arith.addf %67, %66 : vector<16x128xf32>
    %69 = arith.mulf %30, %68 : vector<16x128xf32>
    %70 = arith.truncf %69 : vector<16x128xf32> to vector<16x128xbf16>
    %c0_30 = arith.constant 0 : index
    %c0_31 = arith.constant 0 : index
    %71 = vector.load %arg6[%c0_30, %c0_31] : memref<128x32xbf16, #tpu.memory_space<vmem>>, vector<128x32xbf16>
    %cst_32 = arith.constant dense<0.000000e+00> : vector<16x32xf32>
    %72 = tpu.matmul %70, %71, %cst_32 {dimension_numbers = #tpu.dot_dimension_numbers<[1], [0], [0], [1], [0, 0, 1, 1], [], []>} : vector<16x128xbf16>, vector<128x32xbf16>, vector<16x32xf32> -> vector<16x32xf32>
    %c0_33 = arith.constant 0 : index
    %c0_34 = arith.constant 0 : index
    %73 = vector.load %arg7[%c0_33, %c0_34] : memref<1x32xf32, #tpu.memory_space<vmem>>, vector<1x32xf32>
    %74 = vector.broadcast %73 : vector<1x32xf32> to vector<16x32xf32>
    %75 = arith.addf %72, %74 : vector<16x32xf32>
    %76 = arith.addf %0, %75 : vector<16x32xf32>
    %c0_35 = arith.constant 0 : index
    %c0_36 = arith.constant 0 : index
    %77 = vector.load %arg8[%c0_35, %c0_36] : memref<16x32xf32, #tpu.memory_space<vmem>>, vector<16x32xf32>
    tpu.vector_store %arg8[%c0_35, %c0_36], %76 {strides = array<i32>} : memref<16x32xf32, #tpu.memory_space<vmem>>, vector<16x32xf32>,
    return
  }
  func.func @transform_0(%arg0: i32) -> (i32, i32) {
    %c0_i32 = arith.constant 0 : i32
    %c0_i32_0 = arith.constant 0 : i32
    return %arg0, %c0_i32 : i32, i32
  }
  func.func @transform_1(%arg0: i32) -> (i32, i32) {
    %c0_i32 = arith.constant 0 : i32
    %c0_i32_0 = arith.constant 0 : i32
    %c0_i32_1 = arith.constant 0 : i32
    return %c0_i32, %c0_i32_0 : i32, i32
  }
  func.func @transform_2(%arg0: i32) -> (i32, i32) {
    %c0_i32 = arith.constant 0 : i32
    %c0_i32_0 = arith.constant 0 : i32
    %c0_i32_1 = arith.constant 0 : i32
    return %c0_i32, %c0_i32_0 : i32, i32
  }
  func.func @transform_3(%arg0: i32) -> (i32, i32) {
    %c0_i32 = arith.constant 0 : i32
    %c0_i32_0 = arith.constant 0 : i32
    %c0_i32_1 = arith.constant 0 : i32
    return %c0_i32, %c0_i32_0 : i32, i32
  }
  func.func @transform_4(%arg0: i32) -> (i32, i32) {
    %c0_i32 = arith.constant 0 : i32
    %c0_i32_0 = arith.constant 0 : i32
    %c0_i32_1 = arith.constant 0 : i32
    return %c0_i32, %c0_i32_0 : i32, i32
  }
  func.func @transform_5(%arg0: i32) -> (i32, i32) {
    %c0_i32 = arith.constant 0 : i32
    %c0_i32_0 = arith.constant 0 : i32
    %c0_i32_1 = arith.constant 0 : i32
    return %c0_i32, %c0_i32_0 : i32, i32
  }
  func.func @transform_6(%arg0: i32) -> (i32, i32) {
    %c0_i32 = arith.constant 0 : i32
    %c0_i32_0 = arith.constant 0 : i32
    %c0_i32_1 = arith.constant 0 : i32
    return %c0_i32, %c0_i32_0 : i32, i32
  }
  func.func @transform_7(%arg0: i32) -> (i32, i32) {
    %c0_i32 = arith.constant 0 : i32
    %c0_i32_0 = arith.constant 0 : i32
    return %arg0, %c0_i32 : i32, i32
  }
}

module attributes {stable_mosaic.version = 11 : i64} {
  func.func @kernel(%arg0: i32, %arg1: memref<8x32xf32, #tpu.memory_space<vmem>>, %arg2: memref<1x32xf32, #tpu.memory_space<vmem>>, %arg3: memref<1x32xf32, #tpu.memory_space<vmem>>, %arg4: memref<32x96xbf16, #tpu.memory_space<vmem>>, %arg5: memref<1x96xf32, #tpu.memory_space<vmem>>, %arg6: memref<1x32xf32, #tpu.memory_space<vmem>>, %arg7: memref<1x32xf32, #tpu.memory_space<vmem>>, %arg8: memref<32x4xf32, #tpu.memory_space<vmem>>, %arg9: memref<32x64xf32, #tpu.memory_space<vmem>>, %arg10: memref<32x64xf32, #tpu.memory_space<vmem>>, %arg11: memref<6x64xf32, #tpu.memory_space<vmem>>, %arg12: memref<32x32xbf16, #tpu.memory_space<vmem>>, %arg13: memref<1x32xf32, #tpu.memory_space<vmem>>, %arg14: memref<8x32xf32, #tpu.memory_space<vmem>>) attributes {dimension_semantics = [#tpu.dimension_semantics<parallel>], iteration_bounds = array<i64: 2>, scalar_prefetch = 0 : i64, scratch_operands = 0 : i64, tpu.core_type = #tpu.core_type<tc>, window_params = [{transform_indices = @transform_0, window_bounds = array<i64: 8, 32>}, {pipeline_mode = #tpu.pipeline_mode<synchronous>, transform_indices = @transform_1, window_bounds = array<i64: 1, 32>}, {pipeline_mode = #tpu.pipeline_mode<synchronous>, transform_indices = @transform_2, window_bounds = array<i64: 1, 32>}, {pipeline_mode = #tpu.pipeline_mode<synchronous>, transform_indices = @transform_3, window_bounds = array<i64: 32, 96>}, {pipeline_mode = #tpu.pipeline_mode<synchronous>, transform_indices = @transform_4, window_bounds = array<i64: 1, 96>}, {pipeline_mode = #tpu.pipeline_mode<synchronous>, transform_indices = @transform_5, window_bounds = array<i64: 1, 32>}, {pipeline_mode = #tpu.pipeline_mode<synchronous>, transform_indices = @transform_6, window_bounds = array<i64: 1, 32>}, {pipeline_mode = #tpu.pipeline_mode<synchronous>, transform_indices = @transform_7, window_bounds = array<i64: 32, 4>}, {pipeline_mode = #tpu.pipeline_mode<synchronous>, transform_indices = @transform_8, window_bounds = array<i64: 32, 64>}, {pipeline_mode = #tpu.pipeline_mode<synchronous>, transform_indices = @transform_9, window_bounds = array<i64: 32, 64>}, {pipeline_mode = #tpu.pipeline_mode<synchronous>, transform_indices = @transform_10, window_bounds = array<i64: 6, 64>}, {pipeline_mode = #tpu.pipeline_mode<synchronous>, transform_indices = @transform_11, window_bounds = array<i64: 32, 32>}, {pipeline_mode = #tpu.pipeline_mode<synchronous>, transform_indices = @transform_12, window_bounds = array<i64: 1, 32>}, {transform_indices = @transform_13, window_bounds = array<i64: 8, 32>}]} {
    %c0 = arith.constant 0 : index
    %c0_0 = arith.constant 0 : index
    %0 = vector.load %arg1[%c0, %c0_0] : memref<8x32xf32, #tpu.memory_space<vmem>>, vector<8x32xf32>
    %c0_1 = arith.constant 0 : index
    %c0_2 = arith.constant 0 : index
    %1 = vector.load %arg2[%c0_1, %c0_2] : memref<1x32xf32, #tpu.memory_space<vmem>>, vector<1x32xf32>
    %c0_3 = arith.constant 0 : index
    %c0_4 = arith.constant 0 : index
    %2 = vector.load %arg3[%c0_3, %c0_4] : memref<1x32xf32, #tpu.memory_space<vmem>>, vector<1x32xf32>
    %cst = arith.constant dense<0.000000e+00> : vector<8xf32>
    %3 = vector.multi_reduction <add>, %0, %cst [1] : vector<8x32xf32> to vector<8xf32>
    %4 = vector.shape_cast %3 : vector<8xf32> to vector<8x1xf32>
    %cst_5 = arith.constant 3.200000e+01 : f32
    %5 = vector.broadcast %cst_5 : f32 to vector<8x1xf32>
    %6 = arith.divf %4, %5 : vector<8x1xf32>
    %7 = vector.broadcast %6 : vector<8x1xf32> to vector<8x32xf32>
    %8 = arith.subf %0, %7 : vector<8x32xf32>
    %9 = arith.mulf %8, %8 : vector<8x32xf32>
    %cst_6 = arith.constant dense<0.000000e+00> : vector<8xf32>
    %10 = vector.multi_reduction <add>, %9, %cst_6 [1] : vector<8x32xf32> to vector<8xf32>
    %11 = vector.shape_cast %10 : vector<8xf32> to vector<8x1xf32>
    %cst_7 = arith.constant 3.200000e+01 : f32
    %12 = vector.broadcast %cst_7 : f32 to vector<8x1xf32>
    %13 = arith.divf %11, %12 : vector<8x1xf32>
    %cst_8 = arith.constant 9.99999974E-6 : f32
    %14 = vector.broadcast %cst_8 : f32 to vector<8x1xf32>
    %15 = arith.addf %13, %14 : vector<8x1xf32>
    %16 = math.rsqrt %15 : vector<8x1xf32>
    %17 = vector.broadcast %16 : vector<8x1xf32> to vector<8x32xf32>
    %18 = arith.mulf %8, %17 : vector<8x32xf32>
    %19 = vector.broadcast %1 : vector<1x32xf32> to vector<8x32xf32>
    %20 = arith.mulf %18, %19 : vector<8x32xf32>
    %21 = vector.broadcast %2 : vector<1x32xf32> to vector<8x32xf32>
    %22 = arith.addf %20, %21 : vector<8x32xf32>
    %23 = arith.truncf %22 : vector<8x32xf32> to vector<8x32xbf16>
    %c0_9 = arith.constant 0 : index
    %c0_10 = arith.constant 0 : index
    %24 = vector.load %arg4[%c0_9, %c0_10] : memref<32x96xbf16, #tpu.memory_space<vmem>>, vector<32x96xbf16>
    %cst_11 = arith.constant dense<0.000000e+00> : vector<8x96xf32>
    %25 = tpu.matmul %23, %24, %cst_11 {dimension_numbers = #tpu.dot_dimension_numbers<[1], [0], [0], [1], [0, 0, 1, 1], [], []>} : vector<8x32xbf16>, vector<32x96xbf16>, vector<8x96xf32> -> vector<8x96xf32>
    %c0_12 = arith.constant 0 : index
    %c0_13 = arith.constant 0 : index
    %26 = vector.load %arg5[%c0_12, %c0_13] : memref<1x96xf32, #tpu.memory_space<vmem>>, vector<1x96xf32>
    %27 = vector.broadcast %26 : vector<1x96xf32> to vector<8x96xf32>
    %28 = arith.addf %25, %27 : vector<8x96xf32>
    %29 = vector.extract_strided_slice %28 {offsets = [0, 0], sizes = [8, 32], strides = [1, 1]} : vector<8x96xf32> to vector<8x32xf32>
    %30 = vector.extract_strided_slice %28 {offsets = [0, 32], sizes = [8, 32], strides = [1, 1]} : vector<8x96xf32> to vector<8x32xf32>
    %31 = vector.extract_strided_slice %28 {offsets = [0, 64], sizes = [8, 32], strides = [1, 1]} : vector<8x96xf32> to vector<8x32xf32>
    %32 = arith.truncf %31 : vector<8x32xf32> to vector<8x32xbf16>
    %c0_14 = arith.constant 0 : index
    %c0_15 = arith.constant 0 : index
    %33 = vector.load %arg8[%c0_14, %c0_15] : memref<32x4xf32, #tpu.memory_space<vmem>>, vector<32x4xf32>
    %34 = tpu.concatenate %29, %30 in 0 : vector<8x32xf32>, vector<8x32xf32> -> vector<16x32xf32>
    %35 = arith.mulf %34, %34 : vector<16x32xf32>
    %36 = tpu.concatenate %34, %35 in 0 : vector<16x32xf32>, vector<16x32xf32> -> vector<32x32xf32>
    %cst_16 = arith.constant dense<0.000000e+00> : vector<32x4xf32>
    %37 = tpu.matmul %36, %33, %cst_16 {dimension_numbers = #tpu.dot_dimension_numbers<[1], [0], [0], [1], [0, 0, 1, 1], [], []>} : vector<32x32xf32>, vector<32x4xf32>, vector<32x4xf32> -> vector<32x4xf32>
    %cst_17 = arith.constant 1.250000e-01 : f32
    %38 = vector.broadcast %cst_17 : f32 to vector<32x4xf32>
    %39 = arith.mulf %37, %38 : vector<32x4xf32>
    %cst_18 = arith.constant dense<0.000000e+00> : vector<32x32xf32>
    %40 = tpu.matmul %39, %33, %cst_18 {dimension_numbers = #tpu.dot_dimension_numbers<[1], [1], [0], [0], [0, 0, 1, 0], [], []>} : vector<32x4xf32>, vector<32x4xf32>, vector<32x32xf32> -> vector<32x32xf32>
    %41 = vector.extract_strided_slice %40 {offsets = [0, 0], sizes = [16, 32], strides = [1, 1]} : vector<32x32xf32> to vector<16x32xf32>
    %42 = vector.extract_strided_slice %40 {offsets = [16, 0], sizes = [16, 32], strides = [1, 1]} : vector<32x32xf32> to vector<16x32xf32>
    %43 = arith.mulf %41, %41 : vector<16x32xf32>
    %44 = arith.subf %42, %43 : vector<16x32xf32>
    %cst_19 = arith.constant 0.000000e+00 : f32
    %45 = vector.broadcast %cst_19 : f32 to vector<16x32xf32>
    %46 = arith.maximumf %44, %45 : vector<16x32xf32>
    %47 = arith.subf %34, %41 : vector<16x32xf32>
    %cst_20 = arith.constant 9.99999974E-6 : f32
    %48 = vector.broadcast %cst_20 : f32 to vector<16x32xf32>
    %49 = arith.addf %46, %48 : vector<16x32xf32>
    %50 = math.rsqrt %49 : vector<16x32xf32>
    %51 = arith.mulf %47, %50 : vector<16x32xf32>
    %c0_21 = arith.constant 0 : index
    %c0_22 = arith.constant 0 : index
    %52 = vector.load %arg6[%c0_21, %c0_22] : memref<1x32xf32, #tpu.memory_space<vmem>>, vector<1x32xf32>
    %53 = vector.broadcast %52 : vector<1x32xf32> to vector<16x32xf32>
    %54 = arith.mulf %51, %53 : vector<16x32xf32>
    %c0_23 = arith.constant 0 : index
    %c0_24 = arith.constant 0 : index
    %55 = vector.load %arg7[%c0_23, %c0_24] : memref<1x32xf32, #tpu.memory_space<vmem>>, vector<1x32xf32>
    %56 = vector.broadcast %55 : vector<1x32xf32> to vector<16x32xf32>
    %57 = arith.addf %54, %56 : vector<16x32xf32>
    %c0_25 = arith.constant 0 : index
    %c0_26 = arith.constant 0 : index
    %58 = vector.load %arg10[%c0_25, %c0_26] : memref<32x64xf32, #tpu.memory_space<vmem>>, vector<32x64xf32>
    %c0_27 = arith.constant 0 : index
    %c0_28 = arith.constant 0 : index
    %59 = vector.load %arg9[%c0_27, %c0_28] : memref<32x64xf32, #tpu.memory_space<vmem>>, vector<32x64xf32>
    %c0_29 = arith.constant 0 : index
    %c0_30 = arith.constant 0 : index
    %60 = vector.load %arg11[%c0_29, %c0_30] : memref<6x64xf32, #tpu.memory_space<vmem>>, vector<1x64xf32>
    %c1 = arith.constant 1 : index
    %c0_31 = arith.constant 0 : index
    %61 = vector.load %arg11[%c1, %c0_31] : memref<6x64xf32, #tpu.memory_space<vmem>>, vector<1x64xf32>
    %c2 = arith.constant 2 : index
    %c0_32 = arith.constant 0 : index
    %62 = vector.load %arg11[%c2, %c0_32] : memref<6x64xf32, #tpu.memory_space<vmem>>, vector<1x64xf32>
    %c3 = arith.constant 3 : index
    %c0_33 = arith.constant 0 : index
    %63 = vector.load %arg11[%c3, %c0_33] : memref<6x64xf32, #tpu.memory_space<vmem>>, vector<1x64xf32>
    %c4 = arith.constant 4 : index
    %c0_34 = arith.constant 0 : index
    %64 = vector.load %arg11[%c4, %c0_34] : memref<6x64xf32, #tpu.memory_space<vmem>>, vector<1x64xf32>
    %c5 = arith.constant 5 : index
    %c0_35 = arith.constant 0 : index
    %65 = vector.load %arg11[%c5, %c0_35] : memref<6x64xf32, #tpu.memory_space<vmem>>, vector<1x64xf32>
    %cst_36 = arith.constant dense<0.000000e+00> : vector<16x64xf32>
    %66 = tpu.matmul %57, %58, %cst_36 {dimension_numbers = #tpu.dot_dimension_numbers<[1], [0], [0], [1], [0, 0, 1, 1], [], []>} : vector<16x32xf32>, vector<32x64xf32>, vector<16x64xf32> -> vector<16x64xf32>
    %67 = arith.mulf %57, %57 : vector<16x32xf32>
    %cst_37 = arith.constant dense<0.000000e+00> : vector<16x64xf32>
    %68 = tpu.matmul %67, %59, %cst_37 {dimension_numbers = #tpu.dot_dimension_numbers<[1], [0], [0], [1], [0, 0, 1, 1], [], []>} : vector<16x32xf32>, vector<32x64xf32>, vector<16x64xf32> -> vector<16x64xf32>
    %cst_38 = arith.constant 2.000000e+00 : f32
    %69 = vector.broadcast %cst_38 : f32 to vector<16x64xf32>
    %70 = arith.mulf %69, %66 : vector<16x64xf32>
    %71 = arith.subf %68, %70 : vector<16x64xf32>
    %72 = vector.broadcast %60 : vector<1x64xf32> to vector<16x64xf32>
    %73 = arith.addf %71, %72 : vector<16x64xf32>
    %cst_39 = arith.constant 0.000000e+00 : f32
    %74 = vector.broadcast %cst_39 : f32 to vector<16x64xf32>
    %75 = arith.maximumf %73, %74 : vector<16x64xf32>
    %76 = math.sqrt %75 : vector<16x64xf32>
    %77 = vector.broadcast %61 : vector<1x64xf32> to vector<16x64xf32>
    %78 = arith.subf %76, %77 : vector<16x64xf32>
    %79 = math.absf %78 : vector<16x64xf32>
    %80 = arith.mulf %79, %79 : vector<16x64xf32>
    %81 = arith.mulf %62, %62 : vector<1x64xf32>
    %82 = vector.broadcast %81 : vector<1x64xf32> to vector<16x64xf32>
    %83 = arith.addf %80, %82 : vector<16x64xf32>
    %84 = math.sqrt %83 : vector<16x64xf32>
    %85 = vector.broadcast %62 : vector<1x64xf32> to vector<16x64xf32>
    %86 = arith.subf %84, %85 : vector<16x64xf32>
    %87 = math.absf %86 : vector<16x64xf32>
    %88 = vector.broadcast %63 : vector<1x64xf32> to vector<16x64xf32>
    %89 = arith.mulf %88, %79 : vector<16x64xf32>
    %cst_40 = arith.constant 1.000000e+00 : f32
    %90 = vector.broadcast %cst_40 : f32 to vector<1x64xf32>
    %91 = arith.subf %90, %63 : vector<1x64xf32>
    %92 = vector.broadcast %91 : vector<1x64xf32> to vector<16x64xf32>
    %93 = arith.mulf %92, %87 : vector<16x64xf32>
    %94 = arith.addf %89, %93 : vector<16x64xf32>
    %95 = arith.mulf %94, %94 : vector<16x64xf32>
    %96 = vector.broadcast %64 : vector<1x64xf32> to vector<16x64xf32>
    %97 = arith.mulf %96, %95 : vector<16x64xf32>
    %cst_41 = arith.constant 1.000000e+00 : f32
    %98 = vector.broadcast %cst_41 : f32 to vector<1x64xf32>
    %99 = arith.subf %98, %64 : vector<1x64xf32>
    %100 = vector.broadcast %99 : vector<1x64xf32> to vector<16x64xf32>
    %101 = arith.mulf %100, %75 : vector<16x64xf32>
    %102 = arith.addf %97, %101 : vector<16x64xf32>
    %cst_42 = arith.constant -5.000000e-01 : f32
    %103 = vector.broadcast %cst_42 : f32 to vector<16x64xf32>
    %104 = arith.mulf %103, %102 : vector<16x64xf32>
    %105 = math.exp %104 : vector<16x64xf32>
    %106 = vector.extract_strided_slice %105 {offsets = [0, 0], sizes = [8, 64], strides = [1, 1]} : vector<16x64xf32> to vector<8x64xf32>
    %107 = vector.broadcast %65 : vector<1x64xf32> to vector<8x64xf32>
    %108 = arith.mulf %106, %107 : vector<8x64xf32>
    %109 = vector.extract_strided_slice %105 {offsets = [8, 0], sizes = [8, 64], strides = [1, 1]} : vector<16x64xf32> to vector<8x64xf32>
    %110 = vector.extract_strided_slice %108 {offsets = [0, 0], sizes = [8, 16], strides = [1, 1]} : vector<8x64xf32> to vector<8x16xf32>
    %111 = vector.extract_strided_slice %109 {offsets = [0, 0], sizes = [8, 16], strides = [1, 1]} : vector<8x64xf32> to vector<8x16xf32>
    %cst_43 = arith.constant dense<0.000000e+00> : vector<8x8xf32>
    %112 = tpu.matmul %110, %111, %cst_43 {dimension_numbers = #tpu.dot_dimension_numbers<[1], [1], [0], [0], [0, 0, 1, 0], [], []>} : vector<8x16xf32>, vector<8x16xf32>, vector<8x8xf32> -> vector<8x8xf32>
    %cst_44 = arith.constant dense<0xFF800000> : vector<8xf32>
    %113 = vector.multi_reduction <maximumf>, %112, %cst_44 [1] : vector<8x8xf32> to vector<8xf32>
    %114 = vector.shape_cast %113 : vector<8xf32> to vector<8x1xf32>
    %115 = vector.broadcast %114 : vector<8x1xf32> to vector<8x8xf32>
    %116 = arith.subf %112, %115 : vector<8x8xf32>
    %117 = math.exp %116 : vector<8x8xf32>
    %cst_45 = arith.constant dense<0.000000e+00> : vector<8xf32>
    %118 = vector.multi_reduction <add>, %117, %cst_45 [1] : vector<8x8xf32> to vector<8xf32>
    %119 = vector.shape_cast %118 : vector<8xf32> to vector<8x1xf32>
    %120 = vector.extract_strided_slice %32 {offsets = [0, 0], sizes = [8, 8], strides = [1, 1]} : vector<8x32xbf16> to vector<8x8xbf16>
    %121 = arith.truncf %117 : vector<8x8xf32> to vector<8x8xbf16>
    %cst_46 = arith.constant dense<0.000000e+00> : vector<8x8xf32>
    %122 = tpu.matmul %121, %120, %cst_46 {dimension_numbers = #tpu.dot_dimension_numbers<[1], [0], [0], [1], [0, 0, 1, 1], [], []>} : vector<8x8xbf16>, vector<8x8xbf16>, vector<8x8xf32> -> vector<8x8xf32>
    %cst_47 = arith.constant 1.000000e+00 : f32
    %123 = vector.broadcast %cst_47 : f32 to vector<8x1xf32>
    %124 = arith.divf %123, %119 : vector<8x1xf32>
    %125 = vector.broadcast %124 : vector<8x1xf32> to vector<8x8xf32>
    %126 = arith.mulf %122, %125 : vector<8x8xf32>
    %127 = vector.extract_strided_slice %108 {offsets = [0, 16], sizes = [8, 16], strides = [1, 1]} : vector<8x64xf32> to vector<8x16xf32>
    %128 = vector.extract_strided_slice %109 {offsets = [0, 16], sizes = [8, 16], strides = [1, 1]} : vector<8x64xf32> to vector<8x16xf32>
    %cst_48 = arith.constant dense<0.000000e+00> : vector<8x8xf32>
    %129 = tpu.matmul %127, %128, %cst_48 {dimension_numbers = #tpu.dot_dimension_numbers<[1], [1], [0], [0], [0, 0, 1, 0], [], []>} : vector<8x16xf32>, vector<8x16xf32>, vector<8x8xf32> -> vector<8x8xf32>
    %cst_49 = arith.constant dense<0xFF800000> : vector<8xf32>
    %130 = vector.multi_reduction <maximumf>, %129, %cst_49 [1] : vector<8x8xf32> to vector<8xf32>
    %131 = vector.shape_cast %130 : vector<8xf32> to vector<8x1xf32>
    %132 = vector.broadcast %131 : vector<8x1xf32> to vector<8x8xf32>
    %133 = arith.subf %129, %132 : vector<8x8xf32>
    %134 = math.exp %133 : vector<8x8xf32>
    %cst_50 = arith.constant dense<0.000000e+00> : vector<8xf32>
    %135 = vector.multi_reduction <add>, %134, %cst_50 [1] : vector<8x8xf32> to vector<8xf32>
    %136 = vector.shape_cast %135 : vector<8xf32> to vector<8x1xf32>
    %137 = vector.extract_strided_slice %32 {offsets = [0, 8], sizes = [8, 8], strides = [1, 1]} : vector<8x32xbf16> to vector<8x8xbf16>
    %138 = arith.truncf %134 : vector<8x8xf32> to vector<8x8xbf16>
    %cst_51 = arith.constant dense<0.000000e+00> : vector<8x8xf32>
    %139 = tpu.matmul %138, %137, %cst_51 {dimension_numbers = #tpu.dot_dimension_numbers<[1], [0], [0], [1], [0, 0, 1, 1], [], []>} : vector<8x8xbf16>, vector<8x8xbf16>, vector<8x8xf32> -> vector<8x8xf32>
    %cst_52 = arith.constant 1.000000e+00 : f32
    %140 = vector.broadcast %cst_52 : f32 to vector<8x1xf32>
    %141 = arith.divf %140, %136 : vector<8x1xf32>
    %142 = vector.broadcast %141 : vector<8x1xf32> to vector<8x8xf32>
    %143 = arith.mulf %139, %142 : vector<8x8xf32>
    %144 = vector.extract_strided_slice %108 {offsets = [0, 32], sizes = [8, 16], strides = [1, 1]} : vector<8x64xf32> to vector<8x16xf32>
    %145 = vector.extract_strided_slice %109 {offsets = [0, 32], sizes = [8, 16], strides = [1, 1]} : vector<8x64xf32> to vector<8x16xf32>
    %cst_53 = arith.constant dense<0.000000e+00> : vector<8x8xf32>
    %146 = tpu.matmul %144, %145, %cst_53 {dimension_numbers = #tpu.dot_dimension_numbers<[1], [1], [0], [0], [0, 0, 1, 0], [], []>} : vector<8x16xf32>, vector<8x16xf32>, vector<8x8xf32> -> vector<8x8xf32>
    %cst_54 = arith.constant dense<0xFF800000> : vector<8xf32>
    %147 = vector.multi_reduction <maximumf>, %146, %cst_54 [1] : vector<8x8xf32> to vector<8xf32>
    %148 = vector.shape_cast %147 : vector<8xf32> to vector<8x1xf32>
    %149 = vector.broadcast %148 : vector<8x1xf32> to vector<8x8xf32>
    %150 = arith.subf %146, %149 : vector<8x8xf32>
    %151 = math.exp %150 : vector<8x8xf32>
    %cst_55 = arith.constant dense<0.000000e+00> : vector<8xf32>
    %152 = vector.multi_reduction <add>, %151, %cst_55 [1] : vector<8x8xf32> to vector<8xf32>
    %153 = vector.shape_cast %152 : vector<8xf32> to vector<8x1xf32>
    %154 = vector.extract_strided_slice %32 {offsets = [0, 16], sizes = [8, 8], strides = [1, 1]} : vector<8x32xbf16> to vector<8x8xbf16>
    %155 = arith.truncf %151 : vector<8x8xf32> to vector<8x8xbf16>
    %cst_56 = arith.constant dense<0.000000e+00> : vector<8x8xf32>
    %156 = tpu.matmul %155, %154, %cst_56 {dimension_numbers = #tpu.dot_dimension_numbers<[1], [0], [0], [1], [0, 0, 1, 1], [], []>} : vector<8x8xbf16>, vector<8x8xbf16>, vector<8x8xf32> -> vector<8x8xf32>
    %cst_57 = arith.constant 1.000000e+00 : f32
    %157 = vector.broadcast %cst_57 : f32 to vector<8x1xf32>
    %158 = arith.divf %157, %153 : vector<8x1xf32>
    %159 = vector.broadcast %158 : vector<8x1xf32> to vector<8x8xf32>
    %160 = arith.mulf %156, %159 : vector<8x8xf32>
    %161 = vector.extract_strided_slice %108 {offsets = [0, 48], sizes = [8, 16], strides = [1, 1]} : vector<8x64xf32> to vector<8x16xf32>
    %162 = vector.extract_strided_slice %109 {offsets = [0, 48], sizes = [8, 16], strides = [1, 1]} : vector<8x64xf32> to vector<8x16xf32>
    %cst_58 = arith.constant dense<0.000000e+00> : vector<8x8xf32>
    %163 = tpu.matmul %161, %162, %cst_58 {dimension_numbers = #tpu.dot_dimension_numbers<[1], [1], [0], [0], [0, 0, 1, 0], [], []>} : vector<8x16xf32>, vector<8x16xf32>, vector<8x8xf32> -> vector<8x8xf32>
    %cst_59 = arith.constant dense<0xFF800000> : vector<8xf32>
    %164 = vector.multi_reduction <maximumf>, %163, %cst_59 [1] : vector<8x8xf32> to vector<8xf32>
    %165 = vector.shape_cast %164 : vector<8xf32> to vector<8x1xf32>
    %166 = vector.broadcast %165 : vector<8x1xf32> to vector<8x8xf32>
    %167 = arith.subf %163, %166 : vector<8x8xf32>
    %168 = math.exp %167 : vector<8x8xf32>
    %cst_60 = arith.constant dense<0.000000e+00> : vector<8xf32>
    %169 = vector.multi_reduction <add>, %168, %cst_60 [1] : vector<8x8xf32> to vector<8xf32>
    %170 = vector.shape_cast %169 : vector<8xf32> to vector<8x1xf32>
    %171 = vector.extract_strided_slice %32 {offsets = [0, 24], sizes = [8, 8], strides = [1, 1]} : vector<8x32xbf16> to vector<8x8xbf16>
    %172 = arith.truncf %168 : vector<8x8xf32> to vector<8x8xbf16>
    %cst_61 = arith.constant dense<0.000000e+00> : vector<8x8xf32>
    %173 = tpu.matmul %172, %171, %cst_61 {dimension_numbers = #tpu.dot_dimension_numbers<[1], [0], [0], [1], [0, 0, 1, 1], [], []>} : vector<8x8xbf16>, vector<8x8xbf16>, vector<8x8xf32> -> vector<8x8xf32>
    %cst_62 = arith.constant 1.000000e+00 : f32
    %174 = vector.broadcast %cst_62 : f32 to vector<8x1xf32>
    %175 = arith.divf %174, %170 : vector<8x1xf32>
    %176 = vector.broadcast %175 : vector<8x1xf32> to vector<8x8xf32>
    %177 = arith.mulf %173, %176 : vector<8x8xf32>
    %178 = tpu.concatenate %126, %143, %160, %177 in 1 : vector<8x8xf32>, vector<8x8xf32>, vector<8x8xf32>, vector<8x8xf32> -> vector<8x32xf32>
    %c0_63 = arith.constant 0 : index
    %c0_64 = arith.constant 0 : index
    %179 = vector.load %arg13[%c0_63, %c0_64] : memref<1x32xf32, #tpu.memory_space<vmem>>, vector<1x32xf32>
    %180 = vector.broadcast %179 : vector<1x32xf32> to vector<8x32xf32>
    %181 = arith.addf %0, %180 : vector<8x32xf32>
    %182 = arith.truncf %178 : vector<8x32xf32> to vector<8x32xbf16>
    %c0_65 = arith.constant 0 : index
    %c0_66 = arith.constant 0 : index
    %183 = vector.load %arg12[%c0_65, %c0_66] : memref<32x32xbf16, #tpu.memory_space<vmem>>, vector<32x32xbf16>
    %cst_67 = arith.constant dense<0.000000e+00> : vector<8x32xf32>
    %184 = tpu.matmul %182, %183, %cst_67 {dimension_numbers = #tpu.dot_dimension_numbers<[1], [0], [0], [1], [0, 0, 1, 1], [], []>} : vector<8x32xbf16>, vector<32x32xbf16>, vector<8x32xf32> -> vector<8x32xf32>
    %185 = arith.addf %181, %184 : vector<8x32xf32>
    %c0_68 = arith.constant 0 : index
    %c0_69 = arith.constant 0 : index
    %186 = vector.load %arg14[%c0_68, %c0_69] : memref<8x32xf32, #tpu.memory_space<vmem>>, vector<8x32xf32>
    tpu.vector_store %arg14[%c0_68, %c0_69], %185 {strides = array<i32>} : memref<8x32xf32, #tpu.memory_space<vmem>>, vector<8x32xf32>,
    return
  }
  func.func @transform_0(%arg0: i32) -> (i32, i32) {
    %c0_i32 = arith.constant 0 : i32
    %c0_i32_0 = arith.constant 0 : i32
    return %arg0, %c0_i32 : i32, i32
  }
  func.func @transform_1(%arg0: i32) -> (i32, i32) {
    %c0_i32 = arith.constant 0 : i32
    %c0_i32_0 = arith.constant 0 : i32
    %c0_i32_1 = arith.constant 0 : i32
    return %c0_i32, %c0_i32_0 : i32, i32
  }
  func.func @transform_2(%arg0: i32) -> (i32, i32) {
    %c0_i32 = arith.constant 0 : i32
    %c0_i32_0 = arith.constant 0 : i32
    %c0_i32_1 = arith.constant 0 : i32
    return %c0_i32, %c0_i32_0 : i32, i32
  }
  func.func @transform_3(%arg0: i32) -> (i32, i32) {
    %c0_i32 = arith.constant 0 : i32
    %c0_i32_0 = arith.constant 0 : i32
    %c0_i32_1 = arith.constant 0 : i32
    return %c0_i32, %c0_i32_0 : i32, i32
  }
  func.func @transform_4(%arg0: i32) -> (i32, i32) {
    %c0_i32 = arith.constant 0 : i32
    %c0_i32_0 = arith.constant 0 : i32
    %c0_i32_1 = arith.constant 0 : i32
    return %c0_i32, %c0_i32_0 : i32, i32
  }
  func.func @transform_5(%arg0: i32) -> (i32, i32) {
    %c0_i32 = arith.constant 0 : i32
    %c0_i32_0 = arith.constant 0 : i32
    %c0_i32_1 = arith.constant 0 : i32
    return %c0_i32, %c0_i32_0 : i32, i32
  }
  func.func @transform_6(%arg0: i32) -> (i32, i32) {
    %c0_i32 = arith.constant 0 : i32
    %c0_i32_0 = arith.constant 0 : i32
    %c0_i32_1 = arith.constant 0 : i32
    return %c0_i32, %c0_i32_0 : i32, i32
  }
  func.func @transform_7(%arg0: i32) -> (i32, i32) {
    %c0_i32 = arith.constant 0 : i32
    %c0_i32_0 = arith.constant 0 : i32
    %c0_i32_1 = arith.constant 0 : i32
    return %c0_i32, %c0_i32_0 : i32, i32
  }
  func.func @transform_8(%arg0: i32) -> (i32, i32) {
    %c0_i32 = arith.constant 0 : i32
    %c0_i32_0 = arith.constant 0 : i32
    %c0_i32_1 = arith.constant 0 : i32
    return %c0_i32, %c0_i32_0 : i32, i32
  }
  func.func @transform_9(%arg0: i32) -> (i32, i32) {
    %c0_i32 = arith.constant 0 : i32
    %c0_i32_0 = arith.constant 0 : i32
    %c0_i32_1 = arith.constant 0 : i32
    return %c0_i32, %c0_i32_0 : i32, i32
  }
  func.func @transform_10(%arg0: i32) -> (i32, i32) {
    %c0_i32 = arith.constant 0 : i32
    %c0_i32_0 = arith.constant 0 : i32
    %c0_i32_1 = arith.constant 0 : i32
    return %c0_i32, %c0_i32_0 : i32, i32
  }
  func.func @transform_11(%arg0: i32) -> (i32, i32) {
    %c0_i32 = arith.constant 0 : i32
    %c0_i32_0 = arith.constant 0 : i32
    %c0_i32_1 = arith.constant 0 : i32
    return %c0_i32, %c0_i32_0 : i32, i32
  }
  func.func @transform_12(%arg0: i32) -> (i32, i32) {
    %c0_i32 = arith.constant 0 : i32
    %c0_i32_0 = arith.constant 0 : i32
    %c0_i32_1 = arith.constant 0 : i32
    return %c0_i32, %c0_i32_0 : i32, i32
  }
  func.func @transform_13(%arg0: i32) -> (i32, i32) {
    %c0_i32 = arith.constant 0 : i32
    %c0_i32_0 = arith.constant 0 : i32
    return %arg0, %c0_i32 : i32, i32
  }
}

</mosaic_0001>

<bundles_post_ra>
// kernel: tpu_custom_call.1
= control target key start
LH: loop header
LB: loop body
LE: loop exit
PB: predicated region body
PF: predicated region fallthrough
CT: control target
= control target key end

     0   :  { %6 = vsyncpa [#allocation3], 0  ;;  %s485_s0 = inlined_call_operand.hbm [shape: f32[16,128], index: 0, kind: input, shape index: {}]   ;;  %s486_s1 = inlined_call_operand.hbm [shape: f32[16,128], index: 1, kind: output, shape index: {}]  }
   0x1   :  { %7 = vsyncpa [#allocation4], 0 }
   0x2   :  { %9 = vsyncpa [#allocation4 + $0x1], 0  ;;  %s352_s6 = smov 0   ;;  %s354_s7 = smov 0  }
   0x3   :  { %s356_s8 = smov 0   ;;  %s358_s9 = smov 0  }
   0x4 LB: > { %s373_s10 = sadd.s32 4294967295, %s338_s9   ;;  %s184_s11 = sadd.s32 4294967294, %s338_s9   ;;  %s338_s9 = sphi %s358_s9, %s502_s9   ;;  %s334_s8 = sphi %s356_s8, %s501_s8   ;;  %s330_s7 = sphi %s354_s7, %s500_s7   ;;  %s326_s6 = sphi %s352_s6, %s499_s6  }
   0x5   : > { %s377_s12 = sadd.s32 1, %s338_s9   ;;  %s43_s13 = sadd.s32 1, %s334_s8 }
   0x6   : > { %s40_s14 = ssub.s32 %s338_s9, %s377_s12  ;;  %p53_p0 = scmp.ne.s32.totalorder %s334_s8, %s330_s7 }
   0x7   : > { %p41_p1 = scmp.eq.s32.totalorder %s40_s14, 0  ;;  %p54_p2 = scmp.eq.s32.totalorder %s373_s10, 1 }
   0x8   : > { %p59_p3 = scmp.ne.s32.totalorder %s330_s7, %s326_s6  ;;  %p60_p4 = scmp.eq.s32.totalorder %s184_s11, 1 }
   0x9   : > { %s388_s15 = scalar_select %p41_p1, %s334_s8, %s43_s13  }
   0xa   : > { %p390_p5 = por %p54_p2, %p53_p0  ;;  %p394_p6 = por %p60_p4, %p59_p3 }
   0xb   : > { %p185_p7 = scmp.ge.s32.totalorder %s338_s9, 1  ;;  %p67_p8 = scmp.lt.s32.totalorder %s338_s9, 3 }
   0xc   : > { %s490_s16 = scalar_select %p390_p5, 1, 0 }
   0xd   : > { %s491_s17 = scalar_select %p394_p6, 1, 0 }
   0xe   : > { %p487_p9 = scmp.eq.s32.totalorder %s373_s10, 0  ;;  %p401_p10 = pnand %p185_p7, %p67_p8 }
   0xf   : > { %s340_s19 = smov [#allocation2]   ;;  %s244_s24 = scalar_lea.hbm %s485_s0, 128 }
  0x10   : > { %s492_s18 = scalar_select %p401_p10, 1, 0 }
  0x11   : > { %s80_s20 = sshll.u32 %s340_s19, 4  ;;  %p200_p11 = pneg %p401_p10  ;;  %s81_s20 = int_to_ptr.vmem [resolvable:$true] %s80_s20 }
  0x12   : > { %p245_p13 = scmp.ne.s32.totalorder %s485_s0, %s244_s24  ;;  %s249_s29 = scalar_lea.hbm %s485_s0, 256 }
  0x13   : > { %p409_p12 = pnand %p487_p9, %p200_p11  ;;  %p250_p3 = scmp.lt.u32.totalorder %s249_s29, %s244_s24 }
  0x14   : > { %p251_p4 = scmp.lt.u32.totalorder %s244_s24, %s485_s0 }
  0x15   : > { %p246_p0 = pneg %p409_p12 }
  0x16   : > { %p252_p7 = por %p251_p4, %p250_p3 }
  0x17   : > { %p247_p1 = pnand %p246_p0, %p245_p13 }
  0x19   : > { %p248_p2 = pneg %p247_p1 }
  0x1b   : > { %p253_p8 = pnand %p252_p7, %p248_p2 }
  0x1d   : > { %256 = shalt.err (!%p253_p8)
}
  0x1e   : > { %s257_s3 = scalar_lea.vmem %s81_s20, 128  ;;  %p265_p5 = scmp.lt.s32.totalorder %s81_s20, %s81_s20 }
  0x1f   : > { %p258_p11 = scmp.ne.s32.totalorder %s81_s20, %s257_s3  ;;  %p266_p10 = scmp.lt.s32.totalorder %s257_s3, %s257_s3 }
  0x21   : > { %p260_p9 = pnand %p258_p11, %p246_p0  ;;  %p267_p13 = por %p266_p10, %p265_p5 }
  0x23   : > { %p261_p6 = pneg %p260_p9 }
  0x25   : > { %p268_p1 = pnand %p267_p13, %p261_p6 }
  0x27   : > { %271 = shalt.err (!%p268_p1)
}
  0x28   : > { %203 = dma.hbm_to_vmem [thread:$0]  (!%p409_p12), %s485_s0, 128, %s81_s20, [#allocation3]  }
  0x29   : > { %p494_p3 = scmp.ne.s32.totalorder %s492_s18, 0 }
  0x2a   : > { %p495_p2 = scmp.eq.s32.totalorder (!%p494_p3), %s373_s10, 0 }
  0x2b   : > { %93 = sbr.rel (%p494_p3) target bundleno = 77 (0x4d), region = 24 }
  0x32   : > { %317 = dma.done.wait (%p495_p2), [#allocation3], 128   ;;  %p496_p0 = pmov %p495_p2 }
  0x33   : > { %s105_s11 = sand.u32 1, %s330_s7   ;;  %s191_s21 = sshll.u32 %s373_s10, 7  ;;  %v108_v0 = vld [vmem:[#allocation2] sm:$0xff] }
  0x34   : > { %319 = vsyncadd (%p496_p0), [#allocation3], 4294967168  ;;  %s189_s13 = sshll.u32 %s105_s11, 3  ;;  %v109_v1 = vadd.f32 1.0, %v108_v0  ;;  %s445_s22 = scalar_lea.hbm %s486_s1, %s191_s21 }
  0x35   : > { %s107_s14 = scalar_lea.vmem [#allocation5], %s189_s13  ;;  %s112_s23 = scalar_lea.sflag [#allocation4], %s105_s11 }
  0x36   : > { %s125_s19 = sshll.u32 %s107_s14, 4  ;;  %110 = vst [vmem:[%s107_s14] sm:$0xff] %v109_v1  ;;  %p497_p6 = scmp.ne.s32.totalorder %s490_s16, 0  ;;  %s440_s19 = int_to_ptr.vmem [resolvable:$true] %s125_s19 }
  0x37   : > { %s272_s24 = scalar_lea.vmem %s440_s19, 128  ;;  %s341_s10 = smov [#allocation5]  }
  0x38   : > { %p273_p5 = scmp.ne.s32.totalorder %s440_s19, %s272_s24  ;;  %s276_s25 = sshll.u32 %s341_s10, 4  ;;  %s277_s25 = int_to_ptr.vmem [resolvable:$false] %s276_s25 }
  0x39   : > { %s278_s26 = scalar_lea.vmem %s277_s25, 256  ;;  %p279_p12 = scmp.lt.s32.totalorder %s440_s19, %s277_s25 }
  0x3a   : > { %p274_p9 = pnand %p273_p5, %p497_p6  ;;  %p280_p4 = scmp.lt.s32.totalorder %s278_s26, %s272_s24 }
  0x3c   : > { %p275_p10 = pneg %p274_p9  ;;  %p281_p7 = por %p280_p4, %p279_p12 }
  0x3e   : > { %p282_p8 = pnand %p281_p7, %p275_p10 }
  0x40   : > { %285 = shalt.err (!%p282_p8)
}
  0x41   : > { %s286_s27 = scalar_lea.hbm %s445_s22, 128  ;;  %s290_s30 = scalar_lea.hbm %s486_s1, 256 }
  0x42   : > { %p287_p11 = scmp.ne.s32.totalorder %s445_s22, %s286_s27  ;;  %p291_p3 = scmp.lt.u32.totalorder %s445_s22, %s486_s1 }
  0x43   : > { %p292_p2 = scmp.lt.u32.totalorder %s290_s30, %s286_s27  ;;  %p294_p5 = scmp.lt.u32.totalorder %s286_s27, %s445_s22 }
  0x44   : > { %p288_p13 = pnand %p287_p11, %p497_p6 }
  0x45   : > { %p293_p0 = por %p292_p2, %p291_p3 }
  0x46   : > { %p289_p1 = pneg %p288_p13 }
  0x47   : > { %p295_p9 = por %p294_p5, %p293_p0 }
  0x49   : > { %p296_p10 = pnand %p295_p9, %p289_p1 }
  0x4b   : > { %299 = shalt.err (!%p296_p10)
}
  0x4c   : > { %198 = dma.vmem_to_hbm [thread:$0]  (%p497_p6), %s440_s19, 128, %s445_s22, %s112_s23  }
  0x4d PF: > { %p210_p12 = scmp.ge.s32.totalorder %s338_s9, 2  ;;  %s137_s4 = sand.u32 1, %s326_s6  }
  0x4e   : > { %p498_p4 = scmp.ne.s32.totalorder %s491_s17, 0  ;;  %s138_s5 = scalar_lea.sflag [#allocation4], %s137_s4 }
  0x50   : > { %p205_p7 = pnand %p210_p12, %p498_p4 }
  0x52   : > { %321 = dma.done.wait (!%p205_p7), %s138_s5, 128  }
  0x53   : > { %323 = vsyncadd (!%p205_p7), %s138_s5, 4294967168  ;;  %p12_p8 = scmp.ge.s32.totalorder %s377_s12, 4   ;;  %s499_s6 = smov %s330_s7 }
  0x54   : > { %s500_s7 = smov %s334_s8  ;;  %s501_s8 = smov %s388_s15 }
  0x55   : > { %s502_s9 = smov %s377_s12  ;;  %14 = sbr.rel (!%p12_p8) target bundleno = 4 (0x4), region = 61 }
  0x5c   :  { %143 = vsyncpa [#allocation3], 1 }
  0x5d   :  { %145 = vsyncpa [#allocation3 + $0x1], 1 }
  0x5e   :  { %146 = vsyncpa [#allocation4], 1 }
  0x5f   :  { %148 = vsyncpa [#allocation4 + $0x1], 1 }

// kernel: _lambda_.9
= control target key start
LH: loop header
LB: loop body
LE: loop exit
PB: predicated region body
PF: predicated region fallthrough
CT: control target
= control target key end

     0   :  { %9 = vsyncpa [#allocation3], 0  ;;  %s473_s0 = inlined_call_operand.hbm [shape: f32[16,32], index: 0, kind: input, shape index: {}]   ;;  %s474_s1 = inlined_call_operand.hbm [shape: f32[1,32], index: 1, kind: input, shape index: {}]   ;;  %s475_s2 = inlined_call_operand.hbm [shape: f32[1,32], index: 2, kind: input, shape index: {}]   ;;  %s476_s3 = inlined_call_operand.hbm [shape: bf16[32,64], index: 3, kind: input, shape index: {}]   ;;  %s477_s4 = inlined_call_operand.hbm [shape: f32[16,64], index: 4, kind: output, shape index: {}]  }
   0x1   :  { %10 = vsyncpa [#allocation6], 0 }
   0x2   :  { %11 = vsyncpa [#allocation9], 0 }
   0x3   :  { %12 = vsyncpa [#allocation4], 0  ;;  %s352_s15 = smov [#allocation5]   ;;  %s353_s17 = smov [#allocation2]  }
   0x4   :  { %s31_s16 = sshll.u32 %s352_s15, 4  ;;  %s18_s18 = sshll.u32 %s353_s17, 4  ;;  %s32_s16 = int_to_ptr.vmem [resolvable:$true] %s31_s16  ;;  %s388_s18 = int_to_ptr.vmem [resolvable:$true] %s18_s18 }
   0x5   :  { %s234_s21 = scalar_lea.hbm %s474_s1, 16 }
   0x6   :  { %p235_p0 = scmp.ne.s32.totalorder %s474_s1, %s234_s21  ;;  %p238_p1 = scmp.lt.u32.totalorder %s234_s21, %s474_s1 }
   0x8   :  { %p240_p2 = pnand %p238_p1, %p235_p0 }
   0xa   :  { %243 = shalt.err (!%p240_p2)
}
   0xb   :  { %s244_s26 = scalar_lea.vmem %s32_s16, 16  ;;  %s248_s27 = scalar_lea.vmem %s32_s16, 32 }
   0xc   :  { %p245_p3 = scmp.ne.s32.totalorder %s32_s16, %s244_s26  ;;  %p249_p4 = scmp.lt.s32.totalorder %s32_s16, %s32_s16 }
   0xd   :  { %p250_p5 = scmp.lt.s32.totalorder %s248_s27, %s244_s26 }
   0xf   :  { %p251_p6 = por %p250_p5, %p249_p4 }
  0x11   :  { %p252_p7 = pnand %p251_p6, %p245_p3 }
  0x13   :  { %255 = shalt.err (!%p252_p7)
}
  0x14   :  { %34 = dma.hbm_to_vmem [thread:$0]  %s474_s1, 16, %s32_s16, [#allocation6]  }
  0x15   :  { %s256_s6 = scalar_lea.hbm %s473_s0, 256 }
  0x16   :  { %p257_p8 = scmp.ne.s32.totalorder %s473_s0, %s256_s6  ;;  %p260_p9 = scmp.lt.u32.totalorder %s256_s6, %s473_s0 }
  0x18   :  { %p262_p10 = pnand %p260_p9, %p257_p8 }
  0x1a   :  { %265 = shalt.err (!%p262_p10)
}
  0x1b   :  { %s266_s11 = scalar_lea.vmem %s388_s18, 256  ;;  %p271_p12 = scmp.lt.s32.totalorder %s388_s18, %s388_s18 }
  0x1c   :  { %p267_p11 = scmp.ne.s32.totalorder %s388_s18, %s266_s11  ;;  %p272_p13 = scmp.lt.s32.totalorder %s266_s11, %s266_s11 }
  0x1e   :  { %p273_p0 = por %p272_p13, %p271_p12 }
  0x20   :  { %p274_p1 = pnand %p273_p0, %p267_p11 }
  0x22   :  { %277 = shalt.err (!%p274_p1)
}
  0x23   :  { %s354_s1 = smov 128   ;;  %s355_s12 = smov 8  }
  0x24   :  { %24 = dma.hbm_to_vmem [thread:$0]  %s473_s0, 256, %s388_s18, [#allocation3], %s354_s1, %s354_s1, %s355_s12  }
  0x25   :  { %s356_s15 = smov [#allocation7]   ;;  %s357_s17 = smov [#allocation8]  }
  0x26   :  { %s41_s16 = sshll.u32 %s356_s15, 4  ;;  %s50_s19 = sshll.u32 %s357_s17, 4  ;;  %s42_s16 = int_to_ptr.vmem [resolvable:$true] %s41_s16  ;;  %s422_s19 = int_to_ptr.vmem [resolvable:$true] %s50_s19 }
  0x27   :  { %s278_s22 = scalar_lea.hbm %s475_s2, 16 }
  0x28   :  { %p279_p2 = scmp.ne.s32.totalorder %s475_s2, %s278_s22  ;;  %p282_p3 = scmp.lt.u32.totalorder %s278_s22, %s475_s2 }
  0x2a   :  { %p284_p4 = pnand %p282_p3, %p279_p2 }
  0x2c   :  { %287 = shalt.err (!%p284_p4)
}
  0x2d   :  { %s288_s0 = scalar_lea.vmem %s42_s16, 16  ;;  %s292_s18 = scalar_lea.vmem %s42_s16, 32 }
  0x2e   :  { %p289_p5 = scmp.ne.s32.totalorder %s42_s16, %s288_s0  ;;  %p293_p6 = scmp.lt.s32.totalorder %s42_s16, %s42_s16 }
  0x2f   :  { %p294_p7 = scmp.lt.s32.totalorder %s292_s18, %s288_s0 }
  0x31   :  { %p295_p8 = por %p294_p7, %p293_p6 }
  0x33   :  { %p296_p9 = pnand %p295_p8, %p289_p5 }
  0x35   :  { %299 = shalt.err (!%p296_p9)
}
  0x36   :  { %44 = dma.hbm_to_vmem [thread:$0]  %s475_s2, 16, %s42_s16, [#allocation6]  }
  0x37   :  { %s300_s5 = scalar_lea.hbm %s476_s3, 256 }
  0x38   :  { %p301_p10 = scmp.ne.s32.totalorder %s476_s3, %s300_s5  ;;  %p304_p11 = scmp.lt.u32.totalorder %s300_s5, %s476_s3 }
  0x3a   :  { %p306_p12 = pnand %p304_p11, %p301_p10 }
  0x3c   :  { %309 = shalt.err (!%p306_p12)
}
  0x3d   :  { %s310_s10 = scalar_lea.vmem %s422_s19, 256  ;;  %p315_p0 = scmp.lt.s32.totalorder %s422_s19, %s422_s19 }
  0x3e   :  { %p311_p13 = scmp.ne.s32.totalorder %s422_s19, %s310_s10  ;;  %p316_p1 = scmp.lt.s32.totalorder %s310_s10, %s310_s10 }
  0x40   :  { %p317_p2 = por %p316_p1, %p315_p0 }
  0x42   :  { %p318_p3 = pnand %p317_p2, %p311_p13 }
  0x44   :  { %321 = shalt.err (!%p318_p3)
}
  0x45   :  { %s358_s2 = smov 64   ;;  %s359_s11 = smov 4  }
  0x46   :  { %56 = dma.hbm_to_vmem [thread:$0]  %s476_s3, 256, %s422_s19, [#allocation9], %s358_s2, %s358_s2, %s359_s11  }
  0x47   :  { %344 = dma.done.wait [#allocation3], 256  }
  0x48   :  { %345 = vsyncadd [#allocation3], 4294967040 }
  0x49   :  { %346 = dma.done.wait [#allocation6], 32  }
  0x4a   :  { %347 = vsyncadd [#allocation6], 4294967264 }
  0x4b   :  { %348 = dma.done.wait [#allocation9], 256  }
  0x4c   :  { %349 = vsyncadd [#allocation9], 4294967040  ;;  %vm74_vm0 = vcmask 261120   ;;  %v70_v0 = vld [vmem:[#allocation2] sm:$0xff]  ;;  %v71_v1 = vld [vmem:[#allocation2 + $0x8] sm:$0xff]  ;;  %v360_v15 = vmov 0.0  }
  0x4d   :  { %v75_v2 = vsel %vm74_vm0, %v70_v0, 0.0  ;;  %v78_v3 = vsel %vm74_vm0, %v71_v1, 0.0  ;;  %v228_v14 = vld [vmem:[#allocation8] sm:$0xff]   ;;  %209 = vmatprep.subr.bf16.mxu0 %v360_v15  ;;  %v229_v16 = vld [vmem:[#allocation8 + $0x8] sm:$0xff]   ;;  %vm361_vm1 = vmmov 0   ;;  %vm179_vm2 = vcmask 523264  }
  0x4e   :  { %76 = vadd.xlane.f32.xlu0 %v75_v2  ;;  %210 = vmatpush3.bf16.msra.mxu0 %v228_v14  ;;  %v201_v25 = vld [vmem:[#allocation5] ss:$0 sm:$0xff]  ;;  %v202_v29 = vld [vmem:[#allocation7] ss:$0 sm:$0xff]  ;;  %s362_s3 = smov [#allocation10]  }
  0x4f   :  { %213 = vmatprep.mubr.msk.bf16.mxu0 %vm361_vm1, %v360_v15  ;;  %211 = vmatprep.subr.bf16.mxu0 %v360_v15  ;;  %s187_s15 = sshll.u32 %s362_s3, 4  ;;  %s188_s15 = int_to_ptr.vmem [resolvable:$true] %s187_s15 }
  0x50   :  { %s322_s16 = scalar_lea.vmem %s188_s15, 256  ;;  %p327_p5 = scmp.lt.s32.totalorder %s188_s15, %s188_s15 }
  0x51   :  { %p323_p4 = scmp.ne.s32.totalorder %s188_s15, %s322_s16  ;;  %p328_p6 = scmp.lt.s32.totalorder %s322_s16, %s322_s16 }
  0x52   :  { %79 = vadd.xlane.f32.xlu0 %v78_v3  ;;  %212 = vmatpush3.bf16.msra.mxu0 %v229_v16 }
  0x53   :  { %p329_p7 = por %p328_p6, %p327_p5 }
  0x55   :  { %p330_p8 = pnand %p329_p7, %p323_p4 }
  0xdb   :  { %v77_v4 = vpop.xlane.xlu0 %76 }
  0xdc   :  { %v82_v5 = vmul.f32 0.03125, %v77_v4 }
  0xde   :  { %v84_v6 = vsub.f32 %v70_v0, %v82_v5 }
  0xdf   :  { %v80_v7 = vpop.xlane.xlu0 %79 }
  0xe0   :  { %v83_v8 = vmul.f32 0.03125, %v80_v7  ;;  %v86_v9 = vmul.f32 %v84_v6, %v84_v6 }
  0xe2   :  { %v85_v10 = vsub.f32 %v71_v1, %v83_v8  ;;  %v88_v11 = vsel %vm74_vm0, %v86_v9, 0.0 }
  0xe3   :  { %89 = vadd.xlane.f32.xlu1 %v88_v11 }
  0xe4   :  { %v87_v12 = vmul.f32 %v85_v10, %v85_v10 }
  0xe6   :  { %v91_v13 = vsel %vm74_vm0, %v87_v12, 0.0 }
  0xe7   :  { %92 = vadd.xlane.f32.xlu1 %v91_v13 }
 0x170   :  { %v90_v17 = vpop.xlane.xlu1 %89 }
 0x171   :  { %v94_v18 = vmul.f32 0.03125, %v90_v17 }
 0x173   :  { %v96_v19 = vadd.f32 1e-05, %v94_v18 }
 0x174   :  { %v93_v20 = vpop.xlane.xlu1 %92 }
 0x175   :  { %230 = vrsqrt.f32 %v96_v19  ;;  %v95_v21 = vmul.f32 0.03125, %v93_v20 }
 0x177   :  { %v97_v22 = vadd.f32 1e-05, %v95_v21 }
 0x179   :  { %232 = vrsqrt.f32 %v97_v22 }
 0x17f   :  { %v231_v23 = vpop.eup %230 }
 0x180   :  { %v100_v24 = vmul.f32 %v231_v23, %v84_v6 }
 0x182   :  { %v108_v28 = vmul.f32 %v201_v25, %v100_v24 }
 0x183   :  { %v233_v26 = vpop.eup %232 }
 0x184   :  { %v101_v27 = vmul.f32 %v233_v26, %v85_v10  ;;  %v116_v31 = vadd.f32 %v202_v29, %v108_v28 }
 0x186   :  { %v109_v30 = vmul.f32 %v201_v25, %v101_v27 }
 0x188   :  { %v117_v32 = vadd.f32 %v202_v29, %v109_v30 }
 0x18a   :  { %v118_v33 = vpack.c.bf16 %v117_v32, %v116_v31 }
 0x18c   :  { %214 = vmatmul.mubr.msk.bf16.vlgmr.msra.gmra.mrb[0].mxu0 %vm74_vm0, %v118_v33 }
 0x25f   :  { %v172_v34 = vpop.f32.mrb[0].mxu0 }
 0x260   :  { %180 = vst.msk [vmem:[#allocation10] sm:$0xff] %vm179_vm2, %v172_v34  ;;  %v215_v35 = vpop.f32.mrb[1].mxu0 }
 0x261   :  { %v175_v36 = vpop.f32.mrb[2].mxu0 }
 0x262   :  { %181 = vst.msk [vmem:[#allocation10 + $0x8] sm:$0xff] %vm179_vm2, %v175_v36  ;;  %v216_v37 = vpop.f32.mrb[3].mxu0 }
 0x263   :  { %333 = shalt.err (!%p330_p8)
}
 0x264   :  { %s334_s20 = scalar_lea.hbm %s477_s4, 256 }
 0x265   :  { %p335_p9 = scmp.ne.s32.totalorder %s477_s4, %s334_s20  ;;  %p338_p10 = scmp.lt.u32.totalorder %s334_s20, %s477_s4 }
 0x267   :  { %p340_p11 = pnand %p338_p10, %p335_p9 }
 0x269   :  { %343 = shalt.err (!%p340_p11)
}
 0x26a   :  { %193 = dma.vmem_to_hbm [thread:$0]  %s188_s15, 256, %s477_s4, [#allocation4], %s354_s1, %s354_s1, %s355_s12  }
 0x26b   :  { %350 = dma.done.wait [#allocation4], 256  }
 0x26c   :  { %351 = vsyncadd [#allocation4], 4294967040 }
 0x26d   :  { %197 = vsyncpa [#allocation3], 1 }
 0x26e   :  { %198 = vsyncpa [#allocation6], 1 }
 0x26f   :  { %199 = vsyncpa [#allocation9], 1 }
 0x270   :  { %200 = vsyncpa [#allocation4], 1 }

// kernel: _lambda_.6
= control target key start
LH: loop header
LB: loop body
LE: loop exit
PB: predicated region body
PF: predicated region fallthrough
CT: control target
= control target key end

     0   :  { %12 = vsyncpa [#allocation3], 0  ;;  %s888_s0 = inlined_call_operand.hbm [shape: f32[16,32], index: 0, kind: input, shape index: {}]   ;;  %s889_s1 = inlined_call_operand.hbm [shape: f32[1,32], index: 1, kind: input, shape index: {}]   ;;  %s890_s2 = inlined_call_operand.hbm [shape: f32[1,32], index: 2, kind: input, shape index: {}]   ;;  %s891_s3 = inlined_call_operand.hbm [shape: bf16[32,128], index: 3, kind: input, shape index: {}]   ;;  %s892_s4 = inlined_call_operand.hbm [shape: f32[1,128], index: 4, kind: input, shape index: {}]   ;;  %s893_s5 = inlined_call_operand.hbm [shape: bf16[128,32], index: 5, kind: input, shape index: {}]   ;;  %s894_s6 = inlined_call_operand.hbm [shape: f32[1,32], index: 6, kind: input, shape index: {}]   ;;  %s895_s7 = inlined_call_operand.hbm [shape: f32[16,32], index: 7, kind: output, shape index: {}]  }
   0x1   :  { %13 = vsyncpa [#allocation6], 0 }
   0x2   :  { %14 = vsyncpa [#allocation9], 0 }
   0x3   :  { %15 = vsyncpa [#allocation12], 0 }
   0x4   :  { %16 = vsyncpa [#allocation4], 0  ;;  %s700_s24 = smov [#allocation5]   ;;  %s701_s26 = smov [#allocation8]  }
   0x5   :  { %s35_s25 = sshll.u32 %s700_s24, 4  ;;  %s54_s27 = sshll.u32 %s701_s26, 4  ;;  %s36_s25 = int_to_ptr.vmem [resolvable:$true] %s35_s25  ;;  %s755_s27 = int_to_ptr.vmem [resolvable:$true] %s54_s27 }
   0x6   :  { %s514_s30 = scalar_lea.hbm %s889_s1, 16 }
   0x7   :  { %p515_p0 = scmp.ne.s32.totalorder %s889_s1, %s514_s30  ;;  %p518_p1 = scmp.lt.u32.totalorder %s514_s30, %s889_s1 }
   0x9   :  { %p520_p2 = pnand %p518_p1, %p515_p0 }
   0xb   :  { %523 = shalt.err (!%p520_p2)
}
   0xc   :  { %s524_s12 = scalar_lea.vmem %s36_s25, 16  ;;  %s528_s13 = scalar_lea.vmem %s36_s25, 32 }
   0xd   :  { %p525_p3 = scmp.ne.s32.totalorder %s36_s25, %s524_s12  ;;  %p529_p4 = scmp.lt.s32.totalorder %s36_s25, %s36_s25 }
   0xe   :  { %p530_p5 = scmp.lt.s32.totalorder %s528_s13, %s524_s12 }
  0x10   :  { %p531_p6 = por %p530_p5, %p529_p4 }
  0x12   :  { %p532_p7 = pnand %p531_p6, %p525_p3 }
  0x14   :  { %535 = shalt.err (!%p532_p7)
}
  0x15   :  { %38 = dma.hbm_to_vmem [thread:$0]  %s889_s1, 16, %s36_s25, [#allocation6]  }
  0x16   :  { %s536_s18 = scalar_lea.hbm %s891_s3, 256 }
  0x17   :  { %p537_p8 = scmp.ne.s32.totalorder %s891_s3, %s536_s18  ;;  %p540_p9 = scmp.lt.u32.totalorder %s536_s18, %s891_s3 }
  0x19   :  { %p542_p10 = pnand %p540_p9, %p537_p8 }
  0x1b   :  { %545 = shalt.err (!%p542_p10)
}
  0x1c   :  { %s546_s23 = scalar_lea.vmem %s755_s27, 256  ;;  %p551_p12 = scmp.lt.s32.totalorder %s755_s27, %s755_s27 }
  0x1d   :  { %p547_p11 = scmp.ne.s32.totalorder %s755_s27, %s546_s23  ;;  %p552_p13 = scmp.lt.s32.totalorder %s546_s23, %s546_s23 }
  0x1f   :  { %p553_p0 = por %p552_p13, %p551_p12 }
  0x21   :  { %p554_p1 = pnand %p553_p0, %p547_p11 }
  0x23   :  { %557 = shalt.err (!%p554_p1)
}
  0x24   :  { %s702_s1 = smov 64   ;;  %s703_s24 = smov 4  }
  0x25   :  { %60 = dma.hbm_to_vmem [thread:$0]  %s891_s3, 256, %s755_s27, [#allocation9], %s702_s1, %s702_s1, %s703_s24  }
  0x26   :  { %s704_s28 = smov [#allocation11]   ;;  %s705_s30 = smov [#allocation2]  }
  0x27   :  { %s76_s29 = sshll.u32 %s704_s28, 4  ;;  %s22_s8 = sshll.u32 %s705_s30, 4  ;;  %s77_s29 = int_to_ptr.vmem [resolvable:$true] %s76_s29  ;;  %s786_s8 = int_to_ptr.vmem [resolvable:$true] %s22_s8 }
  0x28   :  { %s558_s11 = scalar_lea.hbm %s893_s5, 1024 }
  0x29   :  { %p559_p2 = scmp.ne.s32.totalorder %s893_s5, %s558_s11  ;;  %p562_p3 = scmp.lt.u32.totalorder %s558_s11, %s893_s5 }
  0x2b   :  { %p564_p4 = pnand %p562_p3, %p559_p2 }
  0x2d   :  { %567 = shalt.err (!%p564_p4)
}
  0x2e   :  { %s568_s3 = scalar_lea.vmem %s77_s29, 1024  ;;  %p573_p6 = scmp.lt.s32.totalorder %s77_s29, %s77_s29 }
  0x2f   :  { %p569_p5 = scmp.ne.s32.totalorder %s77_s29, %s568_s3  ;;  %p574_p7 = scmp.lt.s32.totalorder %s568_s3, %s568_s3 }
  0x31   :  { %p575_p8 = por %p574_p7, %p573_p6 }
  0x33   :  { %p576_p9 = pnand %p575_p8, %p569_p5 }
  0x35   :  { %579 = shalt.err (!%p576_p9)
}
  0x36   :  { %82 = dma.hbm_to_vmem [thread:$0]  %s893_s5, 1024, %s77_s29, [#allocation12], %s702_s1, %s702_s1, %s703_s24  }
  0x37   :  { %s580_s19 = scalar_lea.hbm %s888_s0, 256 }
  0x38   :  { %p581_p10 = scmp.ne.s32.totalorder %s888_s0, %s580_s19  ;;  %p584_p11 = scmp.lt.u32.totalorder %s580_s19, %s888_s0 }
  0x3a   :  { %p586_p12 = pnand %p584_p11, %p581_p10 }
  0x3c   :  { %589 = shalt.err (!%p586_p12)
}
  0x3d   :  { %s590_s25 = scalar_lea.vmem %s786_s8, 256  ;;  %p595_p0 = scmp.lt.s32.totalorder %s786_s8, %s786_s8 }
  0x3e   :  { %p591_p13 = scmp.ne.s32.totalorder %s786_s8, %s590_s25  ;;  %p596_p1 = scmp.lt.s32.totalorder %s590_s25, %s590_s25 }
  0x40   :  { %p597_p2 = por %p596_p1, %p595_p0 }
  0x42   :  { %p598_p3 = pnand %p597_p2, %p591_p13 }
  0x44   :  { %601 = shalt.err (!%p598_p3)
}
  0x45   :  { %s706_s5 = smov 128   ;;  %s707_s1 = smov 8  }
  0x46   :  { %28 = dma.hbm_to_vmem [thread:$0]  %s888_s0, 256, %s786_s8, [#allocation3], %s706_s5, %s706_s5, %s707_s1  }
  0x47   :  { %s708_s28 = smov [#allocation7]   ;;  %s709_s30 = smov [#allocation10]  }
  0x48   :  { %s45_s29 = sshll.u32 %s708_s28, 4  ;;  %s67_s9 = sshll.u32 %s709_s30, 4  ;;  %s46_s29 = int_to_ptr.vmem [resolvable:$true] %s45_s29  ;;  %s68_s9 = int_to_ptr.vmem [resolvable:$true] %s67_s9 }
  0x49   :  { %s602_s12 = scalar_lea.hbm %s890_s2, 16 }
  0x4a   :  { %p603_p4 = scmp.ne.s32.totalorder %s890_s2, %s602_s12  ;;  %p606_p5 = scmp.lt.u32.totalorder %s602_s12, %s890_s2 }
  0x4c   :  { %p608_p6 = pnand %p606_p5, %p603_p4 }
  0x4e   :  { %611 = shalt.err (!%p608_p6)
}
  0x4f   :  { %s612_s0 = scalar_lea.vmem %s46_s29, 16  ;;  %s616_s8 = scalar_lea.vmem %s46_s29, 32 }
  0x50   :  { %p613_p7 = scmp.ne.s32.totalorder %s46_s29, %s612_s0  ;;  %p617_p8 = scmp.lt.s32.totalorder %s46_s29, %s46_s29 }
  0x51   :  { %p618_p9 = scmp.lt.s32.totalorder %s616_s8, %s612_s0 }
  0x53   :  { %p619_p10 = por %p618_p9, %p617_p8 }
  0x55   :  { %p620_p11 = pnand %p619_p10, %p613_p7 }
  0x57   :  { %623 = shalt.err (!%p620_p11)
}
  0x58   :  { %48 = dma.hbm_to_vmem [thread:$0]  %s890_s2, 16, %s46_s29, [#allocation6]  }
  0x59   :  { %s624_s19 = scalar_lea.hbm %s892_s4, 16 }
  0x5a   :  { %p625_p12 = scmp.ne.s32.totalorder %s892_s4, %s624_s19  ;;  %p628_p13 = scmp.lt.u32.totalorder %s624_s19, %s892_s4 }
  0x5c   :  { %p630_p0 = pnand %p628_p13, %p625_p12 }
  0x5e   :  { %633 = shalt.err (!%p630_p0)
}
  0x5f   :  { %s634_s25 = scalar_lea.vmem %s68_s9, 16  ;;  %s638_s24 = scalar_lea.vmem %s68_s9, 32 }
  0x60   :  { %p635_p1 = scmp.ne.s32.totalorder %s68_s9, %s634_s25  ;;  %p639_p2 = scmp.lt.s32.totalorder %s68_s9, %s68_s9 }
  0x61   :  { %p640_p3 = scmp.lt.s32.totalorder %s638_s24, %s634_s25 }
  0x63   :  { %p641_p4 = por %p640_p3, %p639_p2 }
  0x65   :  { %p642_p5 = pnand %p641_p4, %p635_p1 }
  0x67   :  { %645 = shalt.err (!%p642_p5)
}
  0x68   :  { %70 = dma.hbm_to_vmem [thread:$0]  %s892_s4, 16, %s68_s9, [#allocation9]  }
  0x69   :  { %s710_s28 = smov [#allocation13]   ;;  %s646_s11 = scalar_lea.hbm %s894_s6, 16 }
  0x6a   :  { %s89_s29 = sshll.u32 %s710_s28, 4  ;;  %p647_p6 = scmp.ne.s32.totalorder %s894_s6, %s646_s11  ;;  %s90_s29 = int_to_ptr.vmem [resolvable:$true] %s89_s29 }
  0x6b   :  { %p650_p7 = scmp.lt.u32.totalorder %s646_s11, %s894_s6 }
  0x6d   :  { %p652_p8 = pnand %p650_p7, %p647_p6 }
  0x6f   :  { %655 = shalt.err (!%p652_p8)
}
  0x70   :  { %s656_s3 = scalar_lea.vmem %s90_s29, 16  ;;  %s660_s4 = scalar_lea.vmem %s90_s29, 32 }
  0x71   :  { %p657_p9 = scmp.ne.s32.totalorder %s90_s29, %s656_s3  ;;  %p661_p10 = scmp.lt.s32.totalorder %s90_s29, %s90_s29 }
  0x72   :  { %p662_p11 = scmp.lt.s32.totalorder %s660_s4, %s656_s3 }
  0x74   :  { %p663_p12 = por %p662_p11, %p661_p10 }
  0x76   :  { %p664_p13 = pnand %p663_p12, %p657_p9 }
  0x78   :  { %667 = shalt.err (!%p664_p13)
}
  0x79   :  { %92 = dma.hbm_to_vmem [thread:$0]  %s894_s6, 16, %s90_s29, [#allocation12]  }
  0x7a   :  { %690 = dma.done.wait [#allocation3], 256  }
  0x7b   :  { %691 = vsyncadd [#allocation3], 4294967040 }
  0x7c   :  { %692 = dma.done.wait [#allocation6], 32  }
  0x7d   :  { %693 = vsyncadd [#allocation6], 4294967264 }
  0x7e   :  { %694 = dma.done.wait [#allocation9], 272  }
  0x7f   :  { %695 = vsyncadd [#allocation9], 4294967024 }
  0x80   :  { %696 = dma.done.wait [#allocation12], 1040  }
  0x81   :  { %697 = vsyncadd [#allocation12], 4294966256  ;;  %vm119_vm0 = vcmask 261120   ;;  %v856_v0 = vld [vmem:[#allocation2] sm:$0xff]  ;;  %v858_v1 = vld [vmem:[#allocation2 + $0x8] sm:$0xff]  ;;  %v711_v15 = vmov 0.0  }
  0x82   :  { %v120_v2 = vsel %vm119_vm0, %v856_v0, 0.0  ;;  %v123_v3 = vsel %vm119_vm0, %v858_v1, 0.0  ;;  %v492_v14 = vld [vmem:[#allocation8] sm:$0xff]   ;;  %449 = vmatprep.subr.bf16.mxu0 %v711_v15  ;;  %457 = vmatprep.subr.bf16.mxu1 %v711_v15  ;;  %v493_v16 = vld [vmem:[#allocation8 + $0x8] sm:$0xff]   ;;  %vm712_vm1 = vmmov 0   ;;  %v494_v34 = vld [vmem:[#allocation11] sm:$0xff]  }
  0x83   :  { %121 = vadd.xlane.f32.xlu0 %v120_v2  ;;  %450 = vmatpush3.bf16.msra.mxu0 %v492_v14  ;;  %v422_v25 = vld [vmem:[#allocation5] ss:$0 sm:$0xff]  ;;  %v423_v29 = vld [vmem:[#allocation7] ss:$0 sm:$0xff]  ;;  %v496_v36 = vld [vmem:[#allocation11 + $0x10] sm:$0xff]   ;;  %s714_s6 = smov [#allocation14]  }
  0x84   :  { %453 = vmatprep.mubr.msk.bf16.mxu0 %vm712_vm1, %v711_v15  ;;  %451 = vmatprep.subr.bf16.mxu0 %v711_v15  ;;  %v495_v35 = vld [vmem:[#allocation11 + $0x8] sm:$0xff]   ;;  %v497_v37 = vld [vmem:[#allocation11 + $0x18] sm:$0xff]   ;;  %v498_v38 = vld [vmem:[#allocation11 + $0x20] sm:$0xff]   ;;  %s407_s8 = sshll.u32 %s714_s6, 4  ;;  %s408_s8 = int_to_ptr.vmem [resolvable:$true] %s407_s8 }
  0x85   :  { %473 = vmatprep.mubr.msk.bf16.mxu1 %vm712_vm1, %v711_v15  ;;  %458 = vmatpush3.bf16.msra.mxu1 %v494_v34  ;;  %v499_v39 = vld [vmem:[#allocation11 + $0x28] sm:$0xff]   ;;  %v500_v40 = vld [vmem:[#allocation11 + $0x30] sm:$0xff]   ;;  %v501_v41 = vld [vmem:[#allocation11 + $0x38] sm:$0xff]   ;;  %s668_s27 = scalar_lea.vmem %s408_s8, 256  ;;  %p673_p1 = scmp.lt.s32.totalorder %s408_s8, %s408_s8 }
  0x86   :  { %459 = vmatprep.subr.bf16.mxu1 %v711_v15  ;;  %v424_v42 = vld [vmem:[#allocation10] ss:$0 sm:$0xff]  ;;  %p669_p0 = scmp.ne.s32.totalorder %s408_s8, %s668_s27  ;;  %p674_p2 = scmp.lt.s32.totalorder %s668_s27, %s668_s27 }
  0x87   :  { %124 = vadd.xlane.f32.xlu0 %v123_v3  ;;  %452 = vmatpush3.bf16.msra.mxu0 %v493_v16 }
  0x88   :  { %p675_p3 = por %p674_p2, %p673_p1 }
  0x89   :  { %460 = vmatpush3.bf16.msra.mxu1 %v495_v35 }
  0x8a   :  { %461 = vmatprep.subr.bf16.mxu1 %v711_v15  ;;  %p676_p4 = pnand %p675_p3, %p669_p0 }
  0x8d   :  { %462 = vmatpush3.bf16.msra.mxu1 %v496_v36 }
  0x8e   :  { %463 = vmatprep.subr.bf16.mxu1 %v711_v15 }
  0x91   :  { %464 = vmatpush3.bf16.msra.mxu1 %v497_v37 }
  0x92   :  { %465 = vmatprep.subr.bf16.mxu1 %v711_v15 }
  0x95   :  { %466 = vmatpush3.bf16.msra.mxu1 %v498_v38 }
  0x96   :  { %467 = vmatprep.subr.bf16.mxu1 %v711_v15 }
  0x99   :  { %468 = vmatpush3.bf16.msra.mxu1 %v499_v39  ;;  %v428_v39 = vld [vmem:[#allocation13] ss:$0 sm:$0xff] }
  0x9a   :  { %469 = vmatprep.subr.bf16.mxu1 %v711_v15 }
  0x9d   :  { %470 = vmatpush3.bf16.msra.mxu1 %v500_v40 }
  0x9e   :  { %471 = vmatprep.subr.bf16.mxu1 %v711_v15 }
  0xa1   :  { %472 = vmatpush3.bf16.msra.mxu1 %v501_v41 }
 0x110   :  { %v122_v4 = vpop.xlane.xlu0 %121 }
 0x111   :  { %v127_v5 = vmul.f32 0.03125, %v122_v4 }
 0x113   :  { %v129_v6 = vsub.f32 %v856_v0, %v127_v5 }
 0x114   :  { %v125_v7 = vpop.xlane.xlu0 %124 }
 0x115   :  { %v128_v8 = vmul.f32 0.03125, %v125_v7  ;;  %v131_v9 = vmul.f32 %v129_v6, %v129_v6 }
 0x117   :  { %v130_v10 = vsub.f32 %v858_v1, %v128_v8  ;;  %v133_v11 = vsel %vm119_vm0, %v131_v9, 0.0 }
 0x118   :  { %134 = vadd.xlane.f32.xlu1 %v133_v11 }
 0x119   :  { %v132_v12 = vmul.f32 %v130_v10, %v130_v10 }
 0x11b   :  { %v136_v13 = vsel %vm119_vm0, %v132_v12, 0.0 }
 0x11c   :  { %137 = vadd.xlane.f32.xlu1 %v136_v13 }
 0x1a5   :  { %v135_v17 = vpop.xlane.xlu1 %134 }
 0x1a6   :  { %v139_v18 = vmul.f32 0.03125, %v135_v17 }
 0x1a8   :  { %v141_v19 = vadd.f32 1e-05, %v139_v18 }
 0x1a9   :  { %v138_v20 = vpop.xlane.xlu1 %137 }
 0x1aa   :  { %502 = vrsqrt.f32 %v141_v19  ;;  %v140_v21 = vmul.f32 0.03125, %v138_v20 }
 0x1ac   :  { %v142_v22 = vadd.f32 1e-05, %v140_v21 }
 0x1ae   :  { %504 = vrsqrt.f32 %v142_v22 }
 0x1b4   :  { %v503_v23 = vpop.eup %502 }
 0x1b5   :  { %v145_v24 = vmul.f32 %v503_v23, %v129_v6 }
 0x1b7   :  { %v153_v28 = vmul.f32 %v422_v25, %v145_v24 }
 0x1b8   :  { %v505_v26 = vpop.eup %504 }
 0x1b9   :  { %v146_v27 = vmul.f32 %v505_v26, %v130_v10  ;;  %v161_v31 = vadd.f32 %v423_v29, %v153_v28 }
 0x1bb   :  { %v154_v30 = vmul.f32 %v422_v25, %v146_v27  ;;  %v713_v25 = vmov -1.0  }
 0x1bd   :  { %v162_v32 = vadd.f32 %v423_v29, %v154_v30 }
 0x1bf   :  { %v163_v33 = vpack.c.bf16 %v162_v32, %v161_v31 }
 0x1c1   :  { %454 = vmatmul.mubr.msk.bf16.vlgmr.msra.gmra.mrb[0].mxu0 %vm119_vm0, %v163_v33 }
 0x294   :  { %v224_v43 = vpop.f32.mrb[0].mxu0 }
 0x295   :  { %v225_v44 = vadd.f32 %v424_v42, %v224_v43  ;;  %v455_v45 = vpop.f32.mrb[1].mxu0 }
 0x296   :  { %v227_v46 = vpop.f32.mrb[2].mxu0 }
 0x297   :  { %v233_v47 = vmul.f32 0.70710677, %v225_v44  ;;  %v228_v48 = vadd.f32 %v424_v42, %v227_v46  ;;  %v456_v49 = vpop.f32.mrb[3].mxu0  ;;  %v231_v33 = vmul.f32 0.5, %v225_v44 }
 0x299   :  { %v239_v50 = vand.u32 2147483647, %v233_v47  ;;  %v234_v51 = vmul.f32 0.70710677, %v228_v48  ;;  %vm235_vm2 = vcmp.ge.f32.partialorder %v233_v47, 0.0  ;;  %v232_v34 = vmul.f32 0.5, %v228_v48 }
 0x29a   :  { %v237_v26 = vsel %vm235_vm2, 1.0, %v713_v25 }
 0x29b   :  { %v241_v52 = vmul.f32 0.3275911, %v239_v50  ;;  %v240_v53 = vand.u32 2147483647, %v234_v51  ;;  %v267_v57 = vsub.f32 0.0, %v239_v50  ;;  %vm236_vm3 = vcmp.ge.f32.partialorder %v234_v51, 0.0 }
 0x29c   :  { %v238_v30 = vsel %vm236_vm3, 1.0, %v713_v25 }
 0x29d   :  { %v243_v54 = vadd.f32 1.0, %v241_v52  ;;  %v242_v55 = vmul.f32 0.3275911, %v240_v53  ;;  %v268_v58 = vsub.f32 0.0, %v240_v53  ;;  %v269_v60 = vmul.f32 %v267_v57, %v239_v50 }
 0x29f   :  { %506 = vrcp.f32 %v243_v54  ;;  %v244_v56 = vadd.f32 1.0, %v242_v55  ;;  %v270_v2 = vmul.f32 %v268_v58, %v240_v53  ;;  %v271_v3 = vmul.f32 1.442695, %v269_v60 }
 0x2a1   :  { %508 = vrcp.f32 %v244_v56  ;;  %v273_v8 = vmul.f32 1.442695, %v270_v2 }
 0x2a2   :  { %510 = vpow2.f32 %v271_v3 }
 0x2a3   :  { %512 = vpow2.f32 %v273_v8 }
 0x2a9   :  { %v507_v59 = vpop.eup %506 }
 0x2aa   :  { %v249_v61 = vmul.f32 1.0614054, %v507_v59 }
 0x2ab   :  { %v509_v62 = vpop.eup %508 }
 0x2ac   :  { %v251_v63 = vadd.f32 -1.4531521, %v249_v61  ;;  %v250_v4 = vmul.f32 1.0614054, %v509_v62  ;;  %v511_v19 = vpop.eup %510 }
 0x2ad   :  { %v513_v23 = vpop.eup %512 }
 0x2ae   :  { %v253_v5 = vmul.f32 %v507_v59, %v251_v63  ;;  %v252_v6 = vadd.f32 -1.4531521, %v250_v4 }
 0x2b0   :  { %v255_v7 = vadd.f32 1.4214138, %v253_v5  ;;  %v254_v9 = vmul.f32 %v509_v62, %v252_v6 }
 0x2b2   :  { %v257_v10 = vmul.f32 %v507_v59, %v255_v7  ;;  %v256_v11 = vadd.f32 1.4214138, %v254_v9 }
 0x2b4   :  { %v259_v12 = vadd.f32 -0.28449672, %v257_v10  ;;  %v258_v13 = vmul.f32 %v509_v62, %v256_v11 }
 0x2b6   :  { %v261_v14 = vmul.f32 %v507_v59, %v259_v12  ;;  %v260_v15 = vadd.f32 -0.28449672, %v258_v13 }
 0x2b8   :  { %v263_v16 = vadd.f32 0.2548296, %v261_v14  ;;  %v262_v17 = vmul.f32 %v509_v62, %v260_v15 }
 0x2ba   :  { %v265_v18 = vmul.f32 %v507_v59, %v263_v16  ;;  %v264_v20 = vadd.f32 0.2548296, %v262_v17 }
 0x2bc   :  { %v275_v21 = vmul.f32 %v511_v19, %v265_v18  ;;  %v266_v22 = vmul.f32 %v509_v62, %v264_v20 }
 0x2be   :  { %v277_v24 = vsub.f32 1.0, %v275_v21  ;;  %v276_v27 = vmul.f32 %v513_v23, %v266_v22 }
 0x2c0   :  { %v279_v28 = vmul.f32 %v277_v24, %v237_v26  ;;  %v278_v29 = vsub.f32 1.0, %v276_v27 }
 0x2c2   :  { %v281_v31 = vadd.f32 1.0, %v279_v28  ;;  %v280_v32 = vmul.f32 %v278_v29, %v238_v30 }
 0x2c4   :  { %v282_v35 = vadd.f32 1.0, %v280_v32  ;;  %v283_v36 = vmul.f32 %v281_v31, %v231_v33 }
 0x2c6   :  { %v284_v37 = vmul.f32 %v282_v35, %v232_v34 }
 0x2c8   :  { %v285_v38 = vpack.c.bf16 %v284_v37, %v283_v36 }
 0x2ca   :  { %474 = vmatmul.mubr.bf16.vlgmr.msra.gmra.mrb[0].mxu1 %v285_v38 }
 0x39d   :  { %v391_v40 = vpop.f32.mrb[0].mxu1 }
 0x39e   :  { %v392_v41 = vadd.f32 %v428_v39, %v391_v40  ;;  %v475_v42 = vpop.f32.mrb[1].mxu1 }
 0x39f   :  { %v394_v43 = vpop.f32.mrb[2].mxu1 }
 0x3a0   :  { %v398_v45 = vadd.f32 %v392_v41, %v856_v0  ;;  %v395_v46 = vadd.f32 %v428_v39, %v394_v43  ;;  %v476_v47 = vpop.f32.mrb[3].mxu1 }
 0x3a2   :  { %400 = vst.msk [vmem:[#allocation14] sm:$0xff] %vm119_vm0, %v398_v45  ;;  %v399_v44 = vadd.f32 %v395_v46, %v858_v1 }
 0x3a4   :  { %401 = vst.msk [vmem:[#allocation14 + $0x8] sm:$0xff] %vm119_vm0, %v399_v44 }
 0x3a5   :  { %679 = shalt.err (!%p676_p4)
}
 0x3a6   :  { %s680_s18 = scalar_lea.hbm %s895_s7, 256 }
 0x3a7   :  { %p681_p5 = scmp.ne.s32.totalorder %s895_s7, %s680_s18  ;;  %p684_p6 = scmp.lt.u32.totalorder %s680_s18, %s895_s7 }
 0x3a9   :  { %p686_p7 = pnand %p684_p6, %p681_p5 }
 0x3ab   :  { %689 = shalt.err (!%p686_p7)
}
 0x3ac   :  { %413 = dma.vmem_to_hbm [thread:$0]  %s408_s8, 256, %s895_s7, [#allocation4], %s706_s5, %s706_s5, %s707_s1  }
 0x3ad   :  { %698 = dma.done.wait [#allocation4], 256  }
 0x3ae   :  { %699 = vsyncadd [#allocation4], 4294967040 }
 0x3af   :  { %417 = vsyncpa [#allocation3], 1 }
 0x3b0   :  { %418 = vsyncpa [#allocation6], 1 }
 0x3b1   :  { %419 = vsyncpa [#allocation9], 1 }
 0x3b2   :  { %420 = vsyncpa [#allocation12], 1 }
 0x3b3   :  { %421 = vsyncpa [#allocation4], 1 }

// kernel: _lambda_.5
= control target key start
LH: loop header
LB: loop body
LE: loop exit
PB: predicated region body
PF: predicated region fallthrough
CT: control target
= control target key end

     0   :  { %s3767_s0 = inlined_call_operand.hbm [shape: f32[16,32], index: 0, kind: input, shape index: {}]   ;;  %s3768_s1 = inlined_call_operand.hbm [shape: f32[1,32], index: 1, kind: input, shape index: {}]   ;;  %s3769_s2 = inlined_call_operand.hbm [shape: f32[1,32], index: 2, kind: input, shape index: {}]   ;;  %s3770_s3 = inlined_call_operand.hbm [shape: bf16[32,96], index: 3, kind: input, shape index: {}]   ;;  %s3771_s4 = inlined_call_operand.hbm [shape: f32[1,96], index: 4, kind: input, shape index: {}]   ;;  %s3772_s5 = inlined_call_operand.hbm [shape: f32[1,32], index: 5, kind: input, shape index: {}]   ;;  %s3773_s6 = inlined_call_operand.hbm [shape: f32[1,32], index: 6, kind: input, shape index: {}]   ;;  %s3774_s7 = inlined_call_operand.hbm [shape: f32[32,4], index: 7, kind: input, shape index: {}]   ;;  %s3775_s8 = inlined_call_operand.hbm [shape: f32[32,64], index: 8, kind: input, shape index: {}]   ;;  %s3776_s9 = inlined_call_operand.hbm [shape: f32[32,64], index: 9, kind: input, shape index: {}]   ;;  %s3777_s10 = inlined_call_operand.hbm [shape: f32[6,64], index: 10, kind: input, shape index: {}]   ;;  %s3778_s11 = inlined_call_operand.hbm [shape: bf16[32,32], index: 11, kind: input, shape index: {}]   ;;  %s3779_s12 = inlined_call_operand.hbm [shape: f32[1,32], index: 12, kind: input, shape index: {}]   ;;  %s3780_s13 = inlined_call_operand.hbm [shape: f32[16,32], index: 13, kind: output, shape index: {}]  }
   0x1   :  { %3791 = sst [smem:[#allocation33_spill]] %s3767_s0 }
   0x2   :  { %3792 = sst [smem:[#allocation34_spill]] %s3768_s1 }
   0x3   :  { %3793 = sst [smem:[#allocation35_spill]] %s3769_s2 }
   0x4   :  { %3794 = sst [smem:[#allocation36_spill]] %s3770_s3 }
   0x5   :  { %3795 = sst [smem:[#allocation37_spill]] %s3771_s4 }
   0x6   :  { %3796 = sst [smem:[#allocation38_spill]] %s3780_s13 }
   0x7   :  { %18 = vsyncpa [#allocation3], 0 }
   0x8   :  { %20 = vsyncpa [#allocation3 + $0x1], 0 }
   0x9   :  { %21 = vsyncpa [#allocation6], 0 }
   0xa   :  { %22 = vsyncpa [#allocation9], 0 }
   0xb   :  { %23 = vsyncpa [#allocation12], 0 }
   0xc   :  { %24 = vsyncpa [#allocation15], 0 }
   0xd   :  { %25 = vsyncpa [#allocation18], 0 }
   0xe   :  { %26 = vsyncpa [#allocation21], 0 }
   0xf   :  { %27 = vsyncpa [#allocation4], 0 }
  0x10   :  { %29 = vsyncpa [#allocation4 + $0x1], 0  ;;  %s3150_s25 = smov 0   ;;  %s3152_s26 = smov 0  }
  0x11   :  { %s3154_s27 = smov 0   ;;  %s3156_s28 = smov 0  }
  0x12 LB: > { %s3050_s29 = smov [#allocation5]   ;;  %s3171_s14 = sadd.s32 4294967295, %s3048_s28   ;;  %s3048_s28 = sphi %s3156_s28, %s3837_s28   ;;  %s3044_s27 = sphi %s3154_s27, %s3836_s27   ;;  %s3040_s26 = sphi %s3152_s26, %s3835_s26   ;;  %s3036_s25 = sphi %s3150_s25, %s3834_s25  }
  0x13   : > { %s357_s30 = sshll.u32 %s3050_s29, 4  ;;  %p2097_p0 = scmp.ge.s32.totalorder %s3048_s28, 1  ;;  %s3176_s30 = int_to_ptr.vmem [resolvable:$true] %s357_s30 }
  0x14   : > { %p3785_p1 = scmp.eq.s32.totalorder %s3171_s14, 0  ;;  %p344_p2 = scmp.lt.s32.totalorder %s3048_s28, 3 }
  0x15   : > { %s3051_s16 = smov [#allocation8]   ;;  %s3052_s19 = smov [#allocation11]  }
  0x16   : > { %p3178_p3 = pnand %p2097_p0, %p344_p2  ;;  %s378_s17 = sshll.u32 %s3051_s16, 4  ;;  %s3185_s17 = int_to_ptr.vmem [resolvable:$true] %s378_s17 }
  0x17   : > { %s403_s20 = sshll.u32 %s3052_s19, 4  ;;  %s3800_s1 = sld [smem:[#allocation34_spill]]  ;;  %s3193_s20 = int_to_ptr.vmem [resolvable:$true] %s403_s20 }
  0x18   : > { %s3797_s15 = scalar_select %p3178_p3, 1, 0 }
  0x19   : > { %p2423_p5 = pneg %p3178_p3 }
  0x1a   : > { %3798 = sst [smem:[#allocation32_spill]] %s3797_s15 }
  0x1b   : > { %p3189_p6 = pnand %p2423_p5, %p3785_p1 }
  0x1d   : > { %s2592_s23 = scalar_lea.hbm %s3800_s1, 16  ;;  %p3203_p8 = pneg %p3189_p6 }
  0x1e   : > { %p2593_p7 = scmp.ne.s32.totalorder %s3800_s1, %s2592_s23  ;;  %p2599_p11 = scmp.lt.u32.totalorder %s2592_s23, %s3800_s1 }
  0x20   : > { %p2595_p9 = pnand %p3203_p8, %p2593_p7 }
  0x22   : > { %p2596_p10 = pneg %p2595_p9 }
  0x24   : > { %p2601_p12 = pnand %p2599_p11, %p2596_p10 }
  0x26   : > { %2604 = shalt.err (!%p2601_p12)
}
  0x27   : > { %s2605_s21 = scalar_lea.vmem %s3176_s30, 16  ;;  %s2612_s22 = scalar_lea.vmem %s3176_s30, 32 }
  0x28   : > { %p2606_p13 = scmp.ne.s32.totalorder %s3176_s30, %s2605_s21  ;;  %p2613_p5 = scmp.lt.s32.totalorder %s3176_s30, %s3176_s30 }
  0x29   : > { %p2614_p7 = scmp.lt.s32.totalorder %s2612_s22, %s2605_s21 }
  0x2a   : > { %p2608_p0 = pnand %p2606_p13, %p3203_p8 }
  0x2b   : > { %p2615_p9 = por %p2614_p7, %p2613_p5 }
  0x2c   : > { %p2609_p2 = pneg %p2608_p0 }
  0x2e   : > { %p2616_p4 = pnand %p2615_p9, %p2609_p2 }
  0x30   : > { %2619 = shalt.err (!%p2616_p4)
}
  0x31   : > { %2426 = dma.hbm_to_vmem [thread:$0]  (!%p3189_p6), %s3800_s1, 16, %s3176_s30, [#allocation6]  }
  0x32   : > { %s3802_s3 = sld [smem:[#allocation36_spill]] }
  0x38   : > { %s2620_s19 = scalar_lea.hbm %s3802_s3, 256 }
  0x39   : > { %p2621_p10 = scmp.ne.s32.totalorder %s3802_s3, %s2620_s19  ;;  %p2627_p4 = scmp.lt.u32.totalorder %s2620_s19, %s3802_s3 }
  0x3b   : > { %p2623_p11 = pnand %p2621_p10, %p3203_p8 }
  0x3d   : > { %p2624_p12 = pneg %p2623_p11 }
  0x3f   : > { %p2629_p13 = pnand %p2627_p4, %p2624_p12 }
  0x41   : > { %2632 = shalt.err (!%p2629_p13)
}
  0x42   : > { %s2633_s30 = scalar_lea.vmem %s3185_s17, 256  ;;  %p2641_p7 = scmp.lt.s32.totalorder %s3185_s17, %s3185_s17 }
  0x43   : > { %p2634_p0 = scmp.ne.s32.totalorder %s3185_s17, %s2633_s30  ;;  %p2642_p9 = scmp.lt.s32.totalorder %s2633_s30, %s2633_s30 }
  0x45   : > { %p2636_p2 = pnand %p2634_p0, %p3203_p8  ;;  %p2643_p10 = por %p2642_p9, %p2641_p7 }
  0x47   : > { %p2637_p5 = pneg %p2636_p2 }
  0x49   : > { %p2644_p11 = pnand %p2643_p10, %p2637_p5 }
  0x4b   : > { %2647 = shalt.err (!%p2644_p11)
}
  0x4c   : > { %s3784_s0 = smov 64   ;;  %s3787_s15 = smov 4  }
  0x4d   : > { %2432 = dma.hbm_to_vmem [thread:$0]  (!%p3189_p6), %s3802_s3, 256, %s3185_s17, [#allocation9], %s3784_s0, %s3784_s0, %s3787_s15  }
  0x4e   : > { %s2648_s19 = scalar_lea.hbm %s3772_s5, 16 }
  0x4f   : > { %p2649_p12 = scmp.ne.s32.totalorder %s3772_s5, %s2648_s19  ;;  %p2655_p0 = scmp.lt.u32.totalorder %s2648_s19, %s3772_s5 }
  0x51   : > { %p2651_p4 = pnand %p2649_p12, %p3203_p8 }
  0x53   : > { %p2652_p13 = pneg %p2651_p4 }
  0x55   : > { %p2657_p2 = pnand %p2655_p0, %p2652_p13 }
  0x57   : > { %2660 = shalt.err (!%p2657_p2)
}
  0x58   : > { %s2661_s17 = scalar_lea.vmem %s3193_s20, 16  ;;  %s2668_s13 = scalar_lea.vmem %s3193_s20, 32 }
  0x59   : > { %p2662_p5 = scmp.ne.s32.totalorder %s3193_s20, %s2661_s17  ;;  %p2669_p10 = scmp.lt.s32.totalorder %s3193_s20, %s3193_s20 }
  0x5a   : > { %p2670_p11 = scmp.lt.s32.totalorder %s2668_s13, %s2661_s17 }
  0x5b   : > { %p2664_p7 = pnand %p2662_p5, %p3203_p8 }
  0x5c   : > { %p2671_p12 = por %p2670_p11, %p2669_p10 }
  0x5d   : > { %p2665_p9 = pneg %p2664_p7 }
  0x5f   : > { %p2672_p4 = pnand %p2671_p12, %p2665_p9 }
  0x61   : > { %2675 = shalt.err (!%p2672_p4)
}
  0x62   : > { %2438 = dma.hbm_to_vmem [thread:$0]  (!%p3189_p6), %s3772_s5, 16, %s3193_s20, [#allocation12]  }
  0x63   : > { %s3055_s24 = smov [#allocation14]   ;;  %s2676_s22 = scalar_lea.hbm %s3774_s7, 512 }
  0x64   : > { %s424_s29 = sshll.u32 %s3055_s24, 4  ;;  %p2677_p13 = scmp.ne.s32.totalorder %s3774_s7, %s2676_s22  ;;  %s425_s29 = int_to_ptr.vmem [resolvable:$true] %s424_s29 }
  0x65   : > { %p2683_p5 = scmp.lt.u32.totalorder %s2676_s22, %s3774_s7 }
  0x66   : > { %p2679_p0 = pnand %p2677_p13, %p3203_p8 }
  0x68   : > { %p2680_p2 = pneg %p2679_p0 }
  0x6a   : > { %p2685_p7 = pnand %p2683_p5, %p2680_p2 }
  0x6c   : > { %2688 = shalt.err (!%p2685_p7)
}
  0x6d   : > { %s2689_s20 = scalar_lea.vmem %s425_s29, 512  ;;  %p2697_p12 = scmp.lt.s32.totalorder %s425_s29, %s425_s29 }
  0x6e   : > { %p2690_p9 = scmp.ne.s32.totalorder %s425_s29, %s2689_s20  ;;  %p2698_p4 = scmp.lt.s32.totalorder %s2689_s20, %s2689_s20 }
  0x70   : > { %p2692_p10 = pnand %p2690_p9, %p3203_p8  ;;  %p2699_p1 = por %p2698_p4, %p2697_p12 }
  0x72   : > { %p2693_p11 = pneg %p2692_p10 }
  0x74   : > { %p2700_p3 = pnand %p2699_p1, %p2693_p11 }
  0x76   : > { %2703 = shalt.err (!%p2700_p3)
}
  0x77   : > { %s3788_s1 = smov 128   ;;  %s3789_s23 = smov 8  }
  0x78   : > { %2444 = dma.hbm_to_vmem [thread:$0]  (!%p3189_p6), %s3774_s7, 512, %s425_s29, [#allocation15], %s3788_s1, %s3788_s1, %s3789_s23  }
  0x79   : > { %s3058_s19 = smov [#allocation17]   ;;  %s3059_s22 = smov [#allocation20]  }
  0x7a   : > { %s450_s21 = sshll.u32 %s3058_s19, 4  ;;  %s474_s30 = sshll.u32 %s3059_s22, 4  ;;  %s451_s21 = int_to_ptr.vmem [resolvable:$true] %s450_s21  ;;  %s3296_s30 = int_to_ptr.vmem [resolvable:$true] %s474_s30 }
  0x7b   : > { %s2704_s20 = scalar_lea.hbm %s3776_s9, 512 }
  0x7c   : > { %p2705_p1 = scmp.ne.s32.totalorder %s3776_s9, %s2704_s20  ;;  %p2711_p0 = scmp.lt.u32.totalorder %s2704_s20, %s3776_s9 }
  0x7e   : > { %p2707_p3 = pnand %p2705_p1, %p3203_p8 }
  0x80   : > { %p2708_p13 = pneg %p2707_p3 }
  0x82   : > { %p2713_p2 = pnand %p2711_p0, %p2708_p13 }
  0x84   : > { %2716 = shalt.err (!%p2713_p2)
}
  0x85   : > { %s2717_s24 = scalar_lea.vmem %s451_s21, 512  ;;  %p2725_p10 = scmp.lt.s32.totalorder %s451_s21, %s451_s21 }
  0x86   : > { %p2718_p5 = scmp.ne.s32.totalorder %s451_s21, %s2717_s24  ;;  %p2726_p11 = scmp.lt.s32.totalorder %s2717_s24, %s2717_s24 }
  0x88   : > { %p2720_p7 = pnand %p2718_p5, %p3203_p8  ;;  %p2727_p12 = por %p2726_p11, %p2725_p10 }
  0x8a   : > { %p2721_p9 = pneg %p2720_p7 }
  0x8c   : > { %p2728_p4 = pnand %p2727_p12, %p2721_p9 }
  0x8e   : > { %2731 = shalt.err (!%p2728_p4)
}
  0x8f   : > { %2450 = dma.hbm_to_vmem [thread:$0]  (!%p3189_p6), %s3776_s9, 512, %s451_s21, [#allocation18], %s3788_s1, %s3788_s1, %s3789_s23  }
  0x90   : > { %s2732_s17 = scalar_lea.hbm %s3778_s11, 256 }
  0x91   : > { %p2733_p1 = scmp.ne.s32.totalorder %s3778_s11, %s2732_s17  ;;  %p2739_p0 = scmp.lt.u32.totalorder %s2732_s17, %s3778_s11 }
  0x93   : > { %p2735_p3 = pnand %p2733_p1, %p3203_p8 }
  0x95   : > { %p2736_p13 = pneg %p2735_p3 }
  0x97   : > { %p2741_p2 = pnand %p2739_p0, %p2736_p13 }
  0x99   : > { %2744 = shalt.err (!%p2741_p2)
}
  0x9a   : > { %s2745_s21 = scalar_lea.vmem %s3296_s30, 256  ;;  %p2753_p10 = scmp.lt.s32.totalorder %s3296_s30, %s3296_s30 }
  0x9b   : > { %p2746_p5 = scmp.ne.s32.totalorder %s3296_s30, %s2745_s21  ;;  %p2754_p11 = scmp.lt.s32.totalorder %s2745_s21, %s2745_s21 }
  0x9d   : > { %p2748_p7 = pnand %p2746_p5, %p3203_p8  ;;  %p2755_p12 = por %p2754_p11, %p2753_p10 }
  0x9f   : > { %p2749_p9 = pneg %p2748_p7 }
  0xa1   : > { %p2756_p4 = pnand %p2755_p12, %p2749_p9 }
  0xa3   : > { %2759 = shalt.err (!%p2756_p4)
}
  0xa4   : > { %s3803_s24 = smov 4   ;;  %s3804_s3 = smov 64  }
  0xa5   : > { %2456 = dma.hbm_to_vmem [thread:$0]  (!%p3189_p6), %s3778_s11, 256, %s3296_s30, [#allocation21], %s3804_s3, %s3804_s3, %s3803_s24  }
  0xa6   : > { %s3060_s22 = smov [#allocation7]   ;;  %s3061_s13 = smov [#allocation10]  }
  0xa7   : > { %s368_s17 = sshll.u32 %s3060_s22, 4  ;;  %s392_s20 = sshll.u32 %s3061_s13, 4  ;;  %s369_s17 = int_to_ptr.vmem [resolvable:$true] %s368_s17  ;;  %s3345_s20 = int_to_ptr.vmem [resolvable:$true] %s392_s20 }
  0xa8   : > { %s3805_s2 = sld [smem:[#allocation35_spill]] }
  0xae   : > { %s2760_s21 = scalar_lea.hbm %s3805_s2, 16 }
  0xaf   : > { %p2761_p1 = scmp.ne.s32.totalorder %s3805_s2, %s2760_s21  ;;  %p2767_p0 = scmp.lt.u32.totalorder %s2760_s21, %s3805_s2 }
  0xb1   : > { %p2763_p3 = pnand %p2761_p1, %p3203_p8 }
  0xb3   : > { %p2764_p13 = pneg %p2763_p3 }
  0xb5   : > { %p2769_p2 = pnand %p2767_p0, %p2764_p13 }
  0xb7   : > { %2772 = shalt.err (!%p2769_p2)
}
  0xb8   : > { %s2773_s24 = scalar_lea.vmem %s369_s17, 16  ;;  %s2780_s3 = scalar_lea.vmem %s369_s17, 32 }
  0xb9   : > { %p2774_p5 = scmp.ne.s32.totalorder %s369_s17, %s2773_s24  ;;  %p2781_p10 = scmp.lt.s32.totalorder %s369_s17, %s369_s17 }
  0xba   : > { %p2782_p11 = scmp.lt.s32.totalorder %s2780_s3, %s2773_s24 }
  0xbb   : > { %p2776_p7 = pnand %p2774_p5, %p3203_p8 }
  0xbc   : > { %p2783_p12 = por %p2782_p11, %p2781_p10 }
  0xbd   : > { %p2777_p9 = pneg %p2776_p7 }
  0xbf   : > { %p2784_p4 = pnand %p2783_p12, %p2777_p9 }
  0xc1   : > { %2787 = shalt.err (!%p2784_p4)
}
  0xc2   : > { %2429 = dma.hbm_to_vmem [thread:$0]  (!%p3189_p6), %s3805_s2, 16, %s369_s17, [#allocation6]  }
  0xc3   : > { %s3806_s4 = sld [smem:[#allocation37_spill]] }
  0xc9   : > { %s2788_s13 = scalar_lea.hbm %s3806_s4, 16 }
  0xca   : > { %p2789_p1 = scmp.ne.s32.totalorder %s3806_s4, %s2788_s13  ;;  %p2795_p0 = scmp.lt.u32.totalorder %s2788_s13, %s3806_s4 }
  0xcc   : > { %p2791_p3 = pnand %p2789_p1, %p3203_p8 }
  0xce   : > { %p2792_p13 = pneg %p2791_p3 }
  0xd0   : > { %p2797_p2 = pnand %p2795_p0, %p2792_p13 }
  0xd2   : > { %2800 = shalt.err (!%p2797_p2)
}
  0xd3   : > { %s2801_s17 = scalar_lea.vmem %s3345_s20, 16  ;;  %s2808_s30 = scalar_lea.vmem %s3345_s20, 32 }
  0xd4   : > { %p2802_p5 = scmp.ne.s32.totalorder %s3345_s20, %s2801_s17  ;;  %p2809_p10 = scmp.lt.s32.totalorder %s3345_s20, %s3345_s20 }
  0xd5   : > { %p2810_p11 = scmp.lt.s32.totalorder %s2808_s30, %s2801_s17 }
  0xd6   : > { %p2804_p7 = pnand %p2802_p5, %p3203_p8 }
  0xd7   : > { %p2811_p12 = por %p2810_p11, %p2809_p10 }
  0xd8   : > { %p2805_p9 = pneg %p2804_p7 }
  0xda   : > { %p2812_p4 = pnand %p2811_p12, %p2805_p9 }
  0xdc   : > { %2815 = shalt.err (!%p2812_p4)
}
  0xdd   : > { %2435 = dma.hbm_to_vmem [thread:$0]  (!%p3189_p6), %s3806_s4, 16, %s3345_s20, [#allocation9]  }
  0xde   : > { %s3062_s1 = smov [#allocation13]   ;;  %s3063_s19 = smov [#allocation16]  }
  0xdf   : > { %s414_s23 = sshll.u32 %s3062_s1, 4  ;;  %s437_s22 = sshll.u32 %s3063_s19, 4  ;;  %s415_s23 = int_to_ptr.vmem [resolvable:$true] %s414_s23  ;;  %s3389_s22 = int_to_ptr.vmem [resolvable:$true] %s437_s22 }
  0xe0   : > { %s2816_s29 = scalar_lea.hbm %s3773_s6, 16 }
  0xe1   : > { %p2817_p1 = scmp.ne.s32.totalorder %s3773_s6, %s2816_s29  ;;  %p2823_p0 = scmp.lt.u32.totalorder %s2816_s29, %s3773_s6 }
  0xe3   : > { %p2819_p3 = pnand %p2817_p1, %p3203_p8 }
  0xe5   : > { %p2820_p13 = pneg %p2819_p3 }
  0xe7   : > { %p2825_p2 = pnand %p2823_p0, %p2820_p13 }
  0xe9   : > { %2828 = shalt.err (!%p2825_p2)
}
  0xea   : > { %s2829_s30 = scalar_lea.vmem %s415_s23, 16  ;;  %s2836_s24 = scalar_lea.vmem %s415_s23, 32 }
  0xeb   : > { %p2830_p5 = scmp.ne.s32.totalorder %s415_s23, %s2829_s30  ;;  %p2837_p10 = scmp.lt.s32.totalorder %s415_s23, %s415_s23 }
  0xec   : > { %p2838_p11 = scmp.lt.s32.totalorder %s2836_s24, %s2829_s30 }
  0xed   : > { %p2832_p7 = pnand %p2830_p5, %p3203_p8 }
  0xee   : > { %p2839_p12 = por %p2838_p11, %p2837_p10 }
  0xef   : > { %p2833_p9 = pneg %p2832_p7 }
  0xf1   : > { %p2840_p4 = pnand %p2839_p12, %p2833_p9 }
  0xf3   : > { %2843 = shalt.err (!%p2840_p4)
}
  0xf4   : > { %2441 = dma.hbm_to_vmem [thread:$0]  (!%p3189_p6), %s3773_s6, 16, %s415_s23, [#allocation12]  }
  0xf5   : > { %s2844_s0 = scalar_lea.hbm %s3775_s8, 512 }
  0xf6   : > { %p2845_p1 = scmp.ne.s32.totalorder %s3775_s8, %s2844_s0  ;;  %p2851_p0 = scmp.lt.u32.totalorder %s2844_s0, %s3775_s8 }
  0xf8   : > { %p2847_p3 = pnand %p2845_p1, %p3203_p8 }
  0xfa   : > { %p2848_p13 = pneg %p2847_p3 }
  0xfc   : > { %p2853_p2 = pnand %p2851_p0, %p2848_p13 }
  0xfe   : > { %2856 = shalt.err (!%p2853_p2)
}
  0xff   : > { %s2857_s23 = scalar_lea.vmem %s3389_s22, 512  ;;  %p2865_p10 = scmp.lt.s32.totalorder %s3389_s22, %s3389_s22 }
 0x100   : > { %p2858_p5 = scmp.ne.s32.totalorder %s3389_s22, %s2857_s23  ;;  %p2866_p11 = scmp.lt.s32.totalorder %s2857_s23, %s2857_s23 }
 0x102   : > { %p2860_p7 = pnand %p2858_p5, %p3203_p8  ;;  %p2867_p12 = por %p2866_p11, %p2865_p10 }
 0x104   : > { %p2861_p9 = pneg %p2860_p7 }
 0x106   : > { %p2868_p4 = pnand %p2867_p12, %p2861_p9 }
 0x108   : > { %2871 = shalt.err (!%p2868_p4)
}
 0x109   : > { %s3807_s20 = smov 8   ;;  %s3808_s30 = smov 128  }
 0x10a   : > { %2447 = dma.hbm_to_vmem [thread:$0]  (!%p3189_p6), %s3775_s8, 512, %s3389_s22, [#allocation15], %s3808_s30, %s3808_s30, %s3807_s20  }
 0x10b   : > { %s3064_s1 = smov [#allocation19]   ;;  %s3065_s13 = smov [#allocation22]  }
 0x10c   : > { %s464_s19 = sshll.u32 %s3064_s1, 4  ;;  %s488_s0 = sshll.u32 %s3065_s13, 4  ;;  %s465_s19 = int_to_ptr.vmem [resolvable:$true] %s464_s19  ;;  %s3435_s0 = int_to_ptr.vmem [resolvable:$true] %s488_s0 }
 0x10d   : > { %s2872_s15 = scalar_lea.hbm %s3777_s10, 128 }
 0x10e   : > { %p2873_p1 = scmp.ne.s32.totalorder %s3777_s10, %s2872_s15  ;;  %p2879_p0 = scmp.lt.u32.totalorder %s2872_s15, %s3777_s10 }
 0x110   : > { %p2875_p3 = pnand %p2873_p1, %p3203_p8 }
 0x112   : > { %p2876_p13 = pneg %p2875_p3 }
 0x114   : > { %p2881_p2 = pnand %p2879_p0, %p2876_p13 }
 0x116   : > { %2884 = shalt.err (!%p2881_p2)
}
 0x117   : > { %s2885_s20 = scalar_lea.vmem %s465_s19, 128  ;;  %p2893_p10 = scmp.lt.s32.totalorder %s465_s19, %s465_s19 }
 0x118   : > { %p2886_p5 = scmp.ne.s32.totalorder %s465_s19, %s2885_s20  ;;  %p2894_p11 = scmp.lt.s32.totalorder %s2885_s20, %s2885_s20 }
 0x11a   : > { %p2888_p7 = pnand %p2886_p5, %p3203_p8  ;;  %p2895_p12 = por %p2894_p11, %p2893_p10 }
 0x11c   : > { %p2889_p9 = pneg %p2888_p7 }
 0x11e   : > { %p2896_p4 = pnand %p2895_p12, %p2889_p9 }
 0x120   : > { %2899 = shalt.err (!%p2896_p4)
}
 0x121   : > { %2453 = dma.hbm_to_vmem [thread:$0]  (!%p3189_p6), %s3777_s10, 128, %s465_s19, [#allocation18]  }
 0x122   : > { %s2900_s29 = scalar_lea.hbm %s3779_s12, 16 }
 0x123   : > { %p2901_p1 = scmp.ne.s32.totalorder %s3779_s12, %s2900_s29  ;;  %p2907_p0 = scmp.lt.u32.totalorder %s2900_s29, %s3779_s12 }
 0x125   : > { %p2903_p3 = pnand %p2901_p1, %p3203_p8 }
 0x127   : > { %p2904_p13 = pneg %p2903_p3 }
 0x129   : > { %p2909_p2 = pnand %p2907_p0, %p2904_p13 }
 0x12b   : > { %2912 = shalt.err (!%p2909_p2)
}
 0x12c   : > { %s2913_s19 = scalar_lea.vmem %s3435_s0, 16  ;;  %s2920_s24 = scalar_lea.vmem %s3435_s0, 32 }
 0x12d   : > { %p2914_p5 = scmp.ne.s32.totalorder %s3435_s0, %s2913_s19  ;;  %p2921_p10 = scmp.lt.s32.totalorder %s3435_s0, %s3435_s0 }
 0x12e   : > { %p2922_p11 = scmp.lt.s32.totalorder %s2920_s24, %s2913_s19 }
 0x12f   : > { %p2916_p7 = pnand %p2914_p5, %p3203_p8 }
 0x130   : > { %p2923_p12 = por %p2922_p11, %p2921_p10 }
 0x131   : > { %p2917_p9 = pneg %p2916_p7 }
 0x133   : > { %p2924_p4 = pnand %p2923_p12, %p2917_p9 }
 0x135   : > { %2927 = shalt.err (!%p2924_p4)
}
 0x136   : > { %2459 = dma.hbm_to_vmem [thread:$0]  (!%p3189_p6), %s3779_s12, 16, %s3435_s0, [#allocation21]  }
 0x137   : > { %s2096_s18 = sadd.s32 4294967294, %s3048_s28   ;;  %s3481_s16 = sadd.s32 1, %s3048_s28  }
 0x138   : > { %s39_s30 = ssub.s32 %s3048_s28, %s3481_s16  ;;  %s42_s3 = sadd.s32 1, %s3044_s27 }
 0x139   : > { %p40_p8 = scmp.eq.s32.totalorder %s39_s30, 0  ;;  %p49_p1 = scmp.ne.s32.totalorder %s3044_s27, %s3040_s26 }
 0x13a   : > { %p50_p3 = scmp.eq.s32.totalorder %s3048_s28, 0  ;;  %p55_p13 = scmp.ne.s32.totalorder %s3040_s26, %s3036_s25 }
 0x13b   : > { %s3492_s1 = scalar_select %p40_p8, %s3044_s27, %s42_s3  }
 0x13c   : > { %p3494_p0 = por %p50_p3, %p49_p1  ;;  %p3810_p2 = scmp.eq.s32.totalorder %s3171_s14, 0 }
 0x13d   : > { %p331_p5 = scmp.eq.s32.totalorder %s3171_s14, 1  ;;  %p337_p7 = scmp.eq.s32.totalorder %s2096_s18, 1 }
 0x13e   : > { %p3500_p6 = por %p3810_p2, %p55_p13  ;;  %p2480_p9 = scmp.lt.s32.totalorder %s3048_s28, 2 }
 0x13f   : > { %s499_s29 = sand.u32 1, %s3044_s27   ;;  %p3507_p10 = por %p331_p5, %p49_p1 }
 0x140   : > { %p3511_p11 = por %p337_p7, %p55_p13  ;;  %s2111_s17 = sshll.u32 %s499_s29, 3 }
 0x141   : > { %s3812_s21 = scalar_select %p3507_p10, 1, 0 }
 0x142   : > { %s3813_s15 = scalar_select %p3511_p11, 1, 0 }
 0x143   : > { %s2112_s23 = sshll.u32 %s3048_s28, 7  ;;  %s3814_s22 = sld [smem:[#allocation33_spill]] }
 0x144   : > { %s503_s18 = scalar_lea.vmem [#allocation2], %s2111_s17  ;;  %p3525_p12 = pnand %p2480_p9, %p3494_p0 }
 0x145   : > { %s510_s30 = sshll.u32 %s503_s18, 4  ;;  %s500_s2 = scalar_lea.sflag [#allocation3], %s499_s29  ;;  %s3521_s30 = int_to_ptr.vmem [resolvable:$true] %s510_s30 }
 0x146   : > { %p2930_p8 = pneg %p3525_p12 }
 0x149   : > { %s3519_s20 = scalar_lea.hbm %s3814_s22, %s2112_s23  ;;  %s2933_s19 = scalar_lea.hbm %s3814_s22, 256 }
 0x14a   : > { %s2928_s4 = scalar_lea.hbm %s3519_s20, 128  ;;  %p2934_p13 = scmp.lt.u32.totalorder %s3519_s20, %s3814_s22 }
 0x14b   : > { %p2929_p4 = scmp.ne.s32.totalorder %s3519_s20, %s2928_s4  ;;  %p2935_p0 = scmp.lt.u32.totalorder %s2933_s19, %s2928_s4 }
 0x14c   : > { %p2937_p5 = scmp.lt.u32.totalorder %s2928_s4, %s3519_s20 }
 0x14d   : > { %p2931_p1 = pnand %p2930_p8, %p2929_p4  ;;  %p2936_p2 = por %p2935_p0, %p2934_p13 }
 0x14f   : > { %p2932_p3 = pneg %p2931_p1  ;;  %p2938_p7 = por %p2937_p5, %p2936_p2 }
 0x151   : > { %p2939_p9 = pnand %p2938_p7, %p2932_p3 }
 0x153   : > { %2942 = shalt.err (!%p2939_p9)
}
 0x154   : > { %s2943_s29 = scalar_lea.vmem %s3521_s30, 128  ;;  %s3066_s18 = smov [#allocation2]  }
 0x155   : > { %p2944_p4 = scmp.ne.s32.totalorder %s3521_s30, %s2943_s29  ;;  %s2948_s17 = sshll.u32 %s3066_s18, 4  ;;  %s2949_s17 = int_to_ptr.vmem [resolvable:$false] %s2948_s17 }
 0x156   : > { %s2950_s23 = scalar_lea.vmem %s2949_s17, 256  ;;  %p2951_p10 = scmp.lt.s32.totalorder %s3521_s30, %s2949_s17 }
 0x157   : > { %p2946_p1 = pnand %p2944_p4, %p2930_p8  ;;  %p2952_p13 = scmp.lt.s32.totalorder %s2950_s23, %s2943_s29 }
 0x159   : > { %p2947_p11 = pneg %p2946_p1  ;;  %p2953_p0 = por %p2952_p13, %p2951_p10 }
 0x15b   : > { %p2954_p2 = pnand %p2953_p0, %p2947_p11 }
 0x15d   : > { %2957 = shalt.err (!%p2954_p2)
}
 0x15e   : > { %2463 = dma.hbm_to_vmem [thread:$0]  (!%p3525_p12), %s3519_s20, 128, %s3521_s30, %s500_s2  }
 0x15f   : > { %s3816_s4 = sld [smem:[#allocation32_spill]] }
 0x165   : > { %p3817_p3 = scmp.ne.s32.totalorder %s3816_s4, 0 }
 0x166   : > { %s3557_s19 = sand.u32 (!%p3817_p3), 1, %s3040_s26  }
 0x167   : > { %519 = sbr.rel (%p3817_p3) target bundleno = 3212 (0xc8c), region = 72  ;;  %s2114_s13 = sshll.u32 (!%p3817_p3), %s3557_s19, 3 }
 0x168   : > { %s522_s24 = scalar_lea.sflag (!%p3817_p3), [#allocation3], %s3557_s19  ;;  %s525_s29 = scalar_lea.vmem (!%p3817_p3), [#allocation2], %s2114_s13 }
 0x16e   : > { %3003 = dma.done.wait (%p3500_p6), %s522_s24, 128  }
 0x16f   : > { %3005 = vsyncadd (%p3500_p6), %s522_s24, 4294967168  ;;  %p3818_p10 = scmp.eq.s32.totalorder %s3171_s14, 0 }
 0x171   : > { %3007 = dma.done.wait (%p3818_p10), [#allocation6], 32   ;;  %p3819_p11 = pmov %p3818_p10 }
 0x172   : > { %p3820_p12 = pmov %p3818_p10 }
 0x173   : > { %3009 = vsyncadd (%p3819_p11), [#allocation6], 4294967264 }
 0x174   : > { %3011 = dma.done.wait (%p3820_p12), [#allocation9], 272   ;;  %p3821_p8 = pmov %p3818_p10 }
 0x176   : > { %3013 = vsyncadd (%p3821_p8), [#allocation9], 4294967024  ;;  %p3822_p5 = pmov %p3821_p8 }
 0x178   : > { %3015 = dma.done.wait (%p3822_p5), [#allocation12], 32   ;;  %p3823_p7 = pmov %p3822_p5 }
 0x179   : > { %p3824_p6 = pmov %p3822_p5 }
 0x17a   : > { %3017 = vsyncadd (%p3823_p7), [#allocation12], 4294967264 }
 0x17b   : > { %3019 = dma.done.wait (%p3824_p6), [#allocation15], 1024   ;;  %p3825_p9 = pmov %p3822_p5 }
 0x17c   : > { %p3826_p4 = pmov %p3822_p5 }
 0x17d   : > { %3021 = vsyncadd (%p3825_p9), [#allocation15], 4294966272 }
 0x17e   : > { %3023 = dma.done.wait (%p3826_p4), [#allocation18], 640   ;;  %p3827_p1 = pmov %p3826_p4 }
 0x180   : > { %3025 = vsyncadd (%p3827_p1), [#allocation18], 4294966656  ;;  %p3828_p13 = pmov %p3827_p1 }
 0x181   : > { %p3829_p0 = pmov %p3827_p1 }
 0x182   : > { %3027 = dma.done.wait (%p3828_p13), [#allocation21], 272  }
 0x183   : > { %3029 = vsyncadd (%p3829_p0), [#allocation21], 4294967024  ;;  %vm620_vm0 = vcmask 261120   ;;  %v3591_v0 = vld [vmem:[%s525_s29] sm:$0xff]  ;;  %v2554_v7 = vld [vmem:[#allocation8] sm:$0xff]   ;;  %v3067_v8 = vmov 0.0  }
 0x184   : > { %v621_v1 = vsel %vm620_vm0, %v3591_v0, 0.0  ;;  %2225 = vmatprep.subr.bf16.mxu0 %v3067_v8  ;;  %vm3068_vm1 = vmmov 0   ;;  %v2555_v9 = vld [vmem:[#allocation8 + $0x8] sm:$0xff]   ;;  %v2128_v14 = vld [vmem:[#allocation5] ss:$0 sm:$0xff]  ;;  %v718_v21 = vld [vmem:[#allocation14 + $0x8] sm:$0xff] }
 0x185   : > { %622 = vadd.xlane.f32.xlu0 %v621_v1  ;;  %2229 = vmatprep.mubr.msk.bf16.mxu0 %vm3068_vm1, %v3067_v8  ;;  %v2129_v16 = vld [vmem:[#allocation7] ss:$0 sm:$0xff]  ;;  %v717_v20 = vld [vmem:[#allocation14] sm:$0xff]  ;;  %v719_v22 = vld [vmem:[#allocation14 + $0x10] sm:$0xff]  ;;  %vm826_vm2 = vcmask 31744   ;;  %s3069_s2 = smov 96  }
 0x186   : > { %2226 = vmatpush3.bf16.msra.mxu0 %v2554_v7  ;;  %v2335_v23 = vpack.c.bf16 %v718_v21, %v717_v20  ;;  %v720_v24 = vld [vmem:[#allocation14 + $0x18] sm:$0xff]  ;;  %vm2344_vm3 = vmpackc.low %vm826_vm2, %vm826_vm2  ;;  %v968_v43 = vld [vmem:[#allocation17] sm:$0xff]  ;;  %vm1254_vm12 = vcmask 130048   ;;  %s3070_s0 = smov 112   ;;  %s3071_s20 = smov 64   ;;  %vm1348_vm13 = vcmask 1043456  }
 0x187   : > { %2227 = vmatprep.subr.bf16.mxu0 %v3067_v8  ;;  %v2339_v25 = vpack.c.bf16 %v720_v24, %v719_v22  ;;  %v2130_v26 = vld [vmem:[#allocation10] ss:$0 sm:$0xff]  ;;  %v969_v44 = vld [vmem:[#allocation17 + $0x8] sm:$0xff]  ;;  %v970_v46 = vld [vmem:[#allocation17 + $0x10] sm:$0xff]  ;;  %vm1331_vm14 = vcmask 64512   ;;  %s3072_s30 = smov 80  }
 0x188   : > { %2336 = vmatprep.subr.bf16.mxu1 %v2335_v23  ;;  %v2355_v45 = vpack.c.bf16 %v969_v44, %v968_v43  ;;  %v971_v47 = vld [vmem:[#allocation17 + $0x18] sm:$0xff]  ;;  %v972_v49 = vld [vmem:[#allocation16] sm:$0xff]  ;;  %v973_v50 = vld [vmem:[#allocation16 + $0x8] sm:$0xff]  ;;  %s3073_s3 = smov 56   ;;  %s3074_s18 = smov 48   ;;  %vm1826_vm15 = vcmask 195584  }
 0x189   : > { %2338 = vmatpush3.bf16.msra.mxu1 %v2335_v23  ;;  %v2359_v48 = vpack.c.bf16 %v971_v47, %v970_v46  ;;  %v2363_v51 = vpack.c.bf16 %v973_v50, %v972_v49  ;;  %s3075_s17 = smov 40   ;;  %s3076_s23 = smov 8  }
 0x18a   : > { %2228 = vmatpush3.bf16.msra.mxu0 %v2555_v9  ;;  %2340 = vmatprep.subr.bf16.mxu1 %v2339_v25  ;;  %s3077_s4 = smov 16   ;;  %s3078_s24 = smov 24  }
 0x18b   : > { %2345 = vmatprep.subr.msk.bf16.mxu0 %vm2344_vm3, %v2335_v23  ;;  %s2172_s29 = sshll.u32 %s3171_s14, 7  ;;  %s1899_s14 = scalar_lea.sflag [#allocation4], %s3557_s19 }
 0x18c   : > { %p3831_p3 = scmp.ne.s32.totalorder %s3812_s21, 0 }
 0x18d   : > { %2342 = vmatpush3.bf16.msra.mxu1 %v2339_v25 }
 0x18e   : > { %2356 = vmatprep.subr.bf16.mxu1 %v2355_v45 }
 0x212   : > { %v623_v2 = vpop.xlane.xlu0 %622 }
 0x213   : > { %v625_v3 = vmul.f32 0.03125, %v623_v2 }
 0x215   : > { %v626_v4 = vsub.f32 %v3591_v0, %v625_v3 }
 0x217   : > { %v627_v5 = vmul.f32 %v626_v4, %v626_v4 }
 0x219   : > { %v628_v6 = vsel %vm620_vm0, %v627_v5, 0.0 }
 0x21a   : > { %629 = vadd.xlane.f32.xlu0 %v628_v6 }
 0x2a7   : > { %v630_v10 = vpop.xlane.xlu0 %629 }
 0x2a8   : > { %v631_v11 = vmul.f32 0.03125, %v630_v10  ;;  %v2147_v10 = vld [vmem:[#allocation13] ss:$0 sm:$0xff] }
 0x2aa   : > { %v632_v12 = vadd.f32 1e-05, %v631_v11 }
 0x2ac   : > { %2558 = vrsqrt.f32 %v632_v12  ;;  %v974_v12 = vld [vmem:[#allocation16 + $0x10] sm:$0xff] }
 0x2b6   : > { %v2559_v13 = vpop.eup %2558 }
 0x2b7   : > { %v634_v15 = vmul.f32 %v2559_v13, %v626_v4  ;;  %v2146_v4 = vld [vmem:[#allocation11] ss:$0 sm:$0xff] }
 0x2b8   : > { %v975_v13 = vld [vmem:[#allocation16 + $0x18] sm:$0xff] }
 0x2b9   : > { %v641_v17 = vmul.f32 %v2128_v14, %v634_v15 }
 0x2bb   : > { %v648_v18 = vadd.f32 %v2129_v16, %v641_v17  ;;  %v2367_v16 = vpack.c.bf16 %v975_v13, %v974_v12 }
 0x2bd   : > { %v649_v19 = vpack.c.bf16 %v648_v18, %v648_v18 }
 0x2bf   : > { %2230 = vmatmul.mubr.msk.bf16.vlgmr.msra.gmra.mrb[0].mxu0 %vm620_vm0, %v649_v19 }
 0x2c0   : > { %2348 = vmatpush3.bf16.xpose.msk.msra.mxu0 %vm2344_vm3, %v2335_v23  ;;  %v2152_v23 = vld [vmem:[#allocation19] ss:$0 sm:$0xff] }
 0x2c1   : > { %2351 = vmatprep.subr.msk.bf16.mxu0 %vm2344_vm3, %v2339_v25 }
 0x2c8   : > { %2354 = vmatpush3.bf16.xpose.msk.msra.mxu0 %vm2344_vm3, %v2339_v25 }
 0x2c9   : > { %2288 = vmatprep.subr.bf16.mxu0 %v3067_v8 }
 0x392   : > { %v710_v27 = vpop.f32.mrb[0].mxu0 }
 0x393   : > { %v3604_v28 = vadd.f32 %v2130_v26, %v710_v27  ;;  %v2231_v29 = vpop.f32.mrb[1].mxu0 }
 0x394   : > { %v713_v30 = vpop.f32.mrb[2].mxu0 }
 0x395   : > { %722 = vrot.lane.b32.xlu1 %v3604_v28, %s3069_s2  ;;  %v2232_v31 = vpop.f32.mrb[3].mxu0  ;;  %2241 = vmatprep.mubr.msk.f32.mxu1 %vm620_vm0, %v3604_v28  ;;  %v725_v33 = vmul.f32 %v3604_v28, %v3604_v28 }
 0x407   : > { %v723_v32 = vpop.permute.xlu1 %722 }
 0x408   : > { %2242 = vmatmul.mubr.msk.f32.vlgmr.msra.gmra.mrb[0].mxu1 %vm620_vm0, %v723_v32  ;;  %v726_v34 = vmul.f32 %v723_v32, %v723_v32 }
 0x409   : > { %2244 = vmatprep.mubr.msk.f32.mxu1 %vm620_vm0, %v725_v33  ;;  %2358 = vmatpush3.bf16.msra.mxu1 %v2355_v45  ;;  %v1183_v33 = vlaneseq }
 0x40a   : > { %2360 = vmatprep.subr.bf16.mxu1 %v2359_v48 }
 0x40c   : > { %2245 = vmatmul.mubr.msk.f32.gmra.mrb[2].mxu1 %vm620_vm0, %v726_v34  ;;  %v978_v34 = vld [vmem:[#allocation19 + $0x2] sm:$0x1] }
 0x40d   : > { %2362 = vmatpush3.bf16.msra.mxu1 %v2359_v48 }
 0x40e   : > { %2364 = vmatprep.subr.bf16.mxu1 %v2363_v51 }
 0x4db   : > { %v2243_v35 = vpop.f32.mrb[0].mxu1 }
 0x4dc   : > { %v803_v36 = vpop.f32.mrb[1].mxu1  ;;  %v823_v38 = vmul.f32 0.125, %v2243_v35 }
 0x4dd   : > { %v822_v37 = vmul.f32 0.125, %v803_v36 }
 0x4df   : > { %v2246_v39 = vpop.f32.mrb[2].mxu1  ;;  %2255 = vmatprep.mubr.msk.f32.mxu0 %vm826_vm2, %v822_v37 }
 0x4e0   : > { %v813_v40 = vpop.f32.mrb[3].mxu1  ;;  %2256 = vmatmul.mubr.msk.f32.vlgmr.msra.gmra.mrb[4].mxu0 %vm826_vm2, %v823_v38  ;;  %v825_v42 = vmul.f32 0.125, %v2246_v39  ;;  %v1184_v38 = vshrl.u32 %v1183_v33, 7  ;;  %v2153_v39 = vld [vmem:[#allocation19 + $0x1] ss:$0 sm:$0xff] }
 0x4e1   : > { %v824_v41 = vmul.f32 0.125, %v813_v40 }
 0x4e2   : > { %v1185_v48 = vsub.s32 0, %v1184_v38 }
 0x4e3   : > { %2258 = vmatprep.mubr.msk.f32.mxu0 %vm826_vm2, %v824_v41  ;;  %v1182_v41 = vmul.f32 %v978_v34, %v978_v34 }
 0x4e4   : > { %2259 = vmatmul.mubr.msk.f32.gmra.mrb[6].mxu0 %vm826_vm2, %v825_v42 }
 0x4e5   : > { %2290 = vmatprep.mubr.msk.bf16.mxu0 %vm3068_vm1, %v3067_v8 }
 0x5b3   : > { %v2257_v52 = vpop.f32.mrb[4].mxu0 }
 0x5b4   : > { %v917_v53 = vpop.f32.mrb[5].mxu0  ;;  %v937_v54 = vmul.f32 %v2257_v52, %v2257_v52  ;;  %v943_v1 = vsub.f32 %v723_v32, %v2257_v52  ;;  %v1186_v52 = vrot.slane %v1182_v41, %v1185_v48 }
 0x5b5   : > { %v936_v55 = vmul.f32 %v917_v53, %v917_v53  ;;  %v942_v3 = vsub.f32 %v3604_v28, %v917_v53 }
 0x5b7   : > { %v2260_v56 = vpop.f32.mrb[6].mxu0 }
 0x5b8   : > { %v939_v57 = vsub.f32 %v2260_v56, %v937_v54  ;;  %v927_v58 = vpop.f32.mrb[7].mxu0 }
 0x5b9   : > { %v938_v59 = vsub.f32 %v927_v58, %v936_v55 }
 0x5ba   : > { %v941_v60 = vmax.f32 %v939_v57, 0.0 }
 0x5bb   : > { %v940_v61 = vmax.f32 %v938_v59, 0.0  ;;  %v979_v59 = vld [vmem:[#allocation19 + $0x3] sm:$0x1] }
 0x5bc   : > { %v945_v62 = vadd.f32 1e-05, %v941_v60 }
 0x5bd   : > { %v944_v63 = vadd.f32 1e-05, %v940_v61 }
 0x5be   : > { %2560 = vrsqrt.f32 %v945_v62  ;;  %v1206_v62 = vrot.slane %v978_v34, %v1185_v48 }
 0x5bf   : > { %2562 = vrsqrt.f32 %v944_v63  ;;  %v1217_v63 = vsub.f32 1.0, %v979_v59 }
 0x5c8   : > { %v2561_v2 = vpop.eup %2560 }
 0x5c9   : > { %v2563_v5 = vpop.eup %2562  ;;  %v949_v6 = vmul.f32 %v2561_v2, %v943_v1 }
 0x5ca   : > { %v948_v7 = vmul.f32 %v2563_v5, %v942_v3  ;;  %v980_v5 = vld [vmem:[#allocation19 + $0x4] sm:$0x1] }
 0x5cb   : > { %v958_v9 = vmul.f32 %v2146_v4, %v949_v6 }
 0x5cc   : > { %v957_v11 = vmul.f32 %v2146_v4, %v948_v7 }
 0x5cd   : > { %v967_v15 = vadd.f32 %v2147_v10, %v958_v9 }
 0x5ce   : > { %v966_v14 = vadd.f32 %v2147_v10, %v957_v11  ;;  %v1214_v10 = vrot.slane %v979_v59, %v1185_v48  ;;  %v1221_v11 = vrot.slane %v1217_v63, %v1185_v48 }
 0x5cf   : > { %v1064_v18 = vmul.f32 %v967_v15, %v967_v15 }
 0x5d0   : > { %2269 = vmatprep.mubr.msk.f32.mxu1 %vm620_vm0, %v966_v14  ;;  %v1063_v17 = vmul.f32 %v966_v14, %v966_v14 }
 0x5d1   : > { %2270 = vmatmul.mubr.msk.f32.vlgmr.msra.gmra.mrb[4].mxu1 %vm620_vm0, %v967_v15  ;;  %v1234_v15 = vsub.f32 1.0, %v980_v5 }
 0x5d2   : > { %2366 = vmatpush3.bf16.msra.mxu1 %v2363_v51  ;;  %2280 = vmatprep.mubr.msk.f32.mxu1 %vm620_vm0, %v1063_v17 }
 0x5d3   : > { %2368 = vmatprep.subr.bf16.mxu1 %v2367_v16 }
 0x5d6   : > { %2370 = vmatpush3.bf16.msra.mxu1 %v2367_v16 }
 0x5d7   : > { %2283 = vmatprep.subr.mxu1 %v3067_v8 }
 0x5d9   : > { %2281 = vmatmul.mubr.msk.f32.vlgmr.msra.gmra.mrb[6].mxu1 %vm620_vm0, %v1064_v18 }
 0x5da   : > { %2285 = vmatprep.mubr.msk.f32.mxu1 %vm3068_vm1, %v3067_v8 }
 0x6a4   : > { %v2271_v19 = vpop.f32.mrb[4].mxu1 }
 0x6a5   : > { %v1054_v20 = vpop.f32.mrb[5].mxu1  ;;  %v1147_v21 = vmul.f32 2.0, %v2271_v19 }
 0x6a6   : > { %v1146_v22 = vmul.f32 2.0, %v1054_v20 }
 0x6ac   : > { %v2282_v24 = vpop.f32.mrb[6].mxu1 }
 0x6ad   : > { %v1149_v25 = vsub.f32 %v2282_v24, %v1147_v21  ;;  %v1137_v26 = vpop.f32.mrb[7].mxu1 }
 0x6ae   : > { %v1148_v27 = vsub.f32 %v1137_v26, %v1146_v22  ;;  %v1231_v22 = vrot.slane %v980_v5, %v1185_v48 }
 0x6af   : > { %v1155_v29 = vadd.f32 %v2152_v23, %v1149_v25 }
 0x6b0   : > { %v1154_v30 = vadd.f32 %v2152_v23, %v1148_v27  ;;  %v1238_v23 = vrot.slane %v1234_v15, %v1185_v48 }
 0x6b1   : > { %v3630_v31 = vmax.f32 %v1155_v29, 0.0 }
 0x6b2   : > { %v3632_v32 = vmax.f32 %v1154_v30, 0.0 }
 0x6b3   : > { %2564 = vrsqrt.f32 %v3630_v31  ;;  %vm1167_vm4 = vcmp.eq.f32.partialorder %v3630_v31, inf  ;;  %v1170_v40 = vand.u32 2147483648, %v3630_v31  ;;  %vm1169_vm5 = vcmp.eq.f32.partialorder %v3630_v31, 0.0 }
 0x6b4   : > { %2566 = vrsqrt.f32 %v3632_v32  ;;  %vm1160_vm6 = vcmp.eq.f32.partialorder %v3632_v32, inf  ;;  %v1163_v44 = vand.u32 2147483648, %v3632_v32  ;;  %vm1162_vm7 = vcmp.eq.f32.partialorder %v3632_v32, 0.0 }
 0x6b5   : > { %v1240_v29 = vmul.f32 %v1238_v23, %v3630_v31  ;;  %v1239_v33 = vmul.f32 %v1238_v23, %v3632_v32 }
 0x6bd   : > { %v2565_v35 = vpop.eup %2564 }
 0x6be   : > { %v2567_v36 = vpop.eup %2566  ;;  %v1166_v37 = vmul.f32 %v2565_v35, %v3630_v31 }
 0x6bf   : > { %v1159_v42 = vmul.f32 %v2567_v36, %v3632_v32 }
 0x6c0   : > { %v1168_v43 = vsel %vm1167_vm4, %v3630_v31, %v1166_v37 }
 0x6c1   : > { %v1171_v45 = vsel %vm1169_vm5, %v1170_v40, %v1168_v43  ;;  %v1161_v46 = vsel %vm1160_vm6, %v3632_v32, %v1159_v42  ;;  %v2154_v40 = vld [vmem:[#allocation19 + $0x5] ss:$0 sm:$0xff]  ;;  %v3652_v32 = vpack.c.bf16 %v3604_v28, %v3604_v28 }
 0x6c2   : > { %v1177_v47 = vsub.f32 %v1171_v45, %v2153_v39  ;;  %v1164_v49 = vsel %vm1162_vm7, %v1163_v44, %v1161_v46 }
 0x6c3   : > { %v1176_v50 = vsub.f32 %v1164_v49, %v2153_v39 }
 0x6c4   : > { %v1179_v51 = vand.u32 2147483647, %v1177_v47 }
 0x6c5   : > { %v1178_v53 = vand.u32 2147483647, %v1176_v50 }
 0x6c6   : > { %v1181_v54 = vmul.f32 %v1179_v51, %v1179_v51  ;;  %v1216_v17 = vmul.f32 %v1214_v10, %v1179_v51 }
 0x6c7   : > { %v1180_v55 = vmul.f32 %v1178_v53, %v1178_v53  ;;  %v1215_v19 = vmul.f32 %v1214_v10, %v1178_v53 }
 0x6c8   : > { %v1188_v56 = vadd.f32 %v1186_v52, %v1181_v54 }
 0x6c9   : > { %v1187_v57 = vadd.f32 %v1186_v52, %v1180_v55 }
 0x6ca   : > { %2568 = vrsqrt.f32 %v1188_v56  ;;  %vm1198_vm8 = vcmp.eq.f32.partialorder %v1188_v56, inf  ;;  %v1201_v1 = vand.u32 2147483648, %v1188_v56  ;;  %vm1200_vm9 = vcmp.eq.f32.partialorder %v1188_v56, 0.0 }
 0x6cb   : > { %2570 = vrsqrt.f32 %v1187_v57  ;;  %vm1191_vm10 = vcmp.eq.f32.partialorder %v1187_v57, inf  ;;  %v1194_v4 = vand.u32 2147483648, %v1187_v57  ;;  %vm1193_vm11 = vcmp.eq.f32.partialorder %v1187_v57, 0.0 }
 0x6d4   : > { %v2569_v58 = vpop.eup %2568 }
 0x6d5   : > { %v2571_v60 = vpop.eup %2570  ;;  %v1197_v61 = vmul.f32 %v2569_v58, %v1188_v56 }
 0x6d6   : > { %v1190_v2 = vmul.f32 %v2571_v60, %v1187_v57 }
 0x6d7   : > { %v1199_v3 = vsel %vm1198_vm8, %v1188_v56, %v1197_v61 }
 0x6d8   : > { %v1202_v6 = vsel %vm1200_vm9, %v1201_v1, %v1199_v3  ;;  %v1192_v7 = vsel %vm1191_vm10, %v1187_v57, %v1190_v2 }
 0x6d9   : > { %v1208_v9 = vsub.f32 %v1202_v6, %v1206_v62  ;;  %v1195_v12 = vsel %vm1193_vm11, %v1194_v4, %v1192_v7 }
 0x6da   : > { %v1207_v13 = vsub.f32 %v1195_v12, %v1206_v62 }
 0x6db   : > { %v1210_v14 = vand.u32 2147483647, %v1208_v9 }
 0x6dc   : > { %v1209_v16 = vand.u32 2147483647, %v1207_v13 }
 0x6dd   : > { %v1223_v18 = vmul.f32 %v1221_v11, %v1210_v14 }
 0x6de   : > { %v1222_v20 = vmul.f32 %v1221_v11, %v1209_v16 }
 0x6df   : > { %v1225_v21 = vadd.f32 %v1223_v18, %v1216_v17 }
 0x6e0   : > { %v1224_v24 = vadd.f32 %v1222_v20, %v1215_v19 }
 0x6e1   : > { %v1227_v25 = vmul.f32 %v1225_v21, %v1225_v21 }
 0x6e2   : > { %v1226_v26 = vmul.f32 %v1224_v24, %v1224_v24 }
 0x6e3   : > { %v1233_v27 = vmul.f32 %v1231_v22, %v1227_v25 }
 0x6e4   : > { %v1232_v30 = vmul.f32 %v1231_v22, %v1226_v26 }
 0x6e5   : > { %v1242_v34 = vadd.f32 %v1240_v29, %v1233_v27 }
 0x6e6   : > { %v1241_v35 = vadd.f32 %v1239_v33, %v1232_v30 }
 0x6e7   : > { %v1244_v36 = vmul.f32 -0.5, %v1242_v34 }
 0x6e8   : > { %v1243_v37 = vmul.f32 -0.5, %v1241_v35 }
 0x6e9   : > { %v1247_v38 = vmul.f32 1.442695, %v1244_v36 }
 0x6ea   : > { %v1245_v39 = vmul.f32 1.442695, %v1243_v37 }
 0x6eb   : > { %2572 = vpow2.f32 %v1247_v38 }
 0x6ec   : > { %2574 = vpow2.f32 %v1245_v39 }
 0x6f5   : > { %v2573_v41 = vpop.eup %2572 }
 0x6f6   : > { %v2575_v42 = vpop.eup %2574  ;;  %1397 = vrot.lane.b32.xlu1 %v2573_v41, %s3070_s0  ;;  %2284 = vmatpush3.xpose.msk.msra.mxu1 %vm1254_vm12, %v2573_v41 }
 0x6f7   : > { %v1253_v31 = vmul.f32 %v2575_v42, %v2154_v40  ;;  %2294 = vmatprep.subr.mxu1 %v3067_v8 }
 0x6f9   : > { %1395 = vrot.lane.b32.xlu0 %v1253_v31, %s3070_s0  ;;  %2286 = vmatmul.mubr.msk.f32.vlgmr.msra.gmra.mrb[8].mxu1 %vm1254_vm12, %v1253_v31 }
 0x6fa   : > { %1343 = vrot.lane.b32.xlu1 %v3652_v32, %s3071_s20  ;;  %2296 = vmatprep.mubr.msk.f32.mxu1 %vm3068_vm1, %v3067_v8 }
 0x768   : > { %v1398_v43 = vpop.permute.xlu1 %1397 }
 0x769   : > { %2295 = vmatpush3.xpose.msk.msra.mxu1 %vm1254_vm12, %v1398_v43  ;;  %v2556_v43 = vld [vmem:[#allocation20] sm:$0xff]  }
 0x76a   : > { %2299 = vmatprep.subr.bf16.mxu1 %v3067_v8 }
 0x76b   : > { %v1396_v44 = vpop.permute.xlu0 %1395 }
 0x76c   : > { %v1344_v45 = vpop.permute.xlu1 %1343  ;;  %2297 = vmatmul.mubr.msk.f32.vlgmr.msra.gmra.mrb[10].mxu1 %vm1254_vm12, %v1396_v44 }
 0x76d   : > { %v1350_v28 = vsel %vm1348_vm13, %v1344_v45, 0  ;;  %2301 = vmatprep.mubr.msk.bf16.mxu1 %vm3068_vm1, %v3067_v8 }
 0x76e   : > { %2289 = vmatpush3.bf16.msra.mxu0 %v1350_v28 }
 0x76f   : > { %2305 = vmatprep.subr.mxu0 %v3067_v8 }
 0x7cc   : > { %v1327_v46 = vpop.f32.mrb[8].mxu1 }
 0x7cd   : > { %v2287_v47 = vpop.f32.mrb[9].mxu1  ;;  %v1332_v48 = vsel %vm1331_vm14, %v1327_v46, -inf }
 0x7ce   : > { %1333 = vmax.xlane.f32.xlu1 %v1332_v48 }
 0x7df   : > { %1536 = vrot.lane.b32.xlu1 %v2573_v41, %s3069_s2 }
 0x7e3   : > { %1675 = vrot.lane.b32.xlu1 %v2573_v41, %s3072_s30 }
 0x7e7   : > { %1534 = vrot.lane.b32.xlu1 %v1253_v31, %s3069_s2  ;;  %s615_s2 = scalar_lea.vmem [#allocation23], %s2114_s13 }
 0x7e8   : > { %s1912_s0 = sshll.u32 %s615_s2, 4  ;;  %s3724_s0 = int_to_ptr.vmem [resolvable:$true] %s1912_s0 }
 0x7e9   : > { %s2958_s13 = scalar_lea.vmem %s3724_s0, 128 }
 0x7ea   : > { %p2959_p2 = scmp.ne.s32.totalorder %s3724_s0, %s2958_s13 }
 0x7eb   : > { %1673 = vrot.lane.b32.xlu1 %v1253_v31, %s3072_s30 }
 0x7ec   : > { %p2960_p10 = pnand %p2959_p2, %p3831_p3 }
 0x7ee   : > { %p2961_p11 = pneg %p2960_p10 }
 0x83f   : > { %v1469_v49 = vpop.f32.mrb[10].mxu1 }
 0x840   : > { %v2298_v50 = vpop.f32.mrb[11].mxu1  ;;  %v1473_v51 = vsel %vm1331_vm14, %v1469_v49, -inf }
 0x841   : > { %1474 = vmax.xlane.f32.xlu0 %v1473_v51  ;;  %v2557_v50 = vld [vmem:[#allocation20 + $0x8] sm:$0xff]  }
 0x857   : > { %1483 = vrot.lane.b32.xlu0 %v3652_v32, %s3073_s3  ;;  %s3830_s3 = sld [smem:[#allocation38_spill]] }
 0x85b   : > { %v1334_v52 = vpop.xlane.xlu1 %1333 }
 0x85c   : > { %v1335_v53 = vsub.f32 %v1327_v46, %v1334_v52 }
 0x85e   : > { %v1336_v54 = vmul.f32 1.442695, %v1335_v53 }
 0x85f   : > { %v1537_v55 = vpop.permute.xlu1 %1536 }
 0x860   : > { %2576 = vpow2.f32 %v1336_v54 }
 0x863   : > { %v1676_v58 = vpop.permute.xlu1 %1675 }
 0x867   : > { %v1535_v59 = vpop.permute.xlu1 %1534 }
 0x86a   : > { %v3670_v56 = vpop.eup %2576 }
 0x86b   : > { %v1341_v57 = vpack.c.bf16 %v3670_v56, %v3670_v56  ;;  %v1674_v4 = vpop.permute.xlu1 %1673  ;;  %v1338_v30 = vsel %vm1331_vm14, %v3670_v56, 0.0 }
 0x86d   : > { %2291 = vmatmul.mubr.msk.bf16.vlgmr.msra.gmra.mrb[8].mxu0 %vm1331_vm14, %v1341_v57 }
 0x86e   : > { %2306 = vmatpush3.xpose.msk.msra.mxu0 %vm1254_vm12, %v1537_v55  ;;  %2307 = vmatprep.mubr.msk.f32.mxu0 %vm3068_vm1, %v3067_v8 }
 0x86f   : > { %2310 = vmatprep.subr.bf16.mxu0 %v3067_v8 }
 0x875   : > { %2308 = vmatmul.mubr.msk.f32.vlgmr.msra.gmra.mrb[12].mxu0 %vm1254_vm12, %v1535_v59 }
 0x876   : > { %2312 = vmatprep.mubr.msk.bf16.mxu0 %vm3068_vm1, %v3067_v8 }
 0x8ce   : > { %v1475_v60 = vpop.xlane.xlu0 %1474 }
 0x8cf   : > { %v1476_v61 = vsub.f32 %v1469_v49, %v1475_v60 }
 0x8d1   : > { %v1477_v62 = vmul.f32 1.442695, %v1476_v61 }
 0x8d2   : > { %v1484_v63 = vpop.permute.xlu0 %1483 }
 0x8d3   : > { %2578 = vpow2.f32 %v1477_v62  ;;  %v1489_v1 = vsel %vm1348_vm13, %v1484_v63, 0 }
 0x8d4   : > { %2300 = vmatpush3.bf16.msra.mxu1 %v1489_v1 }
 0x8d5   : > { %2316 = vmatprep.subr.mxu1 %v3067_v8 }
 0x8dd   : > { %v2579_v2 = vpop.eup %2578 }
 0x8de   : > { %v1482_v3 = vpack.c.bf16 %v2579_v2, %v2579_v2  ;;  %v1479_v13 = vsel %vm1331_vm14, %v2579_v2, 0.0 }
 0x8e0   : > { %2302 = vmatmul.mubr.msk.bf16.vlgmr.msra.gmra.mrb[12].mxu1 %vm1331_vm14, %v1482_v3  ;;  %v2167_v3 = vld [vmem:[#allocation22] ss:$0 sm:$0xff] }
 0x8e1   : > { %2317 = vmatpush3.xpose.msk.msra.mxu1 %vm1254_vm12, %v1676_v58  ;;  %2318 = vmatprep.mubr.msk.f32.mxu1 %vm3068_vm1, %v3067_v8 }
 0x8e2   : > { %2321 = vmatprep.subr.bf16.mxu1 %v3067_v8 }
 0x8e8   : > { %2319 = vmatmul.mubr.msk.f32.vlgmr.msra.gmra.mrb[16].mxu1 %vm1254_vm12, %v1674_v4  ;;  %v1835_v4 = vadd.f32 %v2167_v3, %v3591_v0 }
 0x8e9   : > { %2323 = vmatprep.mubr.msk.bf16.mxu1 %vm3068_vm1, %v3067_v8 }
 0x940   : > { %v3692_v5 = vpop.f32.mrb[8].mxu0 }
 0x941   : > { %v2292_v6 = vpop.f32.mrb[9].mxu0 }
 0x942   : > { %v1389_v7 = vpop.f32.mrb[10].mxu0 }
 0x943   : > { %v2293_v9 = vpop.f32.mrb[11].mxu0 }
 0x948   : > { %v1608_v10 = vpop.f32.mrb[12].mxu0 }
 0x949   : > { %v2309_v11 = vpop.f32.mrb[13].mxu0  ;;  %v1612_v12 = vsel %vm1331_vm14, %v1608_v10, -inf }
 0x94a   : > { %1613 = vmax.xlane.f32.xlu1 %v1612_v12 }
 0x95b   : > { %1622 = vrot.lane.b32.xlu1 %v3652_v32, %s3074_s18  ;;  %s3722_s18 = scalar_lea.hbm %s3830_s3, %s2172_s29 }
 0x97f   : > { %1480 = vadd.xlane.f32.xlu1 %v1479_v13 }
 0x9b3   : > { %v1525_v14 = vpop.f32.mrb[12].mxu1 }
 0x9b4   : > { %v2303_v15 = vpop.f32.mrb[13].mxu1 }
 0x9b5   : > { %v1528_v16 = vpop.f32.mrb[14].mxu1 }
 0x9b6   : > { %v2304_v17 = vpop.f32.mrb[15].mxu1 }
 0x9bb   : > { %v1747_v18 = vpop.f32.mrb[16].mxu1 }
 0x9bc   : > { %v2320_v19 = vpop.f32.mrb[17].mxu1  ;;  %v1751_v20 = vsel %vm1331_vm14, %v1747_v18, -inf }
 0x9bd   : > { %1752 = vmax.xlane.f32.xlu0 %v1751_v20 }
 0x9d3   : > { %1761 = vrot.lane.b32.xlu0 %v3652_v32, %s3075_s17  ;;  %s3079_s17 = smov [#allocation23]  }
 0x9d7   : > { %v1614_v21 = vpop.xlane.xlu1 %1613 }
 0x9d8   : > { %v1615_v22 = vsub.f32 %v1608_v10, %v1614_v21 }
 0x9da   : > { %v1616_v23 = vmul.f32 1.442695, %v1615_v22 }
 0x9db   : > { %v1623_v24 = vpop.permute.xlu1 %1622 }
 0x9dc   : > { %2580 = vpow2.f32 %v1616_v23  ;;  %v1628_v25 = vsel %vm1348_vm13, %v1623_v24, 0 }
 0x9dd   : > { %2311 = vmatpush3.bf16.msra.mxu0 %v1628_v25 }
 0x9de   : > { %2327 = vmatprep.subr.bf16.mxu0 %v3067_v8 }
 0x9e6   : > { %v2581_v26 = vpop.eup %2580 }
 0x9e7   : > { %v1621_v27 = vpack.c.bf16 %v2581_v26, %v2581_v26  ;;  %v1618_v29 = vsel %vm1331_vm14, %v2581_v26, 0.0 }
 0x9e9   : > { %2313 = vmatmul.mubr.msk.bf16.vlgmr.msra.gmra.mrb[16].mxu0 %vm1331_vm14, %v1621_v27 }
 0x9ea   : > { %2331 = vmatprep.mubr.msk.bf16.mxu0 %vm3068_vm1, %v3067_v8  ;;  %2328 = vmatpush3.bf16.msra.mxu0 %v2556_v43 }
 0x9eb   : > { %2329 = vmatprep.subr.bf16.mxu0 %v3067_v8 }
 0x9ee   : > { %2330 = vmatpush3.bf16.msra.mxu0 %v2557_v50 }
 0x9f2   : > { %1619 = vadd.xlane.f32.xlu0 %v1618_v29 }
 0x9f6   : > { %1339 = vadd.xlane.f32.xlu0 %v1338_v30 }
 0xa0c   : > { %v1481_v39 = vpop.xlane.xlu1 %1480 }
 0xa4a   : > { %v1753_v33 = vpop.xlane.xlu0 %1752 }
 0xa4b   : > { %v1754_v34 = vsub.f32 %v1747_v18, %v1753_v33 }
 0xa4d   : > { %v1755_v35 = vmul.f32 1.442695, %v1754_v34 }
 0xa4e   : > { %v1762_v36 = vpop.permute.xlu0 %1761 }
 0xa4f   : > { %2582 = vpow2.f32 %v1755_v35  ;;  %v1767_v37 = vsel %vm1348_vm13, %v1762_v36, 0 }
 0xa50   : > { %2322 = vmatpush3.bf16.msra.mxu1 %v1767_v37  ;;  %2584 = vrcp.f32 %v1481_v39 }
 0xa59   : > { %v2583_v38 = vpop.eup %2582 }
 0xa5a   : > { %v1757_v40 = vsel %vm1331_vm14, %v2583_v38, 0.0  ;;  %v1760_v41 = vpack.c.bf16 %v2583_v38, %v2583_v38  ;;  %v2585_v42 = vpop.eup %2584 }
 0xa5b   : > { %1758 = vadd.xlane.f32.xlu1 %v1757_v40  ;;  %v1533_v31 = vmul.f32 %v2585_v42, %v1525_v14 }
 0xa5c   : > { %2324 = vmatmul.mubr.msk.bf16.vlgmr.msra.gmra.mrb[20].mxu1 %vm1331_vm14, %v1760_v41 }
 0xa6c   : > { %1813 = vrot.lane.b32.xlu1 %v1533_v31, %s3076_s23  ;;  %s2962_s23 = sshll.u32 %s3079_s17, 4  ;;  %s2963_s23 = int_to_ptr.vmem [resolvable:$false] %s2962_s23 }
 0xa6d   : > { %p2965_p12 = scmp.lt.s32.totalorder %s3724_s0, %s2963_s23 }
 0xa7f   : > { %v1620_v32 = vpop.xlane.xlu0 %1619 }
 0xa80   : > { %2586 = vrcp.f32 %v1620_v32 }
 0xa83   : > { %v1340_v56 = vpop.xlane.xlu0 %1339 }
 0xa8a   : > { %v2587_v44 = vpop.eup %2586 }
 0xabc   : > { %v1664_v45 = vpop.f32.mrb[16].mxu0 }
 0xabd   : > { %v1672_v28 = vmul.f32 %v2587_v44, %v1664_v45  ;;  %v2314_v46 = vpop.f32.mrb[17].mxu0 }
 0xabe   : > { %v1667_v47 = vpop.f32.mrb[18].mxu0 }
 0xabf   : > { %v2315_v48 = vpop.f32.mrb[19].mxu0  ;;  %1817 = vrot.lane.b32.xlu0 %v1672_v28, %s3077_s4  ;;  %s2964_s4 = scalar_lea.vmem %s2963_s23, 256 }
 0xac0   : > { %p2966_p8 = scmp.lt.s32.totalorder %s2964_s4, %s2958_s13 }
 0xac2   : > { %p2967_p5 = por %p2966_p8, %p2965_p12 }
 0xac4   : > { %p2968_p7 = pnand %p2967_p5, %p2961_p11 }
 0xae8   : > { %v1759_v49 = vpop.xlane.xlu1 %1758 }
 0xae9   : > { %2588 = vrcp.f32 %v1759_v49 }
 0xaea   : > { %2590 = vrcp.f32 %v1340_v56 }
 0xaec   : > { %v1814_v58 = vpop.permute.xlu1 %1813 }
 0xaf3   : > { %v2589_v51 = vpop.eup %2588 }
 0xaf4   : > { %v2591_v57 = vpop.eup %2590 }
 0xaf5   : > { %v1394_v59 = vmul.f32 %v2591_v57, %v3692_v5 }
 0xaf7   : > { %v1824_v61 = vsel %vm1331_vm14, %v1394_v59, %v1814_v58 }
 0xb2f   : > { %v1803_v52 = vpop.f32.mrb[20].mxu1 }
 0xb30   : > { %v1811_v53 = vmul.f32 %v2589_v51, %v1803_v52  ;;  %v2325_v54 = vpop.f32.mrb[21].mxu1 }
 0xb31   : > { %v1806_v55 = vpop.f32.mrb[22].mxu1  ;;  %v1818_v60 = vpop.permute.xlu0 %1817 }
 0xb32   : > { %1821 = vrot.lane.b32.xlu1 %v1811_v53, %s3078_s24  ;;  %v2326_v8 = vpop.f32.mrb[23].mxu1  ;;  %v1825_v62 = vsel %vm1254_vm12, %v1824_v61, %v1818_v60 }
 0xba4   : > { %v1822_v63 = vpop.permute.xlu1 %1821 }
 0xba5   : > { %v1827_v1 = vsel %vm1826_vm15, %v1825_v62, %v1822_v63 }
 0xba6   : > { %v1836_v2 = vpack.c.bf16 %v1827_v1, %v1827_v1 }
 0xba8   : > { %2332 = vmatmul.mubr.msk.bf16.vlgmr.msra.gmra.mrb[20].mxu0 %vm620_vm0, %v1836_v2 }
 0xc7b   : > { %v1890_v5 = vpop.f32.mrb[20].mxu0 }
 0xc7c   : > { %v1896_v6 = vadd.f32 %v1890_v5, %v1835_v4  ;;  %v2333_v7 = vpop.f32.mrb[21].mxu0 }
 0xc7d   : > { %v1893_v9 = vpop.f32.mrb[22].mxu0 }
 0xc7e   : > { %v2334_v10 = vpop.f32.mrb[23].mxu0  ;;  %1897 = vst.msk [vmem:[%s615_s2] sm:$0xff] %vm620_vm0, %v1896_v6 }
 0xc7f   : > { %2971 = shalt.err (!%p2968_p7)
}
 0xc80   : > { %s2972_s19 = scalar_lea.hbm %s3722_s18, 128  ;;  %s2976_s2 = scalar_lea.hbm %s3830_s3, 256 }
 0xc81   : > { %p2973_p6 = scmp.ne.s32.totalorder %s3722_s18, %s2972_s19  ;;  %p2977_p1 = scmp.lt.u32.totalorder %s3722_s18, %s3830_s3 }
 0xc82   : > { %p2978_p13 = scmp.lt.u32.totalorder %s2976_s2, %s2972_s19  ;;  %p2980_p2 = scmp.lt.u32.totalorder %s2972_s19, %s3722_s18 }
 0xc83   : > { %p2974_p9 = pnand %p2973_p6, %p3831_p3 }
 0xc84   : > { %p2979_p0 = por %p2978_p13, %p2977_p1 }
 0xc85   : > { %p2975_p4 = pneg %p2974_p9 }
 0xc86   : > { %p2981_p10 = por %p2980_p2, %p2979_p0 }
 0xc88   : > { %p2982_p11 = pnand %p2981_p10, %p2975_p4 }
 0xc8a   : > { %2985 = shalt.err (!%p2982_p11)
}
 0xc8b   : > { %2421 = dma.vmem_to_hbm [thread:$0]  (%p3831_p3), %s3724_s0, 128, %s3722_s18, %s1899_s14  }
 0xc8c PF: > { %s1924_s13 = sand.u32 1, %s3036_s25   ;;  %p3832_p12 = scmp.ne.s32.totalorder %s3813_s15, 0 }
 0xc8d   : > { %p3833_p8 = scmp.ge.s32.totalorder %s3048_s28, 2  ;;  %s1925_s17 = scalar_lea.sflag [#allocation4], %s1924_s13 }
 0xc8f   : > { %p2465_p5 = pnand %p3833_p8, %p3832_p12 }
 0xc91   : > { %3031 = dma.done.wait (!%p2465_p5), %s1925_s17, 128  }
 0xc92   : > { %3033 = vsyncadd (!%p2465_p5), %s1925_s17, 4294967168  ;;  %p32_p7 = scmp.ge.s32.totalorder %s3481_s16, 4   ;;  %s3834_s25 = smov %s3040_s26 }
 0xc93   : > { %s3835_s26 = smov %s3044_s27  ;;  %s3836_s27 = smov %s3492_s1 }
 0xc94   : > { %s3837_s28 = smov %s3481_s16  ;;  %34 = sbr.rel (!%p32_p7) target bundleno = 18 (0x12), region = 165 }
 0xc9b   :  { %1930 = vsyncpa [#allocation3], 1 }
 0xc9c   :  { %1932 = vsyncpa [#allocation3 + $0x1], 1 }
 0xc9d   :  { %1933 = vsyncpa [#allocation6], 1 }
 0xc9e   :  { %1934 = vsyncpa [#allocation9], 1 }
 0xc9f   :  { %1935 = vsyncpa [#allocation12], 1 }
 0xca0   :  { %1936 = vsyncpa [#allocation15], 1 }
 0xca1   :  { %1937 = vsyncpa [#allocation18], 1 }
 0xca2   :  { %1938 = vsyncpa [#allocation21], 1 }
 0xca3   :  { %1939 = vsyncpa [#allocation4], 1 }
 0xca4   :  { %1941 = vsyncpa [#allocation4 + $0x1], 1 }

</bundles_post_ra>
